<compile_context>
chip_gen: v7x
topology: tpu7x:2x2x1
jax: 0.10.0
libtpu: 0.0.40
codegen_flags: <defaults>
</compile_context>

<pallas_src>
import jax
import jax.numpy as jnp
from jax.experimental import pallas as pl
from jax.experimental.pallas import tpu as pltpu

# hyper-params from the PyTorch module
P_, Q_, R_ = 0.75, 0.75, 2
R1_, R2_ = 0.5, 0.25
NEG_SLOPE = 0.25  # LeakyReLU(0.25)

# conv name -> (Cout, Cin, groups)
_CONV_SPECS = {
    "conv1":  (round(32 * Q_),        round(R_ ** 2),   1),
    "conv2":  (round(32 * (1 - Q_)),  round(R_ ** 4),   1),
    "conv3":  (round(32 * R1_),       32,               round(R_ ** 2)),
    "conv4":  (32,                    round(32 * R1_),  round(R_ ** 2)),
    "conv5":  (round(32 * R2_),       32,               1),
    "conv6":  (32,                    round(32 * R2_),  1),
    "conv7":  (round(16 * P_),        32,               round(R_ ** 2)),
    "conv8":  (round(16 * (1 - P_)),  round(R_ ** 2),   1),
    "conv9":  (round(16 * R1_),       16,               round(R_ ** 2)),
    "conv10": (16,                    round(16 * R1_),  round(R_ ** 2)),
    "conv11": (round(16 * R2_),       16,               1),
    "conv12": (16,                    round(16 * R2_),  1),
    "conv13": (8,                     16,               round(R_ ** 2)),
    "conv14": (round(R_ ** 4),        8,                round(R_ ** 2)),
    "conv15": (round(R_ ** 2),        1,                1),
}

_MAX_C = 32      # widest activation anywhere in the network
_MAX_CIN = 32    # widest conv input -> max K = 9 * 32 = 288

# "representation" channel counts used inside the kernel.  Inputs/outputs of
# every conv are kept at a multiple of 8 channels (zero-padded rows/columns) so
# that every sublane concat / weight-row slice is 8-aligned.  _OUT_SHIFT places
# a conv's true output channels inside its (zero) padded block so that
# torch.cat((a, b), dim=0) becomes a plain add of two same-shaped blocks.
_REP_CIN = {1: 8, 2: 16, 3: 32, 4: 16, 5: 32, 6: 8, 7: 32, 8: 8,
            9: 16, 10: 8, 11: 16, 12: 8, 13: 16, 14: 8, 15: 1}
_REP_COUT = {1: 32, 2: 32, 3: 16, 4: 32, 5: 8, 6: 32, 7: 16, 8: 16,
             9: 8, 10: 16, 11: 8, 12: 16, 13: 8, 14: 16, 15: 8}
_OUT_SHIFT = {i: 0 for i in range(1, 16)}
_OUT_SHIFT[2] = 24   # conv2 -> channels 24..31 of the stage-1 concat
_OUT_SHIFT[8] = 12   # conv8 -> channels 12..15 of the stage-2 concat


def _row_offsets():
    offs, off = {}, 0
    for i in range(1, 16):
        offs[i] = off
        off += _REP_COUT[i]
    return offs, off


_ROW_OFF, _W_ROWS = _row_offsets()      # 264 rows total


def _leaky(x):
    return jnp.where(x >= 0, x, NEG_SLOPE * x)


# --------------------------------------------------------------------------
# The fused kernel
# --------------------------------------------------------------------------
def _make_lern_kernel(Hs, Ws, H, W):
    """Fused LERN kernel for half-res (Hs, Ws) and full-res (H, W)."""
    Hp, Wp = Hs + 2, Ws + 2
    Np = Hp * Wp                       # flattened zero-padded half-res grid
    Np_ext = Np + 2 * Wp + 2           # + zero tail so every shift is a slice
    Hpf, Wpf = H + 2, W + 2
    Npf = Hpf * Wpf
    Npf_ext = Npf + 2 * Wpf + 2

    def kernel(mask_ref, lr_ref, htt_ref, lr1_ref, x_ref, w_ref, b_ref,
               o15_ref, oh_ref):
        mask = mask_ref[...]                                   # (1, Np)

        def ext(a):
            """OUT-form (C, Np) -> EXT-form (C, Np_ext) zero-padded conv input.

            Valid pixels move from flat y*Wp+x to (y+1)*Wp+(x+1); the mask
            zeroes the garbage lanes so the 1-pixel border is exactly zero."""
            a = a * mask
            z = jnp.zeros((a.shape[0], Wp + 1), jnp.float32)
            return jnp.concatenate([z, a, z], axis=1)

        def conv(p_ext, idx):
            """3x3 conv as ONE MXU dot on an in-kernel im2col matrix."""
            cin_r, cout_r = _REP_CIN[idx], _REP_COUT[idx]
            assert p_ext.shape == (cin_r, Np_ext)
            off = _ROW_OFF[idx]
            # nine lane-shifted views of the flattened padded activation
            parts = [p_ext[:, dy * Wp + dx: dy * Wp + dx + Np]
                     for dy in range(3) for dx in range(3)]
            col = jnp.concatenate(parts, axis=0)               # (9*cin_r, Np)
            w = w_ref[off:off + cout_r, 0:9 * cin_r]           # (cout_r, 9*cin_r)
            b = b_ref[0:cout_r, idx - 1:idx]                   # (cout_r, 1)
            out = jnp.dot(w, col, preferred_element_type=jnp.float32)
            return out + b                                     # OUT-form (cout_r, Np)

        # ------------------ stage 1 (half-res, <=32 channels) ---------------
        cat1 = conv(lr_ref[...], 1) + conv(htt_ref[...], 2)    # torch.cat -> add
        lrrt = cat1                                            # (32, Np)
        t = _leaky(conv(ext(_leaky(cat1)), 3))                 # (16, Np)
        t = conv(ext(t), 4)                                    # (32, Np)
        lrrrt = t
        t = _leaky(conv(ext(t), 5))                            # (8, Np)
        gate = jax.nn.sigmoid(conv(ext(t), 6))                 # (32, Np)
        s1 = lrrt + lrrrt * gate                               # (32, Np)

        # ------------------ stage 2 ------------------
        cat2 = conv(ext(s1), 7) + conv(lr1_ref[...], 8)        # (16, Np)
        lrrt = cat2
        t = _leaky(conv(ext(_leaky(cat2)), 9))                 # (8, Np)
        t = conv(ext(t), 10)                                   # (16, Np)
        lrrrt = t
        t = _leaky(conv(ext(t), 11))                           # (8, Np) rows 4..7 = 0
        gate = jax.nn.sigmoid(conv(ext(t), 12))                # (16, Np)
        s2 = lrrt + lrrrt * gate                               # (16, Np)
        t = conv(ext(s2), 13)                                  # (8, Np)
        hstt = _leaky(conv(ext(t), 14))                        # (16, Np)
        oh_ref[...] = hstt                                     # lane-dense store

        # --------- conv15 on the full-res frame (Cin=1): VPU FMAs -----------
        off15 = _ROW_OFF[15]
        w15 = w_ref[off15:off15 + 4, 0:9]                      # (4, 9)
        xf = x_ref[...]                                        # (1, Npf_ext)
        acc = jnp.zeros((4, Npf), jnp.float32)
        k = 0
        for dy in range(3):
            for dx in range(3):
                s = dy * Wpf + dx
                acc = acc + w15[:, k:k + 1] * xf[:, s:s + Npf]
                k += 1
        acc = acc + b_ref[0:4, 14:15]
        o15_ref[...] = acc                                     # lane-dense store

    return kernel


# --------------------------------------------------------------------------
# Forward wrapper: layout glue only (pad / unshuffle / shuffle / crop)
# --------------------------------------------------------------------------
def _pixel_unshuffle_chw(x, rr):
    C, H, W = x.shape
    x = x.reshape(C, H // rr, rr, W // rr, rr)
    return jnp.transpose(x, (0, 2, 4, 1, 3)).reshape(C * rr * rr, H // rr, W // rr)


def _pixel_shuffle_chw(x, rr):
    Crr, H, W = x.shape
    C = Crr // (rr * rr)
    x = x.reshape(C, rr, rr, H, W)
    return jnp.transpose(x, (0, 3, 1, 4, 2)).reshape(C, H * rr, W * rr)


def _to_ext(img_chw, hh, ww):
    """(C, hh, ww) -> flattened zero-padded EXT-form (C, (hh+2)*(ww+2)+2*(ww+2)+2)."""
    wp = ww + 2
    c = img_chw.shape[0]
    p = jnp.pad(img_chw, ((0, 0), (1, 1), (1, 1))).reshape(c, (hh + 2) * wp)
    return jnp.pad(p, ((0, 0), (0, 2 * wp + 2)))


def lern_forward(packed, x, x1, htt):
    """x, x1: (1,H,W); htt: (16, H/2, W/2) -> ((1,2H,2W), (16,H/2,W/2))."""
    w_all, b_all = packed
    _, H, W = x.shape
    Hs, Ws = H // R_, W // R_
    Hp, Wp = Hs + 2, Ws + 2
    Np = Hp * Wp
    Hpf, Wpf = H + 2, W + 2
    Npf = Hpf * Wpf

    # pixel_unshuffle + channel padding to 8 (matches _REP_CIN) + EXT padding
    lr_u = jnp.pad(_pixel_unshuffle_chw(x, R_), ((0, 4), (0, 0), (0, 0)))
    lr1_u = jnp.pad(_pixel_unshuffle_chw(x1, R_), ((0, 4), (0, 0), (0, 0)))
    lr_e = _to_ext(lr_u, Hs, Ws)                 # (8, Np_ext)
    lr1_e = _to_ext(lr1_u, Hs, Ws)               # (8, Np_ext)
    htt_e = _to_ext(htt, Hs, Ws)                 # (16, Np_ext)
    x_e = _to_ext(x, H, W)                       # (1, Npf_ext)

    # valid-window mask on the flattened padded half-res grid (const under jit)
    mask = ((jnp.arange(Hp)[:, None] < Hs) & (jnp.arange(Wp)[None, :] < Ws))
    mask = mask.astype(jnp.float32).reshape(1, Np)

    vmem = pl.BlockSpec(memory_space=pltpu.MemorySpace.VMEM)
    o15, oh = pl.pallas_call(
        _make_lern_kernel(Hs, Ws, H, W),
        in_specs=[vmem] * 7,
        out_specs=(vmem, vmem),
        out_shape=(jax.ShapeDtypeStruct((4, Npf), jnp.float32),
                   jax.ShapeDtypeStruct((16, Np), jnp.float32)),
        compiler_params=pltpu.CompilerParams(
            vmem_limit_bytes=32 * 1024 * 1024),
    )(mask, lr_e, htt_e, lr1_e, x_e, w_all, b_all)

    # crop valid windows + pixel shuffles + final add (pure layout glue)
    hstt = oh.reshape(16, Hp, Wp)[:, :Hs, :Ws]                 # (16, Hs, Ws)
    c15 = o15.reshape(4, Hpf, Wpf)[:, :H, :W]                  # (4, H, W)
    out_x = _pixel_shuffle_chw(c15, R_) + _pixel_shuffle_chw(hstt, R_ ** 2)
    return out_x, hstt


# --------------------------------------------------------------------------
# Parameters (PyTorch-default-style uniform init) and one-time packing
# --------------------------------------------------------------------------
def init_params(key):
    params = {}
    for name, (cout, cin, groups) in _CONV_SPECS.items():
        key, kw, kb = jax.random.split(key, 3)
        fan_in = (cin // groups) * 9
        bound = 1.0 / (fan_in ** 0.5)
        w = jax.random.uniform(kw, (cout, cin // groups, 3, 3),
                               jnp.float32, -bound, bound)
        b = jax.random.uniform(kb, (cout,), jnp.float32, -bound, bound)
        params[name] = (w, b, groups)
    return params


def _dense_weight(w, cin, groups):
    """Grouped (Cout,Cin/G,3,3) -> dense block-diagonal (Cout,Cin,3,3) (bit-exact)."""
    cout = w.shape[0]
    if groups == 1:
        return w
    cin_g, cout_g = cin // groups, cout // groups
    dense = jnp.zeros((cout, cin, 3, 3), w.dtype)
    for g in range(groups):
        dense = dense.at[g * cout_g:(g + 1) * cout_g,
                         g * cin_g:(g + 1) * cin_g].set(
                             w[g * cout_g:(g + 1) * cout_g])
    return dense


def pack_params(params):
    """Pack all 15 convs into ONE weight matrix and ONE bias matrix (done once).

    w_all[row_off_i + shift_i + co, (ky*3+kx)*rep_cin_i + c] = w_i[co, c, ky, kx]
    b_all[shift_i + co, i-1] = b_i[co]; all other entries are zero."""
    w_all = jnp.zeros((_W_ROWS, 9 * _MAX_CIN), jnp.float32)    # (264, 288)
    b_all = jnp.zeros((_MAX_C, 15), jnp.float32)               # (32, 15)
    for i in range(1, 16):
        cout, cin, groups = _CONV_SPECS[f"conv{i}"]
        w, b, _ = params[f"conv{i}"]
        rep_cin, rep_cout, sh = _REP_CIN[i], _REP_COUT[i], _OUT_SHIFT[i]
        assert cin <= rep_cin and cout + sh <= rep_cout
        wd = _dense_weight(w, cin, groups)                     # (cout, cin, 3, 3)
        wt = jnp.transpose(wd, (0, 2, 3, 1))                   # (cout, 3, 3, cin)
        wk = jnp.zeros((cout, 3, 3, rep_cin), jnp.float32).at[..., :cin].set(wt)
        off = _ROW_OFF[i] + sh
        w_all = w_all.at[off:off + cout, 0:9 * rep_cin].set(
            wk.reshape(cout, 9 * rep_cin))
        b_all = b_all.at[sh:sh + cout, i - 1].set(b)
    return w_all, b_all


# --------------------------------------------------------------------------
# Plain-JAX reference (for the numerical self-check in __main__)
# --------------------------------------------------------------------------
def _conv_ref(x_chw, w, b, groups):
    out = jax.lax.conv_general_dilated(
        x_chw[None], w, window_strides=(1, 1), padding=((1, 1), (1, 1)),
        dimension_numbers=("NCHW", "OIHW", "NCHW"),
        feature_group_count=groups, precision=jax.lax.Precision.HIGHEST)
    return out[0] + b[:, None, None]


def lern_forward_ref(params, x, x1, htt):
    def cv(name, inp):
        w, b, g = params[name]
        return _conv_ref(inp, w, b, g)

    lrt = _pixel_unshuffle_chw(x, R_)
    lrt = cv("conv1", lrt)
    hstt = cv("conv2", htt)
    lrt = jnp.concatenate([lrt, hstt], axis=0)
    lrrt = lrt
    lrt = _leaky(lrt)
    lrt = _leaky(cv("conv3", lrt))
    lrt = cv("conv4", lrt)
    lrrrt = lrt
    lrt = _leaky(cv("conv5", lrt))
    lrt = jax.nn.sigmoid(cv("conv6", lrt))
    lrt = lrrt + lrrrt * lrt
    lrt = cv("conv7", lrt)
    lrt1 = _pixel_unshuffle_chw(x1, R_)
    lrt1 = cv("conv8", lrt1)
    lrt = jnp.concatenate([lrt, lrt1], axis=0)
    lrrt = lrt
    lrt = _leaky(lrt)
    lrt = _leaky(cv("conv9", lrt))
    lrt = cv("conv10", lrt)
    lrrrt = lrt
    lrt = _leaky(cv("conv11", lrt))
    lrt = jax.nn.sigmoid(cv("conv12", lrt))
    lrt = lrrt + lrrrt * lrt
    lrt = cv("conv13", lrt)
    lrt = _leaky(cv("conv14", lrt))
    hstt = lrt
    xo = _pixel_shuffle_chw(cv("conv15", x), R_)
    lrt = _pixel_shuffle_chw(hstt, R_ ** 2)
    return xo + lrt, hstt


# --------------------------------------------------------------------------
if __name__ == "__main__":
    key = jax.random.PRNGKey(0)
    kx, kx1, kh, kp = jax.random.split(key, 4)

    H = W = 16
    # unbatched CHW inputs, as in the PyTorch module (3-D conv inputs)
    x = jax.random.normal(kx, (1, H, W), jnp.float32)
    x1 = jax.random.normal(kx1, (1, H, W), jnp.float32)
    htt = jax.random.uniform(kh, (round(R_ ** 4), H // R_, W // R_), jnp.float32)

    params = init_params(kp)
    packed = pack_params(params)           # one-time weight/bias packing

    fwd = jax.jit(lern_forward)
    out_x, out_h = fwd(packed, x, x1, htt)
    jax.block_until_ready((out_x, out_h))

    assert out_x.shape == (1, R_ * H, R_ * W)
    assert out_h.shape == (round(R_ ** 4), H // R_, W // R_)

    # numerical self-check against a plain-JAX reference
    ref_fn = jax.jit(lambda a, b, c: lern_forward_ref(params, a, b, c))
    ref_x, ref_h = ref_fn(x, x1, htt)
    assert float(jnp.max(jnp.abs(out_x - ref_x))) < 2e-3
    assert float(jnp.max(jnp.abs(out_h - ref_h))) < 2e-3

    print("KERNEL_OK")
</pallas_src>

<mosaic_0001>
module attributes {stable_mosaic.version = 11 : i64} {
  func.func @kernel(%arg0: memref<1x100xf32, #tpu.memory_space<vmem>>, %arg1: memref<8x122xf32, #tpu.memory_space<vmem>>, %arg2: memref<16x122xf32, #tpu.memory_space<vmem>>, %arg3: memref<8x122xf32, #tpu.memory_space<vmem>>, %arg4: memref<1x362xf32, #tpu.memory_space<vmem>>, %arg5: memref<264x288xf32, #tpu.memory_space<vmem>>, %arg6: memref<32x15xf32, #tpu.memory_space<vmem>>, %arg7: memref<4x324xf32, #tpu.memory_space<vmem>>, %arg8: memref<16x100xf32, #tpu.memory_space<vmem>>) attributes {dimension_semantics = [], scalar_prefetch = 0 : i64, scratch_operands = 0 : i64, tpu.core_type = #tpu.core_type<tc>} {
    %c0 = arith.constant 0 : index
    %c0_0 = arith.constant 0 : index
    %0 = vector.load %arg0[%c0, %c0_0] : memref<1x100xf32, #tpu.memory_space<vmem>>, vector<1x100xf32>
    %c0_1 = arith.constant 0 : index
    %c0_2 = arith.constant 0 : index
    %1 = vector.load %arg1[%c0_1, %c0_2] : memref<8x122xf32, #tpu.memory_space<vmem>>, vector<8x122xf32>
    %2 = vector.extract_strided_slice %1 {offsets = [0, 0], sizes = [8, 100], strides = [1, 1]} : vector<8x122xf32> to vector<8x100xf32>
    %3 = vector.extract_strided_slice %1 {offsets = [0, 1], sizes = [8, 100], strides = [1, 1]} : vector<8x122xf32> to vector<8x100xf32>
    %4 = vector.extract_strided_slice %1 {offsets = [0, 2], sizes = [8, 100], strides = [1, 1]} : vector<8x122xf32> to vector<8x100xf32>
    %5 = vector.extract_strided_slice %1 {offsets = [0, 10], sizes = [8, 100], strides = [1, 1]} : vector<8x122xf32> to vector<8x100xf32>
    %6 = vector.extract_strided_slice %1 {offsets = [0, 11], sizes = [8, 100], strides = [1, 1]} : vector<8x122xf32> to vector<8x100xf32>
    %7 = vector.extract_strided_slice %1 {offsets = [0, 12], sizes = [8, 100], strides = [1, 1]} : vector<8x122xf32> to vector<8x100xf32>
    %8 = vector.extract_strided_slice %1 {offsets = [0, 20], sizes = [8, 100], strides = [1, 1]} : vector<8x122xf32> to vector<8x100xf32>
    %9 = vector.extract_strided_slice %1 {offsets = [0, 21], sizes = [8, 100], strides = [1, 1]} : vector<8x122xf32> to vector<8x100xf32>
    %10 = vector.extract_strided_slice %1 {offsets = [0, 22], sizes = [8, 100], strides = [1, 1]} : vector<8x122xf32> to vector<8x100xf32>
    %11 = tpu.concatenate %2, %3, %4, %5, %6, %7, %8, %9, %10 in 0 : vector<8x100xf32>, vector<8x100xf32>, vector<8x100xf32>, vector<8x100xf32>, vector<8x100xf32>, vector<8x100xf32>, vector<8x100xf32>, vector<8x100xf32>, vector<8x100xf32> -> vector<72x100xf32>
    %c0_3 = arith.constant 0 : index
    %c0_4 = arith.constant 0 : index
    %12 = vector.load %arg5[%c0_3, %c0_4] : memref<264x288xf32, #tpu.memory_space<vmem>>, vector<32x72xf32>
    %c0_5 = arith.constant 0 : index
    %c0_6 = arith.constant 0 : index
    %13 = vector.load %arg6[%c0_5, %c0_6] : memref<32x15xf32, #tpu.memory_space<vmem>>, vector<32x1xf32>
    %cst = arith.constant dense<0.000000e+00> : vector<32x100xf32>
    %14 = tpu.matmul %12, %11, %cst {dimension_numbers = #tpu.dot_dimension_numbers<[1], [0], [0], [1], [0, 0, 1, 1], [], []>} : vector<32x72xf32>, vector<72x100xf32>, vector<32x100xf32> -> vector<32x100xf32>
    %15 = vector.broadcast %13 : vector<32x1xf32> to vector<32x100xf32>
    %16 = arith.addf %14, %15 : vector<32x100xf32>
    %c0_7 = arith.constant 0 : index
    %c0_8 = arith.constant 0 : index
    %17 = vector.load %arg2[%c0_7, %c0_8] : memref<16x122xf32, #tpu.memory_space<vmem>>, vector<16x122xf32>
    %18 = vector.extract_strided_slice %17 {offsets = [0, 0], sizes = [16, 100], strides = [1, 1]} : vector<16x122xf32> to vector<16x100xf32>
    %19 = vector.extract_strided_slice %17 {offsets = [0, 1], sizes = [16, 100], strides = [1, 1]} : vector<16x122xf32> to vector<16x100xf32>
    %20 = vector.extract_strided_slice %17 {offsets = [0, 2], sizes = [16, 100], strides = [1, 1]} : vector<16x122xf32> to vector<16x100xf32>
    %21 = vector.extract_strided_slice %17 {offsets = [0, 10], sizes = [16, 100], strides = [1, 1]} : vector<16x122xf32> to vector<16x100xf32>
    %22 = vector.extract_strided_slice %17 {offsets = [0, 11], sizes = [16, 100], strides = [1, 1]} : vector<16x122xf32> to vector<16x100xf32>
    %23 = vector.extract_strided_slice %17 {offsets = [0, 12], sizes = [16, 100], strides = [1, 1]} : vector<16x122xf32> to vector<16x100xf32>
    %24 = vector.extract_strided_slice %17 {offsets = [0, 20], sizes = [16, 100], strides = [1, 1]} : vector<16x122xf32> to vector<16x100xf32>
    %25 = vector.extract_strided_slice %17 {offsets = [0, 21], sizes = [16, 100], strides = [1, 1]} : vector<16x122xf32> to vector<16x100xf32>
    %26 = vector.extract_strided_slice %17 {offsets = [0, 22], sizes = [16, 100], strides = [1, 1]} : vector<16x122xf32> to vector<16x100xf32>
    %27 = tpu.concatenate %18, %19, %20, %21, %22, %23, %24, %25, %26 in 0 : vector<16x100xf32>, vector<16x100xf32>, vector<16x100xf32>, vector<16x100xf32>, vector<16x100xf32>, vector<16x100xf32>, vector<16x100xf32>, vector<16x100xf32>, vector<16x100xf32> -> vector<144x100xf32>
    %c32 = arith.constant 32 : index
    %c0_9 = arith.constant 0 : index
    %28 = vector.load %arg5[%c32, %c0_9] : memref<264x288xf32, #tpu.memory_space<vmem>>, vector<32x144xf32>
    %c0_10 = arith.constant 0 : index
    %c1 = arith.constant 1 : index
    %29 = vector.load %arg6[%c0_10, %c1] : memref<32x15xf32, #tpu.memory_space<vmem>>, vector<32x1xf32>
    %cst_11 = arith.constant dense<0.000000e+00> : vector<32x100xf32>
    %30 = tpu.matmul %28, %27, %cst_11 {dimension_numbers = #tpu.dot_dimension_numbers<[1], [0], [0], [1], [0, 0, 1, 1], [], []>} : vector<32x144xf32>, vector<144x100xf32>, vector<32x100xf32> -> vector<32x100xf32>
    %31 = vector.broadcast %29 : vector<32x1xf32> to vector<32x100xf32>
    %32 = arith.addf %30, %31 : vector<32x100xf32>
    %33 = arith.addf %16, %32 : vector<32x100xf32>
    %cst_12 = arith.constant 0.000000e+00 : f32
    %34 = vector.broadcast %cst_12 : f32 to vector<32x100xf32>
    %35 = arith.cmpf oge, %33, %34 : vector<32x100xf32>
    %cst_13 = arith.constant 2.500000e-01 : f32
    %36 = vector.broadcast %cst_13 : f32 to vector<32x100xf32>
    %37 = arith.mulf %36, %33 : vector<32x100xf32>
    %38 = arith.select %35, %33, %37 : vector<32x100xi1>, vector<32x100xf32>
    %39 = vector.broadcast %0 : vector<1x100xf32> to vector<32x100xf32>
    %40 = arith.mulf %38, %39 : vector<32x100xf32>
    %cst_14 = arith.constant 0.000000e+00 : f32
    %41 = vector.broadcast %cst_14 : f32 to vector<32x11xf32>
    %42 = tpu.concatenate %41, %40, %41 in 1 : vector<32x11xf32>, vector<32x100xf32>, vector<32x11xf32> -> vector<32x122xf32>
    %43 = vector.extract_strided_slice %42 {offsets = [0, 0], sizes = [32, 100], strides = [1, 1]} : vector<32x122xf32> to vector<32x100xf32>
    %44 = vector.extract_strided_slice %42 {offsets = [0, 1], sizes = [32, 100], strides = [1, 1]} : vector<32x122xf32> to vector<32x100xf32>
    %45 = vector.extract_strided_slice %42 {offsets = [0, 2], sizes = [32, 100], strides = [1, 1]} : vector<32x122xf32> to vector<32x100xf32>
    %46 = vector.extract_strided_slice %42 {offsets = [0, 10], sizes = [32, 100], strides = [1, 1]} : vector<32x122xf32> to vector<32x100xf32>
    %47 = vector.extract_strided_slice %42 {offsets = [0, 11], sizes = [32, 100], strides = [1, 1]} : vector<32x122xf32> to vector<32x100xf32>
    %48 = vector.extract_strided_slice %42 {offsets = [0, 12], sizes = [32, 100], strides = [1, 1]} : vector<32x122xf32> to vector<32x100xf32>
    %49 = vector.extract_strided_slice %42 {offsets = [0, 20], sizes = [32, 100], strides = [1, 1]} : vector<32x122xf32> to vector<32x100xf32>
    %50 = vector.extract_strided_slice %42 {offsets = [0, 21], sizes = [32, 100], strides = [1, 1]} : vector<32x122xf32> to vector<32x100xf32>
    %51 = vector.extract_strided_slice %42 {offsets = [0, 22], sizes = [32, 100], strides = [1, 1]} : vector<32x122xf32> to vector<32x100xf32>
    %52 = tpu.concatenate %43, %44, %45, %46, %47, %48, %49, %50, %51 in 0 : vector<32x100xf32>, vector<32x100xf32>, vector<32x100xf32>, vector<32x100xf32>, vector<32x100xf32>, vector<32x100xf32>, vector<32x100xf32>, vector<32x100xf32>, vector<32x100xf32> -> vector<288x100xf32>
    %c64 = arith.constant 64 : index
    %c0_15 = arith.constant 0 : index
    %53 = vector.load %arg5[%c64, %c0_15] : memref<264x288xf32, #tpu.memory_space<vmem>>, vector<16x288xf32>
    %c0_16 = arith.constant 0 : index
    %c2 = arith.constant 2 : index
    %54 = vector.load %arg6[%c0_16, %c2] : memref<32x15xf32, #tpu.memory_space<vmem>>, vector<16x1xf32>
    %cst_17 = arith.constant dense<0.000000e+00> : vector<16x100xf32>
    %55 = tpu.matmul %53, %52, %cst_17 {dimension_numbers = #tpu.dot_dimension_numbers<[1], [0], [0], [1], [0, 0, 1, 1], [], []>} : vector<16x288xf32>, vector<288x100xf32>, vector<16x100xf32> -> vector<16x100xf32>
    %56 = vector.broadcast %54 : vector<16x1xf32> to vector<16x100xf32>
    %57 = arith.addf %55, %56 : vector<16x100xf32>
    %cst_18 = arith.constant 0.000000e+00 : f32
    %58 = vector.broadcast %cst_18 : f32 to vector<16x100xf32>
    %59 = arith.cmpf oge, %57, %58 : vector<16x100xf32>
    %cst_19 = arith.constant 2.500000e-01 : f32
    %60 = vector.broadcast %cst_19 : f32 to vector<16x100xf32>
    %61 = arith.mulf %60, %57 : vector<16x100xf32>
    %62 = arith.select %59, %57, %61 : vector<16x100xi1>, vector<16x100xf32>
    %63 = vector.broadcast %0 : vector<1x100xf32> to vector<16x100xf32>
    %64 = arith.mulf %62, %63 : vector<16x100xf32>
    %cst_20 = arith.constant 0.000000e+00 : f32
    %65 = vector.broadcast %cst_20 : f32 to vector<16x11xf32>
    %66 = tpu.concatenate %65, %64, %65 in 1 : vector<16x11xf32>, vector<16x100xf32>, vector<16x11xf32> -> vector<16x122xf32>
    %67 = vector.extract_strided_slice %66 {offsets = [0, 0], sizes = [16, 100], strides = [1, 1]} : vector<16x122xf32> to vector<16x100xf32>
    %68 = vector.extract_strided_slice %66 {offsets = [0, 1], sizes = [16, 100], strides = [1, 1]} : vector<16x122xf32> to vector<16x100xf32>
    %69 = vector.extract_strided_slice %66 {offsets = [0, 2], sizes = [16, 100], strides = [1, 1]} : vector<16x122xf32> to vector<16x100xf32>
    %70 = vector.extract_strided_slice %66 {offsets = [0, 10], sizes = [16, 100], strides = [1, 1]} : vector<16x122xf32> to vector<16x100xf32>
    %71 = vector.extract_strided_slice %66 {offsets = [0, 11], sizes = [16, 100], strides = [1, 1]} : vector<16x122xf32> to vector<16x100xf32>
    %72 = vector.extract_strided_slice %66 {offsets = [0, 12], sizes = [16, 100], strides = [1, 1]} : vector<16x122xf32> to vector<16x100xf32>
    %73 = vector.extract_strided_slice %66 {offsets = [0, 20], sizes = [16, 100], strides = [1, 1]} : vector<16x122xf32> to vector<16x100xf32>
    %74 = vector.extract_strided_slice %66 {offsets = [0, 21], sizes = [16, 100], strides = [1, 1]} : vector<16x122xf32> to vector<16x100xf32>
    %75 = vector.extract_strided_slice %66 {offsets = [0, 22], sizes = [16, 100], strides = [1, 1]} : vector<16x122xf32> to vector<16x100xf32>
    %76 = tpu.concatenate %67, %68, %69, %70, %71, %72, %73, %74, %75 in 0 : vector<16x100xf32>, vector<16x100xf32>, vector<16x100xf32>, vector<16x100xf32>, vector<16x100xf32>, vector<16x100xf32>, vector<16x100xf32>, vector<16x100xf32>, vector<16x100xf32> -> vector<144x100xf32>
    %c80 = arith.constant 80 : index
    %c0_21 = arith.constant 0 : index
    %77 = vector.load %arg5[%c80, %c0_21] : memref<264x288xf32, #tpu.memory_space<vmem>>, vector<32x144xf32>
    %c0_22 = arith.constant 0 : index
    %c3 = arith.constant 3 : index
    %78 = vector.load %arg6[%c0_22, %c3] : memref<32x15xf32, #tpu.memory_space<vmem>>, vector<32x1xf32>
    %cst_23 = arith.constant dense<0.000000e+00> : vector<32x100xf32>
    %79 = tpu.matmul %77, %76, %cst_23 {dimension_numbers = #tpu.dot_dimension_numbers<[1], [0], [0], [1], [0, 0, 1, 1], [], []>} : vector<32x144xf32>, vector<144x100xf32>, vector<32x100xf32> -> vector<32x100xf32>
    %80 = vector.broadcast %78 : vector<32x1xf32> to vector<32x100xf32>
    %81 = arith.addf %79, %80 : vector<32x100xf32>
    %82 = vector.broadcast %0 : vector<1x100xf32> to vector<32x100xf32>
    %83 = arith.mulf %81, %82 : vector<32x100xf32>
    %cst_24 = arith.constant 0.000000e+00 : f32
    %84 = vector.broadcast %cst_24 : f32 to vector<32x11xf32>
    %85 = tpu.concatenate %84, %83, %84 in 1 : vector<32x11xf32>, vector<32x100xf32>, vector<32x11xf32> -> vector<32x122xf32>
    %86 = vector.extract_strided_slice %85 {offsets = [0, 0], sizes = [32, 100], strides = [1, 1]} : vector<32x122xf32> to vector<32x100xf32>
    %87 = vector.extract_strided_slice %85 {offsets = [0, 1], sizes = [32, 100], strides = [1, 1]} : vector<32x122xf32> to vector<32x100xf32>
    %88 = vector.extract_strided_slice %85 {offsets = [0, 2], sizes = [32, 100], strides = [1, 1]} : vector<32x122xf32> to vector<32x100xf32>
    %89 = vector.extract_strided_slice %85 {offsets = [0, 10], sizes = [32, 100], strides = [1, 1]} : vector<32x122xf32> to vector<32x100xf32>
    %90 = vector.extract_strided_slice %85 {offsets = [0, 11], sizes = [32, 100], strides = [1, 1]} : vector<32x122xf32> to vector<32x100xf32>
    %91 = vector.extract_strided_slice %85 {offsets = [0, 12], sizes = [32, 100], strides = [1, 1]} : vector<32x122xf32> to vector<32x100xf32>
    %92 = vector.extract_strided_slice %85 {offsets = [0, 20], sizes = [32, 100], strides = [1, 1]} : vector<32x122xf32> to vector<32x100xf32>
    %93 = vector.extract_strided_slice %85 {offsets = [0, 21], sizes = [32, 100], strides = [1, 1]} : vector<32x122xf32> to vector<32x100xf32>
    %94 = vector.extract_strided_slice %85 {offsets = [0, 22], sizes = [32, 100], strides = [1, 1]} : vector<32x122xf32> to vector<32x100xf32>
    %95 = tpu.concatenate %86, %87, %88, %89, %90, %91, %92, %93, %94 in 0 : vector<32x100xf32>, vector<32x100xf32>, vector<32x100xf32>, vector<32x100xf32>, vector<32x100xf32>, vector<32x100xf32>, vector<32x100xf32>, vector<32x100xf32>, vector<32x100xf32> -> vector<288x100xf32>
    %c112 = arith.constant 112 : index
    %c0_25 = arith.constant 0 : index
    %96 = vector.load %arg5[%c112, %c0_25] : memref<264x288xf32, #tpu.memory_space<vmem>>, vector<8x288xf32>
    %c0_26 = arith.constant 0 : index
    %c4 = arith.constant 4 : index
    %97 = vector.load %arg6[%c0_26, %c4] : memref<32x15xf32, #tpu.memory_space<vmem>>, vector<8x1xf32>
    %cst_27 = arith.constant dense<0.000000e+00> : vector<8x100xf32>
    %98 = tpu.matmul %96, %95, %cst_27 {dimension_numbers = #tpu.dot_dimension_numbers<[1], [0], [0], [1], [0, 0, 1, 1], [], []>} : vector<8x288xf32>, vector<288x100xf32>, vector<8x100xf32> -> vector<8x100xf32>
    %99 = vector.broadcast %97 : vector<8x1xf32> to vector<8x100xf32>
    %100 = arith.addf %98, %99 : vector<8x100xf32>
    %cst_28 = arith.constant 0.000000e+00 : f32
    %101 = vector.broadcast %cst_28 : f32 to vector<8x100xf32>
    %102 = arith.cmpf oge, %100, %101 : vector<8x100xf32>
    %cst_29 = arith.constant 2.500000e-01 : f32
    %103 = vector.broadcast %cst_29 : f32 to vector<8x100xf32>
    %104 = arith.mulf %103, %100 : vector<8x100xf32>
    %105 = arith.select %102, %100, %104 : vector<8x100xi1>, vector<8x100xf32>
    %106 = vector.broadcast %0 : vector<1x100xf32> to vector<8x100xf32>
    %107 = arith.mulf %105, %106 : vector<8x100xf32>
    %cst_30 = arith.constant 0.000000e+00 : f32
    %108 = vector.broadcast %cst_30 : f32 to vector<8x11xf32>
    %109 = tpu.concatenate %108, %107, %108 in 1 : vector<8x11xf32>, vector<8x100xf32>, vector<8x11xf32> -> vector<8x122xf32>
    %110 = vector.extract_strided_slice %109 {offsets = [0, 0], sizes = [8, 100], strides = [1, 1]} : vector<8x122xf32> to vector<8x100xf32>
    %111 = vector.extract_strided_slice %109 {offsets = [0, 1], sizes = [8, 100], strides = [1, 1]} : vector<8x122xf32> to vector<8x100xf32>
    %112 = vector.extract_strided_slice %109 {offsets = [0, 2], sizes = [8, 100], strides = [1, 1]} : vector<8x122xf32> to vector<8x100xf32>
    %113 = vector.extract_strided_slice %109 {offsets = [0, 10], sizes = [8, 100], strides = [1, 1]} : vector<8x122xf32> to vector<8x100xf32>
    %114 = vector.extract_strided_slice %109 {offsets = [0, 11], sizes = [8, 100], strides = [1, 1]} : vector<8x122xf32> to vector<8x100xf32>
    %115 = vector.extract_strided_slice %109 {offsets = [0, 12], sizes = [8, 100], strides = [1, 1]} : vector<8x122xf32> to vector<8x100xf32>
    %116 = vector.extract_strided_slice %109 {offsets = [0, 20], sizes = [8, 100], strides = [1, 1]} : vector<8x122xf32> to vector<8x100xf32>
    %117 = vector.extract_strided_slice %109 {offsets = [0, 21], sizes = [8, 100], strides = [1, 1]} : vector<8x122xf32> to vector<8x100xf32>
    %118 = vector.extract_strided_slice %109 {offsets = [0, 22], sizes = [8, 100], strides = [1, 1]} : vector<8x122xf32> to vector<8x100xf32>
    %119 = tpu.concatenate %110, %111, %112, %113, %114, %115, %116, %117, %118 in 0 : vector<8x100xf32>, vector<8x100xf32>, vector<8x100xf32>, vector<8x100xf32>, vector<8x100xf32>, vector<8x100xf32>, vector<8x100xf32>, vector<8x100xf32>, vector<8x100xf32> -> vector<72x100xf32>
    %c120 = arith.constant 120 : index
    %c0_31 = arith.constant 0 : index
    %120 = vector.load %arg5[%c120, %c0_31] : memref<264x288xf32, #tpu.memory_space<vmem>>, vector<32x72xf32>
    %c0_32 = arith.constant 0 : index
    %c5 = arith.constant 5 : index
    %121 = vector.load %arg6[%c0_32, %c5] : memref<32x15xf32, #tpu.memory_space<vmem>>, vector<32x1xf32>
    %cst_33 = arith.constant dense<0.000000e+00> : vector<32x100xf32>
    %122 = tpu.matmul %120, %119, %cst_33 {dimension_numbers = #tpu.dot_dimension_numbers<[1], [0], [0], [1], [0, 0, 1, 1], [], []>} : vector<32x72xf32>, vector<72x100xf32>, vector<32x100xf32> -> vector<32x100xf32>
    %123 = vector.broadcast %121 : vector<32x1xf32> to vector<32x100xf32>
    %124 = arith.addf %122, %123 : vector<32x100xf32>
    %125 = arith.negf %124 : vector<32x100xf32>
    %126 = math.exp %125 : vector<32x100xf32>
    %cst_34 = arith.constant 1.000000e+00 : f32
    %127 = vector.broadcast %cst_34 : f32 to vector<32x100xf32>
    %128 = arith.addf %127, %126 : vector<32x100xf32>
    %129 = arith.divf %127, %128 : vector<32x100xf32>
    %130 = arith.mulf %81, %129 : vector<32x100xf32>
    %131 = arith.addf %33, %130 : vector<32x100xf32>
    %132 = vector.broadcast %0 : vector<1x100xf32> to vector<32x100xf32>
    %133 = arith.mulf %131, %132 : vector<32x100xf32>
    %cst_35 = arith.constant 0.000000e+00 : f32
    %134 = vector.broadcast %cst_35 : f32 to vector<32x11xf32>
    %135 = tpu.concatenate %134, %133, %134 in 1 : vector<32x11xf32>, vector<32x100xf32>, vector<32x11xf32> -> vector<32x122xf32>
    %136 = vector.extract_strided_slice %135 {offsets = [0, 0], sizes = [32, 100], strides = [1, 1]} : vector<32x122xf32> to vector<32x100xf32>
    %137 = vector.extract_strided_slice %135 {offsets = [0, 1], sizes = [32, 100], strides = [1, 1]} : vector<32x122xf32> to vector<32x100xf32>
    %138 = vector.extract_strided_slice %135 {offsets = [0, 2], sizes = [32, 100], strides = [1, 1]} : vector<32x122xf32> to vector<32x100xf32>
    %139 = vector.extract_strided_slice %135 {offsets = [0, 10], sizes = [32, 100], strides = [1, 1]} : vector<32x122xf32> to vector<32x100xf32>
    %140 = vector.extract_strided_slice %135 {offsets = [0, 11], sizes = [32, 100], strides = [1, 1]} : vector<32x122xf32> to vector<32x100xf32>
    %141 = vector.extract_strided_slice %135 {offsets = [0, 12], sizes = [32, 100], strides = [1, 1]} : vector<32x122xf32> to vector<32x100xf32>
    %142 = vector.extract_strided_slice %135 {offsets = [0, 20], sizes = [32, 100], strides = [1, 1]} : vector<32x122xf32> to vector<32x100xf32>
    %143 = vector.extract_strided_slice %135 {offsets = [0, 21], sizes = [32, 100], strides = [1, 1]} : vector<32x122xf32> to vector<32x100xf32>
    %144 = vector.extract_strided_slice %135 {offsets = [0, 22], sizes = [32, 100], strides = [1, 1]} : vector<32x122xf32> to vector<32x100xf32>
    %145 = tpu.concatenate %136, %137, %138, %139, %140, %141, %142, %143, %144 in 0 : vector<32x100xf32>, vector<32x100xf32>, vector<32x100xf32>, vector<32x100xf32>, vector<32x100xf32>, vector<32x100xf32>, vector<32x100xf32>, vector<32x100xf32>, vector<32x100xf32> -> vector<288x100xf32>
    %c152 = arith.constant 152 : index
    %c0_36 = arith.constant 0 : index
    %146 = vector.load %arg5[%c152, %c0_36] : memref<264x288xf32, #tpu.memory_space<vmem>>, vector<16x288xf32>
    %c0_37 = arith.constant 0 : index
    %c6 = arith.constant 6 : index
    %147 = vector.load %arg6[%c0_37, %c6] : memref<32x15xf32, #tpu.memory_space<vmem>>, vector<16x1xf32>
    %cst_38 = arith.constant dense<0.000000e+00> : vector<16x100xf32>
    %148 = tpu.matmul %146, %145, %cst_38 {dimension_numbers = #tpu.dot_dimension_numbers<[1], [0], [0], [1], [0, 0, 1, 1], [], []>} : vector<16x288xf32>, vector<288x100xf32>, vector<16x100xf32> -> vector<16x100xf32>
    %149 = vector.broadcast %147 : vector<16x1xf32> to vector<16x100xf32>
    %150 = arith.addf %148, %149 : vector<16x100xf32>
    %c0_39 = arith.constant 0 : index
    %c0_40 = arith.constant 0 : index
    %151 = vector.load %arg3[%c0_39, %c0_40] : memref<8x122xf32, #tpu.memory_space<vmem>>, vector<8x122xf32>
    %152 = vector.extract_strided_slice %151 {offsets = [0, 0], sizes = [8, 100], strides = [1, 1]} : vector<8x122xf32> to vector<8x100xf32>
    %153 = vector.extract_strided_slice %151 {offsets = [0, 1], sizes = [8, 100], strides = [1, 1]} : vector<8x122xf32> to vector<8x100xf32>
    %154 = vector.extract_strided_slice %151 {offsets = [0, 2], sizes = [8, 100], strides = [1, 1]} : vector<8x122xf32> to vector<8x100xf32>
    %155 = vector.extract_strided_slice %151 {offsets = [0, 10], sizes = [8, 100], strides = [1, 1]} : vector<8x122xf32> to vector<8x100xf32>
    %156 = vector.extract_strided_slice %151 {offsets = [0, 11], sizes = [8, 100], strides = [1, 1]} : vector<8x122xf32> to vector<8x100xf32>
    %157 = vector.extract_strided_slice %151 {offsets = [0, 12], sizes = [8, 100], strides = [1, 1]} : vector<8x122xf32> to vector<8x100xf32>
    %158 = vector.extract_strided_slice %151 {offsets = [0, 20], sizes = [8, 100], strides = [1, 1]} : vector<8x122xf32> to vector<8x100xf32>
    %159 = vector.extract_strided_slice %151 {offsets = [0, 21], sizes = [8, 100], strides = [1, 1]} : vector<8x122xf32> to vector<8x100xf32>
    %160 = vector.extract_strided_slice %151 {offsets = [0, 22], sizes = [8, 100], strides = [1, 1]} : vector<8x122xf32> to vector<8x100xf32>
    %161 = tpu.concatenate %152, %153, %154, %155, %156, %157, %158, %159, %160 in 0 : vector<8x100xf32>, vector<8x100xf32>, vector<8x100xf32>, vector<8x100xf32>, vector<8x100xf32>, vector<8x100xf32>, vector<8x100xf32>, vector<8x100xf32>, vector<8x100xf32> -> vector<72x100xf32>
    %c168 = arith.constant 168 : index
    %c0_41 = arith.constant 0 : index
    %162 = vector.load %arg5[%c168, %c0_41] : memref<264x288xf32, #tpu.memory_space<vmem>>, vector<16x72xf32>
    %c0_42 = arith.constant 0 : index
    %c7 = arith.constant 7 : index
    %163 = vector.load %arg6[%c0_42, %c7] : memref<32x15xf32, #tpu.memory_space<vmem>>, vector<16x1xf32>
    %cst_43 = arith.constant dense<0.000000e+00> : vector<16x100xf32>
    %164 = tpu.matmul %162, %161, %cst_43 {dimension_numbers = #tpu.dot_dimension_numbers<[1], [0], [0], [1], [0, 0, 1, 1], [], []>} : vector<16x72xf32>, vector<72x100xf32>, vector<16x100xf32> -> vector<16x100xf32>
    %165 = vector.broadcast %163 : vector<16x1xf32> to vector<16x100xf32>
    %166 = arith.addf %164, %165 : vector<16x100xf32>
    %167 = arith.addf %150, %166 : vector<16x100xf32>
    %cst_44 = arith.constant 0.000000e+00 : f32
    %168 = vector.broadcast %cst_44 : f32 to vector<16x100xf32>
    %169 = arith.cmpf oge, %167, %168 : vector<16x100xf32>
    %cst_45 = arith.constant 2.500000e-01 : f32
    %170 = vector.broadcast %cst_45 : f32 to vector<16x100xf32>
    %171 = arith.mulf %170, %167 : vector<16x100xf32>
    %172 = arith.select %169, %167, %171 : vector<16x100xi1>, vector<16x100xf32>
    %173 = vector.broadcast %0 : vector<1x100xf32> to vector<16x100xf32>
    %174 = arith.mulf %172, %173 : vector<16x100xf32>
    %cst_46 = arith.constant 0.000000e+00 : f32
    %175 = vector.broadcast %cst_46 : f32 to vector<16x11xf32>
    %176 = tpu.concatenate %175, %174, %175 in 1 : vector<16x11xf32>, vector<16x100xf32>, vector<16x11xf32> -> vector<16x122xf32>
    %177 = vector.extract_strided_slice %176 {offsets = [0, 0], sizes = [16, 100], strides = [1, 1]} : vector<16x122xf32> to vector<16x100xf32>
    %178 = vector.extract_strided_slice %176 {offsets = [0, 1], sizes = [16, 100], strides = [1, 1]} : vector<16x122xf32> to vector<16x100xf32>
    %179 = vector.extract_strided_slice %176 {offsets = [0, 2], sizes = [16, 100], strides = [1, 1]} : vector<16x122xf32> to vector<16x100xf32>
    %180 = vector.extract_strided_slice %176 {offsets = [0, 10], sizes = [16, 100], strides = [1, 1]} : vector<16x122xf32> to vector<16x100xf32>
    %181 = vector.extract_strided_slice %176 {offsets = [0, 11], sizes = [16, 100], strides = [1, 1]} : vector<16x122xf32> to vector<16x100xf32>
    %182 = vector.extract_strided_slice %176 {offsets = [0, 12], sizes = [16, 100], strides = [1, 1]} : vector<16x122xf32> to vector<16x100xf32>
    %183 = vector.extract_strided_slice %176 {offsets = [0, 20], sizes = [16, 100], strides = [1, 1]} : vector<16x122xf32> to vector<16x100xf32>
    %184 = vector.extract_strided_slice %176 {offsets = [0, 21], sizes = [16, 100], strides = [1, 1]} : vector<16x122xf32> to vector<16x100xf32>
    %185 = vector.extract_strided_slice %176 {offsets = [0, 22], sizes = [16, 100], strides = [1, 1]} : vector<16x122xf32> to vector<16x100xf32>
    %186 = tpu.concatenate %177, %178, %179, %180, %181, %182, %183, %184, %185 in 0 : vector<16x100xf32>, vector<16x100xf32>, vector<16x100xf32>, vector<16x100xf32>, vector<16x100xf32>, vector<16x100xf32>, vector<16x100xf32>, vector<16x100xf32>, vector<16x100xf32> -> vector<144x100xf32>
    %c184 = arith.constant 184 : index
    %c0_47 = arith.constant 0 : index
    %187 = vector.load %arg5[%c184, %c0_47] : memref<264x288xf32, #tpu.memory_space<vmem>>, vector<8x144xf32>
    %c0_48 = arith.constant 0 : index
    %c8 = arith.constant 8 : index
    %188 = vector.load %arg6[%c0_48, %c8] : memref<32x15xf32, #tpu.memory_space<vmem>>, vector<8x1xf32>
    %cst_49 = arith.constant dense<0.000000e+00> : vector<8x100xf32>
    %189 = tpu.matmul %187, %186, %cst_49 {dimension_numbers = #tpu.dot_dimension_numbers<[1], [0], [0], [1], [0, 0, 1, 1], [], []>} : vector<8x144xf32>, vector<144x100xf32>, vector<8x100xf32> -> vector<8x100xf32>
    %190 = vector.broadcast %188 : vector<8x1xf32> to vector<8x100xf32>
    %191 = arith.addf %189, %190 : vector<8x100xf32>
    %cst_50 = arith.constant 0.000000e+00 : f32
    %192 = vector.broadcast %cst_50 : f32 to vector<8x100xf32>
    %193 = arith.cmpf oge, %191, %192 : vector<8x100xf32>
    %cst_51 = arith.constant 2.500000e-01 : f32
    %194 = vector.broadcast %cst_51 : f32 to vector<8x100xf32>
    %195 = arith.mulf %194, %191 : vector<8x100xf32>
    %196 = arith.select %193, %191, %195 : vector<8x100xi1>, vector<8x100xf32>
    %197 = vector.broadcast %0 : vector<1x100xf32> to vector<8x100xf32>
    %198 = arith.mulf %196, %197 : vector<8x100xf32>
    %cst_52 = arith.constant 0.000000e+00 : f32
    %199 = vector.broadcast %cst_52 : f32 to vector<8x11xf32>
    %200 = tpu.concatenate %199, %198, %199 in 1 : vector<8x11xf32>, vector<8x100xf32>, vector<8x11xf32> -> vector<8x122xf32>
    %201 = vector.extract_strided_slice %200 {offsets = [0, 0], sizes = [8, 100], strides = [1, 1]} : vector<8x122xf32> to vector<8x100xf32>
    %202 = vector.extract_strided_slice %200 {offsets = [0, 1], sizes = [8, 100], strides = [1, 1]} : vector<8x122xf32> to vector<8x100xf32>
    %203 = vector.extract_strided_slice %200 {offsets = [0, 2], sizes = [8, 100], strides = [1, 1]} : vector<8x122xf32> to vector<8x100xf32>
    %204 = vector.extract_strided_slice %200 {offsets = [0, 10], sizes = [8, 100], strides = [1, 1]} : vector<8x122xf32> to vector<8x100xf32>
    %205 = vector.extract_strided_slice %200 {offsets = [0, 11], sizes = [8, 100], strides = [1, 1]} : vector<8x122xf32> to vector<8x100xf32>
    %206 = vector.extract_strided_slice %200 {offsets = [0, 12], sizes = [8, 100], strides = [1, 1]} : vector<8x122xf32> to vector<8x100xf32>
    %207 = vector.extract_strided_slice %200 {offsets = [0, 20], sizes = [8, 100], strides = [1, 1]} : vector<8x122xf32> to vector<8x100xf32>
    %208 = vector.extract_strided_slice %200 {offsets = [0, 21], sizes = [8, 100], strides = [1, 1]} : vector<8x122xf32> to vector<8x100xf32>
    %209 = vector.extract_strided_slice %200 {offsets = [0, 22], sizes = [8, 100], strides = [1, 1]} : vector<8x122xf32> to vector<8x100xf32>
    %210 = tpu.concatenate %201, %202, %203, %204, %205, %206, %207, %208, %209 in 0 : vector<8x100xf32>, vector<8x100xf32>, vector<8x100xf32>, vector<8x100xf32>, vector<8x100xf32>, vector<8x100xf32>, vector<8x100xf32>, vector<8x100xf32>, vector<8x100xf32> -> vector<72x100xf32>
    %c192 = arith.constant 192 : index
    %c0_53 = arith.constant 0 : index
    %211 = vector.load %arg5[%c192, %c0_53] : memref<264x288xf32, #tpu.memory_space<vmem>>, vector<16x72xf32>
    %c0_54 = arith.constant 0 : index
    %c9 = arith.constant 9 : index
    %212 = vector.load %arg6[%c0_54, %c9] : memref<32x15xf32, #tpu.memory_space<vmem>>, vector<16x1xf32>
    %cst_55 = arith.constant dense<0.000000e+00> : vector<16x100xf32>
    %213 = tpu.matmul %211, %210, %cst_55 {dimension_numbers = #tpu.dot_dimension_numbers<[1], [0], [0], [1], [0, 0, 1, 1], [], []>} : vector<16x72xf32>, vector<72x100xf32>, vector<16x100xf32> -> vector<16x100xf32>
    %214 = vector.broadcast %212 : vector<16x1xf32> to vector<16x100xf32>
    %215 = arith.addf %213, %214 : vector<16x100xf32>
    %216 = vector.broadcast %0 : vector<1x100xf32> to vector<16x100xf32>
    %217 = arith.mulf %215, %216 : vector<16x100xf32>
    %cst_56 = arith.constant 0.000000e+00 : f32
    %218 = vector.broadcast %cst_56 : f32 to vector<16x11xf32>
    %219 = tpu.concatenate %218, %217, %218 in 1 : vector<16x11xf32>, vector<16x100xf32>, vector<16x11xf32> -> vector<16x122xf32>
    %220 = vector.extract_strided_slice %219 {offsets = [0, 0], sizes = [16, 100], strides = [1, 1]} : vector<16x122xf32> to vector<16x100xf32>
    %221 = vector.extract_strided_slice %219 {offsets = [0, 1], sizes = [16, 100], strides = [1, 1]} : vector<16x122xf32> to vector<16x100xf32>
    %222 = vector.extract_strided_slice %219 {offsets = [0, 2], sizes = [16, 100], strides = [1, 1]} : vector<16x122xf32> to vector<16x100xf32>
    %223 = vector.extract_strided_slice %219 {offsets = [0, 10], sizes = [16, 100], strides = [1, 1]} : vector<16x122xf32> to vector<16x100xf32>
    %224 = vector.extract_strided_slice %219 {offsets = [0, 11], sizes = [16, 100], strides = [1, 1]} : vector<16x122xf32> to vector<16x100xf32>
    %225 = vector.extract_strided_slice %219 {offsets = [0, 12], sizes = [16, 100], strides = [1, 1]} : vector<16x122xf32> to vector<16x100xf32>
    %226 = vector.extract_strided_slice %219 {offsets = [0, 20], sizes = [16, 100], strides = [1, 1]} : vector<16x122xf32> to vector<16x100xf32>
    %227 = vector.extract_strided_slice %219 {offsets = [0, 21], sizes = [16, 100], strides = [1, 1]} : vector<16x122xf32> to vector<16x100xf32>
    %228 = vector.extract_strided_slice %219 {offsets = [0, 22], sizes = [16, 100], strides = [1, 1]} : vector<16x122xf32> to vector<16x100xf32>
    %229 = tpu.concatenate %220, %221, %222, %223, %224, %225, %226, %227, %228 in 0 : vector<16x100xf32>, vector<16x100xf32>, vector<16x100xf32>, vector<16x100xf32>, vector<16x100xf32>, vector<16x100xf32>, vector<16x100xf32>, vector<16x100xf32>, vector<16x100xf32> -> vector<144x100xf32>
    %c208 = arith.constant 208 : index
    %c0_57 = arith.constant 0 : index
    %230 = vector.load %arg5[%c208, %c0_57] : memref<264x288xf32, #tpu.memory_space<vmem>>, vector<8x144xf32>
    %c0_58 = arith.constant 0 : index
    %c10 = arith.constant 10 : index
    %231 = vector.load %arg6[%c0_58, %c10] : memref<32x15xf32, #tpu.memory_space<vmem>>, vector<8x1xf32>
    %cst_59 = arith.constant dense<0.000000e+00> : vector<8x100xf32>
    %232 = tpu.matmul %230, %229, %cst_59 {dimension_numbers = #tpu.dot_dimension_numbers<[1], [0], [0], [1], [0, 0, 1, 1], [], []>} : vector<8x144xf32>, vector<144x100xf32>, vector<8x100xf32> -> vector<8x100xf32>
    %233 = vector.broadcast %231 : vector<8x1xf32> to vector<8x100xf32>
    %234 = arith.addf %232, %233 : vector<8x100xf32>
    %cst_60 = arith.constant 0.000000e+00 : f32
    %235 = vector.broadcast %cst_60 : f32 to vector<8x100xf32>
    %236 = arith.cmpf oge, %234, %235 : vector<8x100xf32>
    %cst_61 = arith.constant 2.500000e-01 : f32
    %237 = vector.broadcast %cst_61 : f32 to vector<8x100xf32>
    %238 = arith.mulf %237, %234 : vector<8x100xf32>
    %239 = arith.select %236, %234, %238 : vector<8x100xi1>, vector<8x100xf32>
    %240 = vector.broadcast %0 : vector<1x100xf32> to vector<8x100xf32>
    %241 = arith.mulf %239, %240 : vector<8x100xf32>
    %cst_62 = arith.constant 0.000000e+00 : f32
    %242 = vector.broadcast %cst_62 : f32 to vector<8x11xf32>
    %243 = tpu.concatenate %242, %241, %242 in 1 : vector<8x11xf32>, vector<8x100xf32>, vector<8x11xf32> -> vector<8x122xf32>
    %244 = vector.extract_strided_slice %243 {offsets = [0, 0], sizes = [8, 100], strides = [1, 1]} : vector<8x122xf32> to vector<8x100xf32>
    %245 = vector.extract_strided_slice %243 {offsets = [0, 1], sizes = [8, 100], strides = [1, 1]} : vector<8x122xf32> to vector<8x100xf32>
    %246 = vector.extract_strided_slice %243 {offsets = [0, 2], sizes = [8, 100], strides = [1, 1]} : vector<8x122xf32> to vector<8x100xf32>
    %247 = vector.extract_strided_slice %243 {offsets = [0, 10], sizes = [8, 100], strides = [1, 1]} : vector<8x122xf32> to vector<8x100xf32>
    %248 = vector.extract_strided_slice %243 {offsets = [0, 11], sizes = [8, 100], strides = [1, 1]} : vector<8x122xf32> to vector<8x100xf32>
    %249 = vector.extract_strided_slice %243 {offsets = [0, 12], sizes = [8, 100], strides = [1, 1]} : vector<8x122xf32> to vector<8x100xf32>
    %250 = vector.extract_strided_slice %243 {offsets = [0, 20], sizes = [8, 100], strides = [1, 1]} : vector<8x122xf32> to vector<8x100xf32>
    %251 = vector.extract_strided_slice %243 {offsets = [0, 21], sizes = [8, 100], strides = [1, 1]} : vector<8x122xf32> to vector<8x100xf32>
    %252 = vector.extract_strided_slice %243 {offsets = [0, 22], sizes = [8, 100], strides = [1, 1]} : vector<8x122xf32> to vector<8x100xf32>
    %253 = tpu.concatenate %244, %245, %246, %247, %248, %249, %250, %251, %252 in 0 : vector<8x100xf32>, vector<8x100xf32>, vector<8x100xf32>, vector<8x100xf32>, vector<8x100xf32>, vector<8x100xf32>, vector<8x100xf32>, vector<8x100xf32>, vector<8x100xf32> -> vector<72x100xf32>
    %c216 = arith.constant 216 : index
    %c0_63 = arith.constant 0 : index
    %254 = vector.load %arg5[%c216, %c0_63] : memref<264x288xf32, #tpu.memory_space<vmem>>, vector<16x72xf32>
    %c0_64 = arith.constant 0 : index
    %c11 = arith.constant 11 : index
    %255 = vector.load %arg6[%c0_64, %c11] : memref<32x15xf32, #tpu.memory_space<vmem>>, vector<16x1xf32>
    %cst_65 = arith.constant dense<0.000000e+00> : vector<16x100xf32>
    %256 = tpu.matmul %254, %253, %cst_65 {dimension_numbers = #tpu.dot_dimension_numbers<[1], [0], [0], [1], [0, 0, 1, 1], [], []>} : vector<16x72xf32>, vector<72x100xf32>, vector<16x100xf32> -> vector<16x100xf32>
    %257 = vector.broadcast %255 : vector<16x1xf32> to vector<16x100xf32>
    %258 = arith.addf %256, %257 : vector<16x100xf32>
    %259 = arith.negf %258 : vector<16x100xf32>
    %260 = math.exp %259 : vector<16x100xf32>
    %cst_66 = arith.constant 1.000000e+00 : f32
    %261 = vector.broadcast %cst_66 : f32 to vector<16x100xf32>
    %262 = arith.addf %261, %260 : vector<16x100xf32>
    %263 = arith.divf %261, %262 : vector<16x100xf32>
    %264 = arith.mulf %215, %263 : vector<16x100xf32>
    %265 = arith.addf %167, %264 : vector<16x100xf32>
    %266 = vector.broadcast %0 : vector<1x100xf32> to vector<16x100xf32>
    %267 = arith.mulf %265, %266 : vector<16x100xf32>
    %cst_67 = arith.constant 0.000000e+00 : f32
    %268 = vector.broadcast %cst_67 : f32 to vector<16x11xf32>
    %269 = tpu.concatenate %268, %267, %268 in 1 : vector<16x11xf32>, vector<16x100xf32>, vector<16x11xf32> -> vector<16x122xf32>
    %270 = vector.extract_strided_slice %269 {offsets = [0, 0], sizes = [16, 100], strides = [1, 1]} : vector<16x122xf32> to vector<16x100xf32>
    %271 = vector.extract_strided_slice %269 {offsets = [0, 1], sizes = [16, 100], strides = [1, 1]} : vector<16x122xf32> to vector<16x100xf32>
    %272 = vector.extract_strided_slice %269 {offsets = [0, 2], sizes = [16, 100], strides = [1, 1]} : vector<16x122xf32> to vector<16x100xf32>
    %273 = vector.extract_strided_slice %269 {offsets = [0, 10], sizes = [16, 100], strides = [1, 1]} : vector<16x122xf32> to vector<16x100xf32>
    %274 = vector.extract_strided_slice %269 {offsets = [0, 11], sizes = [16, 100], strides = [1, 1]} : vector<16x122xf32> to vector<16x100xf32>
    %275 = vector.extract_strided_slice %269 {offsets = [0, 12], sizes = [16, 100], strides = [1, 1]} : vector<16x122xf32> to vector<16x100xf32>
    %276 = vector.extract_strided_slice %269 {offsets = [0, 20], sizes = [16, 100], strides = [1, 1]} : vector<16x122xf32> to vector<16x100xf32>
    %277 = vector.extract_strided_slice %269 {offsets = [0, 21], sizes = [16, 100], strides = [1, 1]} : vector<16x122xf32> to vector<16x100xf32>
    %278 = vector.extract_strided_slice %269 {offsets = [0, 22], sizes = [16, 100], strides = [1, 1]} : vector<16x122xf32> to vector<16x100xf32>
    %279 = tpu.concatenate %270, %271, %272, %273, %274, %275, %276, %277, %278 in 0 : vector<16x100xf32>, vector<16x100xf32>, vector<16x100xf32>, vector<16x100xf32>, vector<16x100xf32>, vector<16x100xf32>, vector<16x100xf32>, vector<16x100xf32>, vector<16x100xf32> -> vector<144x100xf32>
    %c232 = arith.constant 232 : index
    %c0_68 = arith.constant 0 : index
    %280 = vector.load %arg5[%c232, %c0_68] : memref<264x288xf32, #tpu.memory_space<vmem>>, vector<8x144xf32>
    %c0_69 = arith.constant 0 : index
    %c12 = arith.constant 12 : index
    %281 = vector.load %arg6[%c0_69, %c12] : memref<32x15xf32, #tpu.memory_space<vmem>>, vector<8x1xf32>
    %cst_70 = arith.constant dense<0.000000e+00> : vector<8x100xf32>
    %282 = tpu.matmul %280, %279, %cst_70 {dimension_numbers = #tpu.dot_dimension_numbers<[1], [0], [0], [1], [0, 0, 1, 1], [], []>} : vector<8x144xf32>, vector<144x100xf32>, vector<8x100xf32> -> vector<8x100xf32>
    %283 = vector.broadcast %281 : vector<8x1xf32> to vector<8x100xf32>
    %284 = arith.addf %282, %283 : vector<8x100xf32>
    %285 = vector.broadcast %0 : vector<1x100xf32> to vector<8x100xf32>
    %286 = arith.mulf %284, %285 : vector<8x100xf32>
    %cst_71 = arith.constant 0.000000e+00 : f32
    %287 = vector.broadcast %cst_71 : f32 to vector<8x11xf32>
    %288 = tpu.concatenate %287, %286, %287 in 1 : vector<8x11xf32>, vector<8x100xf32>, vector<8x11xf32> -> vector<8x122xf32>
    %289 = vector.extract_strided_slice %288 {offsets = [0, 0], sizes = [8, 100], strides = [1, 1]} : vector<8x122xf32> to vector<8x100xf32>
    %290 = vector.extract_strided_slice %288 {offsets = [0, 1], sizes = [8, 100], strides = [1, 1]} : vector<8x122xf32> to vector<8x100xf32>
    %291 = vector.extract_strided_slice %288 {offsets = [0, 2], sizes = [8, 100], strides = [1, 1]} : vector<8x122xf32> to vector<8x100xf32>
    %292 = vector.extract_strided_slice %288 {offsets = [0, 10], sizes = [8, 100], strides = [1, 1]} : vector<8x122xf32> to vector<8x100xf32>
    %293 = vector.extract_strided_slice %288 {offsets = [0, 11], sizes = [8, 100], strides = [1, 1]} : vector<8x122xf32> to vector<8x100xf32>
    %294 = vector.extract_strided_slice %288 {offsets = [0, 12], sizes = [8, 100], strides = [1, 1]} : vector<8x122xf32> to vector<8x100xf32>
    %295 = vector.extract_strided_slice %288 {offsets = [0, 20], sizes = [8, 100], strides = [1, 1]} : vector<8x122xf32> to vector<8x100xf32>
    %296 = vector.extract_strided_slice %288 {offsets = [0, 21], sizes = [8, 100], strides = [1, 1]} : vector<8x122xf32> to vector<8x100xf32>
    %297 = vector.extract_strided_slice %288 {offsets = [0, 22], sizes = [8, 100], strides = [1, 1]} : vector<8x122xf32> to vector<8x100xf32>
    %298 = tpu.concatenate %289, %290, %291, %292, %293, %294, %295, %296, %297 in 0 : vector<8x100xf32>, vector<8x100xf32>, vector<8x100xf32>, vector<8x100xf32>, vector<8x100xf32>, vector<8x100xf32>, vector<8x100xf32>, vector<8x100xf32>, vector<8x100xf32> -> vector<72x100xf32>
    %c240 = arith.constant 240 : index
    %c0_72 = arith.constant 0 : index
    %299 = vector.load %arg5[%c240, %c0_72] : memref<264x288xf32, #tpu.memory_space<vmem>>, vector<16x72xf32>
    %c0_73 = arith.constant 0 : index
    %c13 = arith.constant 13 : index
    %300 = vector.load %arg6[%c0_73, %c13] : memref<32x15xf32, #tpu.memory_space<vmem>>, vector<16x1xf32>
    %cst_74 = arith.constant dense<0.000000e+00> : vector<16x100xf32>
    %301 = tpu.matmul %299, %298, %cst_74 {dimension_numbers = #tpu.dot_dimension_numbers<[1], [0], [0], [1], [0, 0, 1, 1], [], []>} : vector<16x72xf32>, vector<72x100xf32>, vector<16x100xf32> -> vector<16x100xf32>
    %302 = vector.broadcast %300 : vector<16x1xf32> to vector<16x100xf32>
    %303 = arith.addf %301, %302 : vector<16x100xf32>
    %cst_75 = arith.constant 0.000000e+00 : f32
    %304 = vector.broadcast %cst_75 : f32 to vector<16x100xf32>
    %305 = arith.cmpf oge, %303, %304 : vector<16x100xf32>
    %cst_76 = arith.constant 2.500000e-01 : f32
    %306 = vector.broadcast %cst_76 : f32 to vector<16x100xf32>
    %307 = arith.mulf %306, %303 : vector<16x100xf32>
    %308 = arith.select %305, %303, %307 : vector<16x100xi1>, vector<16x100xf32>
    %c0_77 = arith.constant 0 : index
    %c0_78 = arith.constant 0 : index
    %309 = vector.load %arg8[%c0_77, %c0_78] : memref<16x100xf32, #tpu.memory_space<vmem>>, vector<16x100xf32>
    tpu.vector_store %arg8[%c0_77, %c0_78], %308 {strides = array<i32>} : memref<16x100xf32, #tpu.memory_space<vmem>>, vector<16x100xf32>,
    %c256 = arith.constant 256 : index
    %c0_79 = arith.constant 0 : index
    %310 = vector.load %arg5[%c256, %c0_79] : memref<264x288xf32, #tpu.memory_space<vmem>>, vector<4x9xf32>
    %c0_80 = arith.constant 0 : index
    %c0_81 = arith.constant 0 : index
    %311 = vector.load %arg4[%c0_80, %c0_81] : memref<1x362xf32, #tpu.memory_space<vmem>>, vector<1x362xf32>
    %cst_82 = arith.constant 0.000000e+00 : f32
    %312 = vector.broadcast %cst_82 : f32 to vector<4x324xf32>
    %313 = vector.extract_strided_slice %310 {offsets = [0, 0], sizes = [4, 1], strides = [1, 1]} : vector<4x9xf32> to vector<4x1xf32>
    %314 = vector.extract_strided_slice %311 {offsets = [0, 0], sizes = [1, 324], strides = [1, 1]} : vector<1x362xf32> to vector<1x324xf32>
    %315 = vector.broadcast %313 : vector<4x1xf32> to vector<4x324xf32>
    %316 = vector.broadcast %314 : vector<1x324xf32> to vector<4x324xf32>
    %317 = arith.mulf %315, %316 : vector<4x324xf32>
    %318 = arith.addf %312, %317 : vector<4x324xf32>
    %319 = vector.extract_strided_slice %310 {offsets = [0, 1], sizes = [4, 1], strides = [1, 1]} : vector<4x9xf32> to vector<4x1xf32>
    %320 = vector.extract_strided_slice %311 {offsets = [0, 1], sizes = [1, 324], strides = [1, 1]} : vector<1x362xf32> to vector<1x324xf32>
    %321 = vector.broadcast %319 : vector<4x1xf32> to vector<4x324xf32>
    %322 = vector.broadcast %320 : vector<1x324xf32> to vector<4x324xf32>
    %323 = arith.mulf %321, %322 : vector<4x324xf32>
    %324 = arith.addf %318, %323 : vector<4x324xf32>
    %325 = vector.extract_strided_slice %310 {offsets = [0, 2], sizes = [4, 1], strides = [1, 1]} : vector<4x9xf32> to vector<4x1xf32>
    %326 = vector.extract_strided_slice %311 {offsets = [0, 2], sizes = [1, 324], strides = [1, 1]} : vector<1x362xf32> to vector<1x324xf32>
    %327 = vector.broadcast %325 : vector<4x1xf32> to vector<4x324xf32>
    %328 = vector.broadcast %326 : vector<1x324xf32> to vector<4x324xf32>
    %329 = arith.mulf %327, %328 : vector<4x324xf32>
    %330 = arith.addf %324, %329 : vector<4x324xf32>
    %331 = vector.extract_strided_slice %310 {offsets = [0, 3], sizes = [4, 1], strides = [1, 1]} : vector<4x9xf32> to vector<4x1xf32>
    %332 = vector.extract_strided_slice %311 {offsets = [0, 18], sizes = [1, 324], strides = [1, 1]} : vector<1x362xf32> to vector<1x324xf32>
    %333 = vector.broadcast %331 : vector<4x1xf32> to vector<4x324xf32>
    %334 = vector.broadcast %332 : vector<1x324xf32> to vector<4x324xf32>
    %335 = arith.mulf %333, %334 : vector<4x324xf32>
    %336 = arith.addf %330, %335 : vector<4x324xf32>
    %337 = vector.extract_strided_slice %310 {offsets = [0, 4], sizes = [4, 1], strides = [1, 1]} : vector<4x9xf32> to vector<4x1xf32>
    %338 = vector.extract_strided_slice %311 {offsets = [0, 19], sizes = [1, 324], strides = [1, 1]} : vector<1x362xf32> to vector<1x324xf32>
    %339 = vector.broadcast %337 : vector<4x1xf32> to vector<4x324xf32>
    %340 = vector.broadcast %338 : vector<1x324xf32> to vector<4x324xf32>
    %341 = arith.mulf %339, %340 : vector<4x324xf32>
    %342 = arith.addf %336, %341 : vector<4x324xf32>
    %343 = vector.extract_strided_slice %310 {offsets = [0, 5], sizes = [4, 1], strides = [1, 1]} : vector<4x9xf32> to vector<4x1xf32>
    %344 = vector.extract_strided_slice %311 {offsets = [0, 20], sizes = [1, 324], strides = [1, 1]} : vector<1x362xf32> to vector<1x324xf32>
    %345 = vector.broadcast %343 : vector<4x1xf32> to vector<4x324xf32>
    %346 = vector.broadcast %344 : vector<1x324xf32> to vector<4x324xf32>
    %347 = arith.mulf %345, %346 : vector<4x324xf32>
    %348 = arith.addf %342, %347 : vector<4x324xf32>
    %349 = vector.extract_strided_slice %310 {offsets = [0, 6], sizes = [4, 1], strides = [1, 1]} : vector<4x9xf32> to vector<4x1xf32>
    %350 = vector.extract_strided_slice %311 {offsets = [0, 36], sizes = [1, 324], strides = [1, 1]} : vector<1x362xf32> to vector<1x324xf32>
    %351 = vector.broadcast %349 : vector<4x1xf32> to vector<4x324xf32>
    %352 = vector.broadcast %350 : vector<1x324xf32> to vector<4x324xf32>
    %353 = arith.mulf %351, %352 : vector<4x324xf32>
    %354 = arith.addf %348, %353 : vector<4x324xf32>
    %355 = vector.extract_strided_slice %310 {offsets = [0, 7], sizes = [4, 1], strides = [1, 1]} : vector<4x9xf32> to vector<4x1xf32>
    %356 = vector.extract_strided_slice %311 {offsets = [0, 37], sizes = [1, 324], strides = [1, 1]} : vector<1x362xf32> to vector<1x324xf32>
    %357 = vector.broadcast %355 : vector<4x1xf32> to vector<4x324xf32>
    %358 = vector.broadcast %356 : vector<1x324xf32> to vector<4x324xf32>
    %359 = arith.mulf %357, %358 : vector<4x324xf32>
    %360 = arith.addf %354, %359 : vector<4x324xf32>
    %361 = vector.extract_strided_slice %310 {offsets = [0, 8], sizes = [4, 1], strides = [1, 1]} : vector<4x9xf32> to vector<4x1xf32>
    %362 = vector.extract_strided_slice %311 {offsets = [0, 38], sizes = [1, 324], strides = [1, 1]} : vector<1x362xf32> to vector<1x324xf32>
    %363 = vector.broadcast %361 : vector<4x1xf32> to vector<4x324xf32>
    %364 = vector.broadcast %362 : vector<1x324xf32> to vector<4x324xf32>
    %365 = arith.mulf %363, %364 : vector<4x324xf32>
    %366 = arith.addf %360, %365 : vector<4x324xf32>
    %c0_83 = arith.constant 0 : index
    %c14 = arith.constant 14 : index
    %367 = vector.load %arg6[%c0_83, %c14] : memref<32x15xf32, #tpu.memory_space<vmem>>, vector<4x1xf32>
    %368 = vector.broadcast %367 : vector<4x1xf32> to vector<4x324xf32>
    %369 = arith.addf %366, %368 : vector<4x324xf32>
    %c0_84 = arith.constant 0 : index
    %c0_85 = arith.constant 0 : index
    %370 = vector.load %arg7[%c0_84, %c0_85] : memref<4x324xf32, #tpu.memory_space<vmem>>, vector<4x324xf32>
    tpu.vector_store %arg7[%c0_84, %c0_85], %369 {strides = array<i32>} : memref<4x324xf32, #tpu.memory_space<vmem>>, vector<4x324xf32>,
    return
  }
}

</mosaic_0001>

<bundles_post_ra>
// kernel: lern_forward.1
= control target key start
LH: loop header
LB: loop body
LE: loop exit
PB: predicated region body
PF: predicated region fallthrough
CT: control target
= control target key end

     0   :  { %v4232_v2 = vmov 0.0|0.0   ;;  %s4233_s9 = smov 127   ;;  %s4234_s10 = smov 118   ;;  %vm257_vm0 = vcmask 130048   ;;  %vm83_vm1 = vcmask 588800   ;;  %v4241_v8 = vmov 0   ;;  %s5117_s2 = inlined_call_operand.vmem [shape: f32[16,122], index: 2, kind: input, shape index: {}]   ;;  %s5118_s1 = inlined_call_operand.vmem [shape: f32[8,122], index: 1, kind: input, shape index: {}]   ;;  %s5119_s5 = inlined_call_operand.vmem [shape: f32[264,288], index: 5, kind: input, shape index: {}]   ;;  %s5120_s6 = inlined_call_operand.vmem [shape: f32[32,15], index: 6, kind: input, shape index: {}]   ;;  %s5121_s0 = inlined_call_operand.vmem [shape: f32[1,100], index: 0, kind: input, shape index: {}]   ;;  %s5122_s3 = inlined_call_operand.vmem [shape: f32[8,122], index: 3, kind: input, shape index: {}]   ;;  %s5123_s4 = inlined_call_operand.vmem [shape: f32[1,362], index: 4, kind: input, shape index: {}]   ;;  %s5124_s7 = inlined_call_operand.vmem [shape: f32[4,324], index: 7, kind: output, shape index: {0}]   ;;  %s5125_s8 = inlined_call_operand.vmem [shape: f32[16,100], index: 8, kind: output, shape index: {1}]  }
   0x1   :  { %v181_v0 = vld [vmem:[%s5117_s2] sm:$0xff]  ;;  %v182_v1 = vld [vmem:[%s5117_s2 + $0x8] sm:$0xff]  ;;  %3284 = vmatprep.subr.bf16.mxu1 %v4232_v2  ;;  %s4235_s11 = smov 126   ;;  %s4236_s12 = smov 117   ;;  %3715 = vset.pattern.permute.xlu1 %v4241_v8  ;;  %v4242_v11 = vmov 1   ;;  %v4376_v12 = vld [vmem:[%s5120_s6 + $0x10] sm:$0xff] }
   0x2   :  { %v3674_v3 = vpack.i.bf16 %v182_v1, %v181_v0  ;;  %v3285_v4 = vpack.c.bf16 %v182_v1, %v181_v0  ;;  %v4325_v5 = vld [vmem:[%s5118_s1] sm:$0xff]  ;;  %s4237_s14 = smov 116   ;;  %s4238_s15 = smov 108   ;;  %v234_v6 = vld [vmem:[%s5119_s5 + $0x68] sm:$0xff]  ;;  %3714 = vset.pattern.permute.xlu0 %v4241_v8  ;;  %v4384_v13 = vld [vmem:[%s5120_s6 + $0x18] sm:$0xff]  ;;  %vm397_vm6 = vcmask 89088  }
   0x3   :  { %s4239_s16 = smov 107   ;;  %2846 = vmatprep.mubr.msk.f32.mxu1 %vm257_vm0, %v234_v6  ;;  %v55_v7 = vld [vmem:[%s5119_s5] sm:$0xff]  ;;  %s4240_s20 = smov 106   ;;  %v4359_v9 = vld [vmem:[%s5120_s6 + $0x8] sm:$0xff]  ;;  %v56_v59 = vld [vmem:[%s5119_s5 + $0x18] sm:$0xff]  ;;  %vm402_vm7 = vcmask 908288  }
   0x4   :  { %3675 = vrot.lane.b32.xlu0 %v3674_v3, %s4233_s9  ;;  %3685 = vrot.lane.b32.xlu1 %v3674_v3, %s4234_s10  ;;  %v4364_v10 = vld [vmem:[%s5120_s6] sm:$0xff]  ;;  %v57_v61 = vld [vmem:[%s5119_s5 + $0x30] sm:$0xff]  ;;  %s4243_s18 = smov 11   ;;  %vm4497_vm8 = vmpackc.low %vm402_vm7, %vm402_vm7  ;;  %vm525_vm9 = vcmask 261120   ;;  %vm4247_vm12 = vmmov 0   ;;  %vm4250_vm14 = vmmov 1  }
   0x5   :  { %3286 = vmatpush1.bf16.msra.mxu1 %v3285_v4  ;;  %3121 = vmatprep.mubr.msk.f32.mxu0 %vm83_vm1, %v55_v7  ;;  %v233_v58 = vld [vmem:[%s5119_s5 + $0x60] sm:$0xff]  ;;  %v235_v62 = vld [vmem:[%s5119_s5 + $0x78] sm:$0xff]  ;;  %v58_v63 = vld [vmem:[%s5119_s5 + $0x48] sm:$0xff]  ;;  %s4264_s25 = smov 90  }
   0x6   :  { %3287 = vmatprep.subr.bf16.mxu1 %v4232_v2  ;;  %v236_v60 = vld [vmem:[%s5119_s5 + $0x80] sm:$0xff]  ;;  %v238_v0 = vld [vmem:[%s5119_s5 + $0x98] sm:$0xff]  ;;  %v237_v1 = vld [vmem:[%s5119_s5 + $0x90] sm:$0xff] }
   0x7   :  { %v239_v4 = vld [vmem:[%s5119_s5 + $0xa8] sm:$0xff]  ;;  %vm4679_vm15 = vmpackc.low %vm4250_vm14, %vm402_vm7  ;;  %vm2586_vm14 = vcmask 818176  }
   0x8   :  { %3680 = vrot.lane.b32.xlu0 %v3674_v3, %s4235_s11  ;;  %3690 = vrot.lane.b32.xlu1 %v3674_v3, %s4236_s12 }
   0xc   :  { %3695 = vrot.lane.b32.xlu0 %v3674_v3, %s4237_s14  ;;  %31 = vrot.lane.b32.xlu1 %v4325_v5, %s4233_s9 }
  0x10   :  { %3700 = vrot.lane.b32.xlu0 %v3674_v3, %s4238_s15  ;;  %34 = vrot.lane.b32.xlu1 %v4325_v5, %s4235_s11 }
  0x14   :  { %37 = vrot.lane.b32.xlu0 %v4325_v5, %s4234_s10  ;;  %3705 = vrot.lane.b32.xlu1 %v3674_v3, %s4239_s16 }
  0x18   :  { %40 = vrot.lane.b32.xlu0 %v4325_v5, %s4236_s12  ;;  %43 = vrot.lane.b32.xlu1 %v4325_v5, %s4237_s14 }
  0x1c   :  { %3710 = vrot.lane.b32.xlu0 %v3674_v3, %s4240_s20  ;;  %46 = vrot.lane.b32.xlu1 %v4325_v5, %s4238_s15  ;;  %v240_v3 = vld [vmem:[%s5119_s5 + $0xb0] sm:$0xff] }
  0x20   :  { %49 = vrot.lane.b32.xlu0 %v4325_v5, %s4239_s16  ;;  %52 = vrot.lane.b32.xlu1 %v4325_v5, %s4240_s20 }
  0x24   :  { %70 = vperm.xlu1 %3715, %v4359_v9   ;;  %65 = vperm.xlu0 %3714, %v4364_v10  }
  0x28   :  { %3716 = vset.pattern.permute.xlu1 %v4242_v11  ;;  %3717 = vset.pattern.permute.xlu0 %v4242_v11 }
  0x29   :  { %242 = vperm.xlu1 %3716, %v4364_v10   ;;  %246 = vperm.xlu0 %3717, %v4359_v9  }
  0x2d   :  { %3718 = vset.pattern.permute.xlu1 %v4241_v8  ;;  %250 = vperm.xlu0 %3717, %v4376_v12  }
  0x2e   :  { %75 = vperm.xlu1 %3718, %v4376_v12  }
  0x32   :  { %80 = vperm.xlu1 %3718, %v4384_v13  }
  0x36   :  { %3719 = vset.pattern.permute.xlu1 %v4242_v11 }
  0x37   :  { %254 = vperm.xlu1 %3719, %v4384_v13  }
  0x76   :  { %v3676_v14 = vpop.permute.xlu0 %3675  ;;  %v3686_v15 = vpop.permute.xlu1 %3685 }
  0x77   :  { %v3678_v16 = vunpack.i.h.bf16 %v3676_v14  ;;  %v3677_v17 = vunpack.i.l.bf16 %v3676_v14  ;;  %v3688_v21 = vunpack.i.h.bf16 %v3686_v15  ;;  %v3687_v22 = vunpack.i.l.bf16 %v3686_v15 }
  0x79   :  { %v3288_v18 = vpack.c.bf16 %v3678_v16, %v3677_v17  ;;  %v3294_v30 = vpack.c.bf16 %v3688_v21, %v3687_v22 }
  0x7a   :  { %v3681_v19 = vpop.permute.xlu0 %3680  ;;  %v3691_v20 = vpop.permute.xlu1 %3690 }
  0x7b   :  { %v3683_v23 = vunpack.i.h.bf16 %v3681_v19  ;;  %v3682_v24 = vunpack.i.l.bf16 %v3681_v19  ;;  %3289 = vmatpush1.bf16.msra.mxu1 %v3288_v18  ;;  %v3693_v28 = vunpack.i.h.bf16 %v3691_v20  ;;  %v3692_v29 = vunpack.i.l.bf16 %v3691_v20 }
  0x7c   :  { %3290 = vmatprep.subr.bf16.mxu1 %v4232_v2 }
  0x7d   :  { %v3291_v25 = vpack.c.bf16 %v3683_v23, %v3682_v24  ;;  %v3297_v34 = vpack.c.bf16 %v3693_v28, %v3692_v29 }
  0x7e   :  { %v3696_v26 = vpop.permute.xlu0 %3695  ;;  %v32_v27 = vpop.permute.xlu1 %31 }
  0x7f   :  { %3292 = vmatpush1.bf16.msra.mxu1 %v3291_v25  ;;  %v3268_v31 = vpack.c.bf16 %v32_v27, %v4325_v5  ;;  %v3698_v35 = vunpack.i.h.bf16 %v3696_v26  ;;  %v3697_v36 = vunpack.i.l.bf16 %v3696_v26 }
  0x80   :  { %3293 = vmatprep.subr.bf16.mxu1 %v4232_v2 }
  0x81   :  { %3269 = vmatprep.subr.bf16.mxu0 %v3268_v31  ;;  %v3300_v42 = vpack.c.bf16 %v3698_v35, %v3697_v36 }
  0x82   :  { %v3701_v32 = vpop.permute.xlu0 %3700  ;;  %v35_v33 = vpop.permute.xlu1 %34  ;;  %3271 = vmatpush3.bf16.msra.mxu0 %v3268_v31 }
  0x83   :  { %3295 = vmatpush1.bf16.msra.mxu1 %v3294_v30  ;;  %v3703_v40 = vunpack.i.h.bf16 %v3701_v32  ;;  %v3702_v41 = vunpack.i.l.bf16 %v3701_v32 }
  0x84   :  { %3296 = vmatprep.subr.bf16.mxu1 %v4232_v2 }
  0x85   :  { %v3303_v48 = vpack.c.bf16 %v3703_v40, %v3702_v41 }
  0x86   :  { %v38_v37 = vpop.permute.xlu0 %37  ;;  %v3706_v38 = vpop.permute.xlu1 %3705 }
  0x87   :  { %v3272_v39 = vpack.c.bf16 %v38_v37, %v35_v33  ;;  %3298 = vmatpush1.bf16.msra.mxu1 %v3297_v34  ;;  %v3708_v45 = vunpack.i.h.bf16 %v3706_v38  ;;  %v3707_v46 = vunpack.i.l.bf16 %v3706_v38  ;;  %v4443_v38 = vld [vmem:[%s5121_s0] ss:$0 sm:$0xff] }
  0x88   :  { %3299 = vmatprep.subr.bf16.mxu1 %v4232_v2 }
  0x89   :  { %3273 = vmatprep.subr.bf16.mxu0 %v3272_v39  ;;  %v3306_v52 = vpack.c.bf16 %v3708_v45, %v3707_v46 }
  0x8a   :  { %v41_v43 = vpop.permute.xlu0 %40  ;;  %3275 = vmatpush3.bf16.msra.mxu0 %v3272_v39  ;;  %v44_v44 = vpop.permute.xlu1 %43 }
  0x8b   :  { %3301 = vmatpush1.bf16.msra.mxu1 %v3300_v42  ;;  %v3276_v47 = vpack.c.bf16 %v44_v44, %v41_v43 }
  0x8c   :  { %3302 = vmatprep.subr.bf16.mxu1 %v4232_v2 }
  0x8d   :  { %3277 = vmatprep.subr.bf16.mxu0 %v3276_v47 }
  0x8e   :  { %v3711_v49 = vpop.permute.xlu0 %3710  ;;  %3279 = vmatpush3.bf16.msra.mxu0 %v3276_v47  ;;  %v47_v53 = vpop.permute.xlu1 %46 }
  0x8f   :  { %v3713_v50 = vunpack.i.h.bf16 %v3711_v49  ;;  %v3712_v51 = vunpack.i.l.bf16 %v3711_v49  ;;  %3304 = vmatpush1.bf16.msra.mxu1 %v3303_v48 }
  0x90   :  { %3305 = vmatprep.subr.bf16.mxu1 %v4232_v2 }
  0x91   :  { %v3309_v56 = vpack.c.bf16 %v3713_v50, %v3712_v51 }
  0x92   :  { %v50_v54 = vpop.permute.xlu0 %49  ;;  %v53_v57 = vpop.permute.xlu1 %52 }
  0x93   :  { %v3280_v55 = vpack.c.bf16 %v50_v54, %v47_v53  ;;  %3307 = vmatpush1.bf16.msra.mxu1 %v3306_v52 }
  0x94   :  { %3308 = vmatprep.subr.bf16.mxu1 %v4232_v2 }
  0x95   :  { %3281 = vmatprep.subr.bf16.mxu0 %v3280_v55 }
  0x96   :  { %3283 = vmatpush3.bf16.msra.mxu0 %v3280_v55 }
  0x97   :  { %3310 = vmatpush1.bf16.msra.mxu1 %v3309_v56  ;;  %3119 = vmatprep.subr.mxu0 %v53_v57 }
  0x9a   :  { %3120 = vmatpush3.msra.mxu0 %v53_v57  ;;  %335 = vmatmul.mubr.f32.vlgmr.msra.gmra.mrb[0].mxu1 %v233_v58 }
  0x9b   :  { %3122 = vmatmul.mubr.msk.f32.vlgmr.msra.gmra.mrb[0].mxu0 %vm83_vm1, %v56_v59  ;;  %2847 = vmatprep.mubr.msk.f32.mxu1 %vm257_vm0, %v236_v60 }
  0x9c   :  { %3124 = vmatprep.mubr.msk.f32.mxu0 %vm83_vm1, %v57_v61 }
  0x9e   :  { %340 = vmatmul.mubr.f32.gmra.mrb[2].mxu1 %v235_v62 }
  0x9f   :  { %3125 = vmatmul.mubr.msk.f32.gmra.mrb[2].mxu0 %vm83_vm1, %v58_v63  ;;  %2848 = vmatprep.mubr.msk.f32.mxu1 %vm257_vm0, %v238_v0 }
  0xa2   :  { %345 = vmatmul.mubr.f32.gmra.mrb[4].mxu1 %v237_v1 }
  0xa3   :  { %2849 = vmatprep.mubr.msk.f32.mxu1 %vm257_vm0, %v240_v3  ;;  %v71_v5 = vpop.permute.xlu1 %70  ;;  %v66_v7 = vpop.permute.xlu0 %65 }
  0xa6   :  { %350 = vmatmul.mubr.f32.gmra.mrb[6].mxu1 %v239_v4 }
  0xa8   :  { %v243_v6 = vpop.permute.xlu1 %242  ;;  %v247_v16 = vpop.permute.xlu0 %246 }
  0xac   :  { %v251_v30 = vpop.permute.xlu0 %250 }
  0xad   :  { %v76_v14 = vpop.permute.xlu1 %75 }
  0xb1   :  { %v81_v22 = vpop.permute.xlu1 %80 }
  0xb6   :  { %v255_v40 = vpop.permute.xlu1 %254 }
 0x16d   :  { %v336_v15 = vpop.f32.mrb[0].mxu1 }
 0x16e   :  { %v3123_v17 = vpop.f32.mrb[0].mxu0  ;;  %v338_v18 = vpop.f32.mrb[1].mxu1  ;;  %v337_v20 = vadd.f32 %v336_v15, %v243_v6 }
 0x16f   :  { %v162_v19 = vpop.f32.mrb[1].mxu0  ;;  %v168_v24 = vadd.f32 %v3123_v17, %v71_v5 }
 0x170   :  { %v163_v21 = vadd.f32 %v162_v19, %v66_v7  ;;  %v508_v19 = vld [vmem:[%s5119_s5 + $0xc8] sm:$0xff] }
 0x171   :  { %v341_v23 = vpop.f32.mrb[2].mxu1  ;;  %596 = vmatprep.mubr.f32.mxu0 %v508_v19 }
 0x172   :  { %v4433_v25 = vadd.f32 %v337_v20, %v163_v21  ;;  %v342_v26 = vadd.f32 %v341_v23, %v247_v16  ;;  %v3126_v27 = vpop.f32.mrb[2].mxu0  ;;  %v343_v28 = vpop.f32.mrb[3].mxu1  ;;  %v4244_v20 = vmov 2  }
 0x173   :  { %v172_v29 = vpop.f32.mrb[3].mxu0  ;;  %v178_v46 = vadd.f32 %v3126_v27, %v81_v22  ;;  %3810 = vset.pattern.permute.xlu0 %v4244_v20  ;;  %3811 = vset.pattern.permute.xlu1 %v4244_v20 }
 0x174   :  { %v363_v31 = vmul.f32 0.25, %v4433_v25  ;;  %v4436_v32 = vadd.f32 %v342_v26, %v168_v24  ;;  %vm359_vm2 = vcmp.ge.f32.partialorder %v4433_v25, 0.0  ;;  %v173_v33 = vadd.f32 %v172_v29, %v76_v14  ;;  %v2379_v26 = vld [vmem:[%s5119_s5 + $0x2c0] sm:$0xff] }
 0x175   :  { %v346_v34 = vpop.f32.mrb[4].mxu1 }
 0x176   :  { %v364_v35 = vmul.f32 0.25, %v4436_v32  ;;  %v347_v36 = vadd.f32 %v346_v34, %v251_v30  ;;  %v348_v37 = vpop.f32.mrb[5].mxu1  ;;  %vm360_vm3 = vcmp.ge.f32.partialorder %v4436_v32, 0.0  ;;  %v367_v39 = vsel %vm359_vm2, %v4433_v25, %v363_v31 }
 0x177   :  { %v377_v44 = vmul.f32 %v4443_v38, %v367_v39 }
 0x178   :  { %v4447_v41 = vadd.f32 %v347_v36, %v173_v33  ;;  %v368_v42 = vsel %vm360_vm3, %v4436_v32, %v364_v35 }
 0x179   :  { %v351_v43 = vpop.f32.mrb[6].mxu1  ;;  %v378_v45 = vmul.f32 %v4443_v38, %v368_v42 }
 0x17a   :  { %v365_v47 = vmul.f32 0.25, %v4447_v41  ;;  %v352_v48 = vadd.f32 %v351_v43, %v255_v40  ;;  %v353_v49 = vpop.f32.mrb[7].mxu1  ;;  %vm361_vm4 = vcmp.ge.f32.partialorder %v4447_v41, 0.0 }
 0x17b   :  { %v3720_v50 = vpack.i.bf16 %v378_v45, %v377_v44 }
 0x17c   :  { %v4454_v51 = vadd.f32 %v352_v48, %v178_v46  ;;  %v369_v53 = vsel %vm361_vm4, %v4447_v41, %v365_v47 }
 0x17d   :  { %3721 = vrot.lane.b32.xlu0 %v3720_v50, %s4243_s18  ;;  %v379_v55 = vmul.f32 %v4443_v38, %v369_v53 }
 0x17e   :  { %v366_v52 = vmul.f32 0.25, %v4454_v51  ;;  %vm362_vm5 = vcmp.ge.f32.partialorder %v4454_v51, 0.0 }
 0x180   :  { %v370_v54 = vsel %vm362_vm5, %v4454_v51, %v366_v52 }
 0x181   :  { %v380_v56 = vmul.f32 %v4443_v38, %v370_v54 }
 0x183   :  { %v3725_v57 = vpack.i.bf16 %v380_v56, %v379_v55 }
 0x185   :  { %3726 = vrot.lane.b32.xlu1 %v3725_v57, %s4243_s18 }
 0x1ef   :  { %v3722_v58 = vpop.permute.xlu0 %3721 }
 0x1f0   :  { %v3724_v59 = vunpack.i.h.bf16 %v3722_v58  ;;  %v3723_v60 = vunpack.i.l.bf16 %v3722_v58 }
 0x1f2   :  { %v399_v61 = vsel %vm397_vm6, 0.0, %v3724_v59  ;;  %v398_v62 = vsel %vm397_vm6, 0.0, %v3723_v60 }
 0x1f3   :  { %v404_v63 = vsel %vm402_vm7, %v399_v61, 0.0  ;;  %v403_v0 = vsel %vm402_vm7, %v398_v62, 0.0  ;;  %v3313_v1 = vpack.c.bf16 %v399_v61, %v398_v62 }
 0x1f4   :  { %v3730_v3 = vpack.i.bf16 %v404_v63, %v403_v0 }
 0x1f6   :  { %3731 = vrot.lane.b32.xlu0 %v3730_v3, %s4236_s12 }
 0x1f7   :  { %v3727_v4 = vpop.permute.xlu1 %3726 }
 0x1f8   :  { %v3729_v5 = vunpack.i.h.bf16 %v3727_v4  ;;  %v3728_v6 = vunpack.i.l.bf16 %v3727_v4 }
 0x1fa   :  { %v401_v7 = vsel %vm397_vm6, 0.0, %v3729_v5  ;;  %v400_v14 = vsel %vm397_vm6, 0.0, %v3728_v6  ;;  %3741 = vrot.lane.b32.xlu0 %v3730_v3, %s4237_s14 }
 0x1fb   :  { %v406_v15 = vsel %vm402_vm7, %v401_v7, 0.0  ;;  %v405_v16 = vsel %vm402_vm7, %v400_v14, 0.0  ;;  %v3318_v17 = vpack.c.bf16 %v401_v7, %v400_v14 }
 0x1fc   :  { %v3735_v18 = vpack.i.bf16 %v406_v15, %v405_v16 }
 0x1fe   :  { %3736 = vrot.lane.b32.xlu1 %v3735_v18, %s4236_s12  ;;  %3751 = vrot.lane.b32.xlu0 %v3735_v18, %s4237_s14 }
 0x202   :  { %3746 = vrot.lane.b32.xlu1 %v3730_v3, %s4233_s9  ;;  %3756 = vrot.lane.b32.xlu0 %v3730_v3, %s4238_s15 }
 0x206   :  { %3761 = vrot.lane.b32.xlu1 %v3735_v18, %s4233_s9  ;;  %3771 = vrot.lane.b32.xlu0 %v3735_v18, %s4238_s15 }
 0x20a   :  { %3766 = vrot.lane.b32.xlu1 %v3730_v3, %s4235_s11  ;;  %3776 = vrot.lane.b32.xlu0 %v3730_v3, %s4239_s16 }
 0x20e   :  { %3781 = vrot.lane.b32.xlu1 %v3735_v18, %s4235_s11  ;;  %3791 = vrot.lane.b32.xlu0 %v3735_v18, %s4239_s16 }
 0x212   :  { %3786 = vrot.lane.b32.xlu1 %v3730_v3, %s4234_s10  ;;  %3801 = vrot.lane.b32.xlu0 %v3730_v3, %s4240_s20 }
 0x216   :  { %3796 = vrot.lane.b32.xlu1 %v3735_v18, %s4234_s10  ;;  %517 = vperm.xlu0 %3810, %v4364_v10  }
 0x21a   :  { %3806 = vrot.lane.b32.xlu1 %v3735_v18, %s4240_s20 }
 0x21e   :  { %522 = vperm.xlu1 %3811, %v4359_v9  }
 0x268   :  { %v3732_v21 = vpop.permute.xlu0 %3731 }
 0x269   :  { %v3734_v22 = vunpack.i.h.bf16 %v3732_v21  ;;  %v3733_v23 = vunpack.i.l.bf16 %v3732_v21 }
 0x26b   :  { %v3311_v24 = vpack.c.bf16 %v3734_v22, %v3733_v23 }
 0x26c   :  { %v3742_v27 = vpop.permute.xlu0 %3741 }
 0x26d   :  { %3312 = vmatprep.subr.bf16.mxu0 %v3311_v24  ;;  %v3744_v30 = vunpack.i.h.bf16 %v3742_v27  ;;  %v3743_v31 = vunpack.i.l.bf16 %v3742_v27 }
 0x26e   :  { %3315 = vmatpush3.bf16.msk.msra.mxu0 %vm4497_vm8, %v3313_v1 }
 0x26f   :  { %v3321_v44 = vpack.c.bf16 %v3744_v30, %v3743_v31 }
 0x270   :  { %v3737_v28 = vpop.permute.xlu1 %3736  ;;  %v3752_v29 = vpop.permute.xlu0 %3751 }
 0x271   :  { %v3739_v33 = vunpack.i.h.bf16 %v3737_v28  ;;  %v3738_v34 = vunpack.i.l.bf16 %v3737_v28  ;;  %v3754_v36 = vunpack.i.h.bf16 %v3752_v29  ;;  %v3753_v37 = vunpack.i.l.bf16 %v3752_v29 }
 0x273   :  { %v3316_v35 = vpack.c.bf16 %v3739_v33, %v3738_v34  ;;  %v3325_v48 = vpack.c.bf16 %v3754_v36, %v3753_v37  ;;  %v507_v37 = vld [vmem:[%s5119_s5 + $0xc0] sm:$0xff] }
 0x274   :  { %v3747_v39 = vpop.permute.xlu1 %3746  ;;  %v3757_v40 = vpop.permute.xlu0 %3756 }
 0x275   :  { %v3749_v42 = vunpack.i.h.bf16 %v3747_v39  ;;  %v3748_v43 = vunpack.i.l.bf16 %v3747_v39  ;;  %3317 = vmatprep.subr.bf16.mxu0 %v3316_v35  ;;  %v3759_v49 = vunpack.i.h.bf16 %v3757_v40  ;;  %v3758_v50 = vunpack.i.l.bf16 %v3757_v40  ;;  %v511_v39 = vld [vmem:[%s5119_s5 + $0xe0] sm:$0xff] }
 0x276   :  { %3320 = vmatpush3.bf16.msk.msra.mxu0 %vm4497_vm8, %v3318_v17 }
 0x277   :  { %v3323_v45 = vpack.c.bf16 %v3749_v42, %v3748_v43  ;;  %3322 = vmatprep.subr.bf16.mxu0 %v3321_v44  ;;  %v3329_v61 = vpack.c.bf16 %v3759_v49, %v3758_v50  ;;  %v510_v42 = vld [vmem:[%s5119_s5 + $0xd8] sm:$0xff]  ;;  %v509_v43 = vld [vmem:[%s5119_s5 + $0xd0] sm:$0xff]  ;;  %v512_v44 = vld [vmem:[%s5119_s5 + $0xe8] sm:$0xff] }
 0x278   :  { %v3762_v46 = vpop.permute.xlu1 %3761  ;;  %v3772_v47 = vpop.permute.xlu0 %3771 }
 0x279   :  { %v3764_v52 = vunpack.i.h.bf16 %v3762_v46  ;;  %v3763_v53 = vunpack.i.l.bf16 %v3762_v46  ;;  %v3774_v55 = vunpack.i.h.bf16 %v3772_v47  ;;  %v3773_v56 = vunpack.i.l.bf16 %v3772_v47 }
 0x27a   :  { %3324 = vmatpush3.bf16.msra.mxu0 %v3323_v45 }
 0x27b   :  { %v3327_v54 = vpack.c.bf16 %v3764_v52, %v3763_v53  ;;  %3326 = vmatprep.subr.bf16.mxu0 %v3325_v48  ;;  %v3333_v1 = vpack.c.bf16 %v3774_v55, %v3773_v56 }
 0x27c   :  { %v3767_v57 = vpop.permute.xlu1 %3766  ;;  %v3777_v58 = vpop.permute.xlu0 %3776 }
 0x27d   :  { %v3769_v59 = vunpack.i.h.bf16 %v3767_v57  ;;  %v3768_v60 = vunpack.i.l.bf16 %v3767_v57  ;;  %v3779_v3 = vunpack.i.h.bf16 %v3777_v58  ;;  %v3778_v4 = vunpack.i.l.bf16 %v3777_v58 }
 0x27e   :  { %3328 = vmatpush3.bf16.msra.mxu0 %v3327_v54 }
 0x27f   :  { %v3331_v62 = vpack.c.bf16 %v3769_v59, %v3768_v60  ;;  %3330 = vmatprep.subr.bf16.mxu0 %v3329_v61  ;;  %v3337_v19 = vpack.c.bf16 %v3779_v3, %v3778_v4 }
 0x280   :  { %v3782_v63 = vpop.permute.xlu1 %3781  ;;  %v3792_v0 = vpop.permute.xlu0 %3791 }
 0x281   :  { %v3784_v5 = vunpack.i.h.bf16 %v3782_v63  ;;  %v3783_v6 = vunpack.i.l.bf16 %v3782_v63  ;;  %v3794_v14 = vunpack.i.h.bf16 %v3792_v0  ;;  %v3793_v15 = vunpack.i.l.bf16 %v3792_v0 }
 0x282   :  { %3332 = vmatpush3.bf16.msra.mxu0 %v3331_v62 }
 0x283   :  { %v3335_v7 = vpack.c.bf16 %v3784_v5, %v3783_v6  ;;  %3334 = vmatprep.subr.bf16.mxu0 %v3333_v1  ;;  %v3341_v24 = vpack.c.bf16 %v3794_v14, %v3793_v15 }
 0x284   :  { %v3787_v16 = vpop.permute.xlu1 %3786  ;;  %v3802_v21 = vpop.permute.xlu0 %3801 }
 0x285   :  { %v3789_v17 = vunpack.i.h.bf16 %v3787_v16  ;;  %v3788_v18 = vunpack.i.l.bf16 %v3787_v16  ;;  %v3804_v27 = vunpack.i.h.bf16 %v3802_v21  ;;  %v3803_v28 = vunpack.i.l.bf16 %v3802_v21 }
 0x286   :  { %3336 = vmatpush3.bf16.msra.mxu0 %v3335_v7  ;;  %v4245_v21 = vmov 3  }
 0x287   :  { %v3339_v22 = vpack.c.bf16 %v3789_v17, %v3788_v18  ;;  %3338 = vmatprep.subr.bf16.mxu0 %v3337_v19  ;;  %v3345_v36 = vpack.c.bf16 %v3804_v27, %v3803_v28  ;;  %v753_v19 = vld [vmem:[%s5119_s5 + $0xf8] sm:$0xff]  ;;  %3857 = vset.pattern.permute.xlu0 %v4245_v21 }
 0x288   :  { %v3797_v23 = vpop.permute.xlu1 %3796  ;;  %3858 = vset.pattern.permute.xlu1 %v4245_v21 }
 0x289   :  { %v3799_v29 = vunpack.i.h.bf16 %v3797_v23  ;;  %v3798_v30 = vunpack.i.l.bf16 %v3797_v23 }
 0x28a   :  { %3340 = vmatpush3.bf16.msra.mxu0 %v3339_v22 }
 0x28b   :  { %v3343_v31 = vpack.c.bf16 %v3799_v29, %v3798_v30  ;;  %3342 = vmatprep.subr.bf16.mxu0 %v3341_v24 }
 0x28c   :  { %v3807_v33 = vpop.permute.xlu1 %3806 }
 0x28d   :  { %v3809_v34 = vunpack.i.h.bf16 %v3807_v33  ;;  %v3808_v35 = vunpack.i.l.bf16 %v3807_v33 }
 0x28e   :  { %3344 = vmatpush3.bf16.msra.mxu0 %v3343_v31 }
 0x28f   :  { %3346 = vmatprep.subr.bf16.mxu0 %v3345_v36  ;;  %v3349_v40 = vpack.c.bf16 %v3809_v34, %v3808_v35 }
 0x291   :  { %597 = vmatmul.mubr.f32.vlgmr.msra.gmra.mrb[4].mxu0 %v507_v37 }
 0x292   :  { %3348 = vmatpush3.bf16.msra.mxu0 %v3345_v36  ;;  %601 = vmatprep.mubr.f32.mxu0 %v511_v39 }
 0x293   :  { %3350 = vmatprep.subr.bf16.mxu0 %v3349_v40 }
 0x295   :  { %602 = vmatmul.mubr.f32.gmra.mrb[6].mxu0 %v510_v42  ;;  %v518_v48 = vpop.permute.xlu0 %517 }
 0x296   :  { %3352 = vmatpush3.bf16.msra.mxu0 %v3349_v40  ;;  %3135 = vmatprep.mubr.msk.f32.mxu0 %vm525_vm9, %v509_v43 }
 0x297   :  { %3353 = vmatprep.subr.bf16.mxu0 %v4232_v2 }
 0x299   :  { %3136 = vmatmul.mubr.msk.f32.vlgmr.msra.gmra.mrb[8].mxu0 %vm525_vm9, %v512_v44 }
 0x29a   :  { %2859 = vmatprep.mubr.msk.f32.mxu0 %vm257_vm0, %v753_v19 }
 0x29d   :  { %v523_v52 = vpop.permute.xlu1 %522 }
 0x364   :  { %v2950_v45 = vpop.f32.mrb[4].mxu0 }
 0x365   :  { %v2951_v46 = vpop.f32.mrb[5].mxu0 }
 0x366   :  { %v2952_v47 = vadd.f32 %v2951_v46, %v2950_v45 }
 0x368   :  { %v2953_v49 = vpop.f32.mrb[6].mxu0  ;;  %v599_v54 = vadd.f32 %v2952_v47, %v518_v48 }
 0x369   :  { %v2954_v50 = vpop.f32.mrb[7].mxu0 }
 0x36a   :  { %v2955_v53 = vadd.f32 %v2954_v50, %v2953_v49 }
 0x36c   :  { %v604_v55 = vadd.f32 %v2955_v53, %v523_v52  ;;  %v3137_v56 = vpop.f32.mrb[8].mxu0 }
 0x36d   :  { %v673_v57 = vpop.f32.mrb[9].mxu0 }
 0x36e   :  { %v679_v58 = vadd.f32 %v3137_v56, %v604_v55  ;;  %v674_v59 = vadd.f32 %v673_v57, %v599_v54  ;;  %v752_v57 = vld [vmem:[%s5119_s5 + $0xf0] sm:$0xff] }
 0x370   :  { %vm683_vm10 = vcmp.ge.f32.partialorder %v679_v58, 0.0  ;;  %v685_v60 = vmul.f32 0.25, %v679_v58  ;;  %vm682_vm11 = vcmp.ge.f32.partialorder %v674_v59, 0.0  ;;  %v684_v61 = vmul.f32 0.25, %v674_v59 }
 0x372   :  { %v687_v62 = vsel %vm683_vm10, %v679_v58, %v685_v60  ;;  %v686_v63 = vsel %vm682_vm11, %v674_v59, %v684_v61  ;;  %v755_v58 = vld [vmem:[%s5119_s5 + $0x110] sm:$0xff]  ;;  %v754_v59 = vld [vmem:[%s5119_s5 + $0x108] sm:$0xff]  ;;  %v756_v61 = vld [vmem:[%s5119_s5 + $0x120] sm:$0xff]  ;;  %vm2784_vm10 = vcmask 744448   ;;  %vm2809_vm11 = vcmask 736256  }
 0x373   :  { %v688_v0 = vmul.f32 %v4443_v38, %v686_v63  ;;  %v689_v1 = vmul.f32 %v4443_v38, %v687_v62  ;;  %v757_v60 = vld [vmem:[%s5119_s5 + $0x128] sm:$0xff]  ;;  %v759_v62 = vld [vmem:[%s5119_s5 + $0x140] sm:$0xff]  ;;  %v758_v63 = vld [vmem:[%s5119_s5 + $0x138] sm:$0xff] }
 0x375   :  { %v3812_v3 = vpack.i.bf16 %v689_v1, %v688_v0 }
 0x377   :  { %3813 = vrot.lane.b32.xlu1 %v3812_v3, %s4243_s18 }
 0x3e9   :  { %v3814_v4 = vpop.permute.xlu1 %3813 }
 0x3ea   :  { %v3816_v5 = vunpack.i.h.bf16 %v3814_v4  ;;  %v3815_v6 = vunpack.i.l.bf16 %v3814_v4 }
 0x3ec   :  { %v699_v7 = vsel %vm397_vm6, 0.0, %v3816_v5  ;;  %v698_v14 = vsel %vm397_vm6, 0.0, %v3815_v6 }
 0x3ed   :  { %v701_v15 = vsel %vm402_vm7, %v699_v7, 0.0  ;;  %v700_v16 = vsel %vm402_vm7, %v698_v14, 0.0  ;;  %v3354_v17 = vpack.c.bf16 %v699_v7, %v698_v14 }
 0x3ee   :  { %v3822_v18 = vpack.i.bf16 %v701_v15, %v700_v16 }
 0x3ef   :  { %3356 = vmatpush1.bf16.msk.msra.mxu0 %vm4497_vm8, %v3354_v17 }
 0x3f0   :  { %3823 = vrot.lane.b32.xlu1 %v3822_v18, %s4235_s11  ;;  %3818 = vrot.lane.b32.xlu0 %v3822_v18, %s4233_s9 }
 0x3f1   :  { %3357 = vmatprep.subr.bf16.mxu0 %v4232_v2 }
 0x3f4   :  { %3833 = vrot.lane.b32.xlu1 %v3822_v18, %s4236_s12  ;;  %3828 = vrot.lane.b32.xlu0 %v3822_v18, %s4234_s10 }
 0x3f8   :  { %3843 = vrot.lane.b32.xlu1 %v3822_v18, %s4238_s15  ;;  %3838 = vrot.lane.b32.xlu0 %v3822_v18, %s4237_s14 }
 0x3fc   :  { %3853 = vrot.lane.b32.xlu1 %v3822_v18, %s4240_s20  ;;  %3848 = vrot.lane.b32.xlu0 %v3822_v18, %s4239_s16 }
 0x400   :  { %761 = vperm.xlu0 %3857, %v4364_v10   ;;  %765 = vperm.xlu1 %3858, %v4359_v9  }
 0x404   :  { %769 = vperm.xlu1 %3858, %v4376_v12   ;;  %773 = vperm.xlu0 %3857, %v4384_v13  }
 0x462   :  { %v3824_v22 = vpop.permute.xlu1 %3823  ;;  %v3819_v23 = vpop.permute.xlu0 %3818 }
 0x463   :  { %v3821_v24 = vunpack.i.h.bf16 %v3819_v23  ;;  %v3820_v27 = vunpack.i.l.bf16 %v3819_v23  ;;  %v3826_v28 = vunpack.i.h.bf16 %v3824_v22  ;;  %v3825_v29 = vunpack.i.l.bf16 %v3824_v22 }
 0x465   :  { %v3358_v30 = vpack.c.bf16 %v3821_v24, %v3820_v27  ;;  %v3361_v33 = vpack.c.bf16 %v3826_v28, %v3825_v29 }
 0x466   :  { %v3829_v31 = vpop.permute.xlu0 %3828  ;;  %v3834_v36 = vpop.permute.xlu1 %3833 }
 0x467   :  { %3359 = vmatpush1.bf16.msra.mxu0 %v3358_v30  ;;  %v3831_v34 = vunpack.i.h.bf16 %v3829_v31  ;;  %v3830_v35 = vunpack.i.l.bf16 %v3829_v31  ;;  %v3836_v9 = vunpack.i.h.bf16 %v3834_v36  ;;  %v3835_v12 = vunpack.i.l.bf16 %v3834_v36 }
 0x468   :  { %3360 = vmatprep.subr.bf16.mxu0 %v4232_v2 }
 0x469   :  { %v3364_v13 = vpack.c.bf16 %v3831_v34, %v3830_v35  ;;  %v3367_v39 = vpack.c.bf16 %v3836_v9, %v3835_v12 }
 0x46a   :  { %v3839_v37 = vpop.permute.xlu0 %3838  ;;  %v3844_v43 = vpop.permute.xlu1 %3843 }
 0x46b   :  { %3362 = vmatpush1.bf16.msra.mxu0 %v3361_v33  ;;  %v3841_v40 = vunpack.i.h.bf16 %v3839_v37  ;;  %v3840_v42 = vunpack.i.l.bf16 %v3839_v37  ;;  %v3846_v44 = vunpack.i.h.bf16 %v3844_v43  ;;  %v3845_v45 = vunpack.i.l.bf16 %v3844_v43 }
 0x46c   :  { %3363 = vmatprep.subr.bf16.mxu0 %v4232_v2 }
 0x46d   :  { %v3370_v46 = vpack.c.bf16 %v3841_v40, %v3840_v42  ;;  %v3373_v48 = vpack.c.bf16 %v3846_v44, %v3845_v45 }
 0x46e   :  { %v3849_v47 = vpop.permute.xlu0 %3848  ;;  %v3854_v52 = vpop.permute.xlu1 %3853 }
 0x46f   :  { %3365 = vmatpush1.bf16.msra.mxu0 %v3364_v13  ;;  %v3851_v49 = vunpack.i.h.bf16 %v3849_v47  ;;  %v3850_v50 = vunpack.i.l.bf16 %v3849_v47  ;;  %v3856_v53 = vunpack.i.h.bf16 %v3854_v52  ;;  %v3855_v54 = vunpack.i.l.bf16 %v3854_v52  ;;  %v1002_v52 = vld [vmem:[%s5119_s5 + $0x158] sm:$0xff] }
 0x470   :  { %3366 = vmatprep.subr.bf16.mxu0 %v4232_v2  ;;  %1077 = vmatprep.mubr.f32.mxu1 %v1002_v52 }
 0x471   :  { %v3376_v55 = vpack.c.bf16 %v3851_v49, %v3850_v50  ;;  %v3379_v56 = vpack.c.bf16 %v3856_v53, %v3855_v54  ;;  %v4246_v53 = vmov 4  }
 0x472   :  { %3949 = vset.pattern.permute.xlu1 %v4246_v53 }
 0x473   :  { %3368 = vmatpush1.bf16.msra.mxu0 %v3367_v39 }
 0x474   :  { %3369 = vmatprep.subr.bf16.mxu0 %v4232_v2 }
 0x477   :  { %3371 = vmatpush1.bf16.msra.mxu0 %v3370_v46 }
 0x478   :  { %3372 = vmatprep.subr.bf16.mxu0 %v4232_v2 }
 0x47b   :  { %3374 = vmatpush1.bf16.msra.mxu0 %v3373_v48 }
 0x47c   :  { %3375 = vmatprep.subr.bf16.mxu0 %v4232_v2 }
 0x47f   :  { %3377 = vmatpush1.bf16.msra.mxu0 %v3376_v55  ;;  %v762_v0 = vpop.permute.xlu0 %761  ;;  %v766_v4 = vpop.permute.xlu1 %765 }
 0x480   :  { %3378 = vmatprep.subr.bf16.mxu0 %v4232_v2 }
 0x483   :  { %3380 = vmatpush1.bf16.msra.mxu0 %v3379_v56  ;;  %v770_v17 = vpop.permute.xlu1 %769  ;;  %v774_v24 = vpop.permute.xlu0 %773 }
 0x486   :  { %853 = vmatmul.mubr.f32.vlgmr.msra.gmra.mrb[10].mxu0 %v752_v57 }
 0x487   :  { %2860 = vmatprep.mubr.msk.f32.mxu0 %vm257_vm0, %v755_v58 }
 0x48a   :  { %858 = vmatmul.mubr.f32.gmra.mrb[12].mxu0 %v754_v59 }
 0x48b   :  { %2861 = vmatprep.mubr.msk.f32.mxu0 %vm257_vm0, %v757_v60 }
 0x48e   :  { %863 = vmatmul.mubr.f32.gmra.mrb[14].mxu0 %v756_v61 }
 0x48f   :  { %2862 = vmatprep.mubr.msk.f32.mxu0 %vm257_vm0, %v759_v62 }
 0x492   :  { %868 = vmatmul.mubr.f32.gmra.mrb[16].mxu0 %v758_v63 }
 0x559   :  { %v854_v1 = vpop.f32.mrb[10].mxu0 }
 0x55a   :  { %v856_v3 = vpop.f32.mrb[11].mxu0  ;;  %v4582_v5 = vadd.f32 %v854_v1, %v762_v0 }
 0x55c   :  { %v873_v15 = vmul.f32 %v4443_v38, %v4582_v5 }
 0x55d   :  { %v859_v6 = vpop.f32.mrb[12].mxu0 }
 0x55e   :  { %v4584_v7 = vadd.f32 %v859_v6, %v766_v4  ;;  %v861_v14 = vpop.f32.mrb[13].mxu0 }
 0x560   :  { %v874_v16 = vmul.f32 %v4443_v38, %v4584_v7 }
 0x561   :  { %v864_v18 = vpop.f32.mrb[14].mxu0 }
 0x562   :  { %v866_v19 = vpop.f32.mrb[15].mxu0  ;;  %v3859_v22 = vpack.i.bf16 %v874_v16, %v873_v15  ;;  %v4590_v23 = vadd.f32 %v864_v18, %v770_v17 }
 0x564   :  { %3860 = vrot.lane.b32.xlu1 %v3859_v22, %s4243_s18  ;;  %v875_v30 = vmul.f32 %v4443_v38, %v4590_v23 }
 0x565   :  { %v869_v27 = vpop.f32.mrb[16].mxu0 }
 0x566   :  { %v4593_v28 = vadd.f32 %v869_v27, %v774_v24  ;;  %v871_v29 = vpop.f32.mrb[17].mxu0 }
 0x568   :  { %v876_v31 = vmul.f32 %v4443_v38, %v4593_v28 }
 0x56a   :  { %v3864_v33 = vpack.i.bf16 %v876_v31, %v875_v30 }
 0x56c   :  { %3865 = vrot.lane.b32.xlu0 %v3864_v33, %s4243_s18 }
 0x5d6   :  { %v3861_v34 = vpop.permute.xlu1 %3860 }
 0x5d7   :  { %v3863_v35 = vunpack.i.h.bf16 %v3861_v34  ;;  %v3862_v36 = vunpack.i.l.bf16 %v3861_v34 }
 0x5d9   :  { %v894_v9 = vsel %vm397_vm6, 0.0, %v3863_v35  ;;  %v893_v12 = vsel %vm397_vm6, 0.0, %v3862_v36 }
 0x5da   :  { %v898_v13 = vsel %vm402_vm7, %v894_v9, 0.0  ;;  %v897_v37 = vsel %vm402_vm7, %v893_v12, 0.0  ;;  %v3383_v39 = vpack.c.bf16 %v894_v9, %v893_v12 }
 0x5db   :  { %v3869_v40 = vpack.i.bf16 %v898_v13, %v897_v37 }
 0x5dd   :  { %3870 = vrot.lane.b32.xlu1 %v3869_v40, %s4236_s12 }
 0x5de   :  { %v3866_v42 = vpop.permute.xlu0 %3865 }
 0x5df   :  { %v3868_v43 = vunpack.i.h.bf16 %v3866_v42  ;;  %v3867_v44 = vunpack.i.l.bf16 %v3866_v42 }
 0x5e1   :  { %v896_v45 = vsel %vm397_vm6, 0.0, %v3868_v43  ;;  %v895_v46 = vsel %vm397_vm6, 0.0, %v3867_v44  ;;  %3880 = vrot.lane.b32.xlu1 %v3869_v40, %s4237_s14 }
 0x5e2   :  { %v900_v47 = vsel %vm402_vm7, %v896_v45, 0.0  ;;  %v899_v48 = vsel %vm402_vm7, %v895_v46, 0.0  ;;  %v3388_v49 = vpack.c.bf16 %v896_v45, %v895_v46 }
 0x5e3   :  { %v3874_v50 = vpack.i.bf16 %v900_v47, %v899_v48 }
 0x5e5   :  { %3875 = vrot.lane.b32.xlu0 %v3874_v50, %s4236_s12  ;;  %3890 = vrot.lane.b32.xlu1 %v3874_v50, %s4237_s14 }
 0x5e9   :  { %3885 = vrot.lane.b32.xlu0 %v3869_v40, %s4233_s9  ;;  %3895 = vrot.lane.b32.xlu1 %v3869_v40, %s4238_s15 }
 0x5ed   :  { %3900 = vrot.lane.b32.xlu0 %v3874_v50, %s4233_s9  ;;  %3910 = vrot.lane.b32.xlu1 %v3874_v50, %s4238_s15 }
 0x5f1   :  { %3905 = vrot.lane.b32.xlu0 %v3869_v40, %s4235_s11  ;;  %3915 = vrot.lane.b32.xlu1 %v3869_v40, %s4239_s16 }
 0x5f5   :  { %3920 = vrot.lane.b32.xlu0 %v3874_v50, %s4235_s11  ;;  %3930 = vrot.lane.b32.xlu1 %v3874_v50, %s4239_s16 }
 0x5f9   :  { %3925 = vrot.lane.b32.xlu0 %v3869_v40, %s4234_s10  ;;  %3940 = vrot.lane.b32.xlu1 %v3869_v40, %s4240_s20 }
 0x5fd   :  { %3935 = vrot.lane.b32.xlu0 %v3874_v50, %s4234_s10  ;;  %1007 = vperm.xlu1 %3949, %v4364_v10  }
 0x601   :  { %3945 = vrot.lane.b32.xlu0 %v3874_v50, %s4240_s20 }
 0x64f   :  { %v3871_v54 = vpop.permute.xlu1 %3870 }
 0x650   :  { %v3873_v55 = vunpack.i.h.bf16 %v3871_v54  ;;  %v3872_v56 = vunpack.i.l.bf16 %v3871_v54 }
 0x652   :  { %v3381_v57 = vpack.c.bf16 %v3873_v55, %v3872_v56 }
 0x653   :  { %v3881_v58 = vpop.permute.xlu1 %3880 }
 0x654   :  { %3382 = vmatprep.subr.bf16.mxu1 %v3381_v57  ;;  %v3883_v59 = vunpack.i.h.bf16 %v3881_v58  ;;  %v3882_v60 = vunpack.i.l.bf16 %v3881_v58 }
 0x655   :  { %3385 = vmatpush3.bf16.msk.msra.mxu1 %vm4497_vm8, %v3383_v39 }
 0x656   :  { %v3391_v6 = vpack.c.bf16 %v3883_v59, %v3882_v60 }
 0x657   :  { %v3876_v61 = vpop.permute.xlu0 %3875  ;;  %v3891_v62 = vpop.permute.xlu1 %3890 }
 0x658   :  { %v3878_v63 = vunpack.i.h.bf16 %v3876_v61  ;;  %v3877_v0 = vunpack.i.l.bf16 %v3876_v61  ;;  %v3893_v10 = vunpack.i.h.bf16 %v3891_v62  ;;  %v3892_v14 = vunpack.i.l.bf16 %v3891_v62 }
 0x65a   :  { %v3386_v1 = vpack.c.bf16 %v3878_v63, %v3877_v0  ;;  %v3395_v30 = vpack.c.bf16 %v3893_v10, %v3892_v14  ;;  %v4248_v14 = vmov 0.0  }
 0x65b   :  { %v3886_v3 = vpop.permute.xlu0 %3885  ;;  %v3896_v4 = vpop.permute.xlu1 %3895 }
 0x65c   :  { %v3888_v15 = vunpack.i.h.bf16 %v3886_v3  ;;  %v3887_v16 = vunpack.i.l.bf16 %v3886_v3  ;;  %3387 = vmatprep.subr.bf16.mxu1 %v3386_v1  ;;  %v3898_v18 = vunpack.i.h.bf16 %v3896_v4  ;;  %v3897_v19 = vunpack.i.l.bf16 %v3896_v4  ;;  %v1001_v3 = vld [vmem:[%s5119_s5 + $0x150] sm:$0xff] }
 0x65d   :  { %3390 = vmatpush3.bf16.msk.msra.mxu1 %vm4497_vm8, %v3388_v49 }
 0x65e   :  { %v3393_v17 = vpack.c.bf16 %v3888_v15, %v3887_v16  ;;  %3392 = vmatprep.subr.bf16.mxu1 %v3391_v6  ;;  %v3399_v35 = vpack.c.bf16 %v3898_v18, %v3897_v19  ;;  %v1003_v16 = vld [vmem:[%s5119_s5 + $0x160] sm:$0xff] }
 0x65f   :  { %v3901_v22 = vpop.permute.xlu0 %3900  ;;  %v3911_v24 = vpop.permute.xlu1 %3910 }
 0x660   :  { %v3903_v27 = vunpack.i.h.bf16 %v3901_v22  ;;  %v3902_v29 = vunpack.i.l.bf16 %v3901_v22  ;;  %v3913_v36 = vunpack.i.h.bf16 %v3911_v24  ;;  %v3912_v9 = vunpack.i.l.bf16 %v3911_v24 }
 0x661   :  { %3394 = vmatpush3.bf16.msra.mxu1 %v3393_v17 }
 0x662   :  { %v3397_v31 = vpack.c.bf16 %v3903_v27, %v3902_v29  ;;  %3396 = vmatprep.subr.bf16.mxu1 %v3395_v30  ;;  %v3403_v45 = vpack.c.bf16 %v3913_v36, %v3912_v9 }
 0x663   :  { %v3906_v33 = vpop.permute.xlu0 %3905  ;;  %v3916_v34 = vpop.permute.xlu1 %3915 }
 0x664   :  { %v3908_v12 = vunpack.i.h.bf16 %v3906_v33  ;;  %v3907_v13 = vunpack.i.l.bf16 %v3906_v33  ;;  %v3918_v39 = vunpack.i.h.bf16 %v3916_v34  ;;  %v3917_v40 = vunpack.i.l.bf16 %v3916_v34 }
 0x665   :  { %3398 = vmatpush3.bf16.msra.mxu1 %v3397_v31 }
 0x666   :  { %v3401_v37 = vpack.c.bf16 %v3908_v12, %v3907_v13  ;;  %3400 = vmatprep.subr.bf16.mxu1 %v3399_v35  ;;  %v3407_v49 = vpack.c.bf16 %v3918_v39, %v3917_v40  ;;  %v1188_v12 = vld [vmem:[%s5119_s5 + $0x168] sm:$0xff]  ;;  %v4663_v13 = vld [vmem:[%s5120_s6] sm:$0xff]  ;;  %v4226_v39 = vld [vmem:[%s5120_s6 + $0x10] sm:$0xff] }
 0x667   :  { %v3921_v42 = vpop.permute.xlu0 %3920  ;;  %v3931_v46 = vpop.permute.xlu1 %3930  ;;  %3167 = vmatprep.mubr.msk.f32.mxu0 %vm83_vm1, %v1188_v12  ;;  %v4227_v40 = vld [vmem:[%s5120_s6 + $0x18] sm:$0xff] }
 0x668   :  { %v3923_v43 = vunpack.i.h.bf16 %v3921_v42  ;;  %v3922_v44 = vunpack.i.l.bf16 %v3921_v42  ;;  %v3933_v50 = vunpack.i.h.bf16 %v3931_v46  ;;  %v3932_v52 = vunpack.i.l.bf16 %v3931_v46 }
 0x669   :  { %3402 = vmatpush3.bf16.msra.mxu1 %v3401_v37  ;;  %v4669_v37 = vld [vmem:[%s5120_s6 + $0x8] sm:$0xff] }
 0x66a   :  { %v3405_v47 = vpack.c.bf16 %v3923_v43, %v3922_v44  ;;  %3404 = vmatprep.subr.bf16.mxu1 %v3403_v45  ;;  %v3411_v61 = vpack.c.bf16 %v3933_v50, %v3932_v52  ;;  %v2490_v44 = vld [vmem:[%s5119_s5 + $0x2e8] sm:$0xff] }
 0x66b   :  { %v3926_v48 = vpop.permute.xlu0 %3925  ;;  %v3941_v58 = vpop.permute.xlu1 %3940 }
 0x66c   :  { %v3928_v54 = vunpack.i.h.bf16 %v3926_v48  ;;  %v3927_v55 = vunpack.i.l.bf16 %v3926_v48  ;;  %v3943_v63 = vunpack.i.h.bf16 %v3941_v58  ;;  %v3942_v0 = vunpack.i.l.bf16 %v3941_v58  ;;  %v1190_v58 = vld [vmem:[%s5119_s5 + $0x198] sm:$0xff] }
 0x66d   :  { %3406 = vmatpush3.bf16.msra.mxu1 %v3405_v47 }
 0x66e   :  { %v3409_v56 = vpack.c.bf16 %v3928_v54, %v3927_v55  ;;  %3408 = vmatprep.subr.bf16.mxu1 %v3407_v49  ;;  %v3416_v4 = vpack.c.bf16 %v3943_v63, %v3942_v0 }
 0x66f   :  { %v3936_v57 = vpop.permute.xlu0 %3935 }
 0x670   :  { %v3938_v59 = vunpack.i.h.bf16 %v3936_v57  ;;  %v3937_v60 = vunpack.i.l.bf16 %v3936_v57  ;;  %v1189_v57 = vld [vmem:[%s5119_s5 + $0x180] sm:$0xff] }
 0x671   :  { %3410 = vmatpush3.bf16.msra.mxu1 %v3409_v56 }
 0x672   :  { %v3413_v62 = vpack.c.bf16 %v3938_v59, %v3937_v60  ;;  %3412 = vmatprep.subr.bf16.mxu1 %v3411_v61  ;;  %v1191_v59 = vld [vmem:[%s5119_s5 + $0x1b0] sm:$0xff] }
 0x673   :  { %v3946_v1 = vpop.permute.xlu0 %3945 }
 0x674   :  { %v3948_v6 = vunpack.i.h.bf16 %v3946_v1  ;;  %v3947_v10 = vunpack.i.l.bf16 %v3946_v1 }
 0x675   :  { %3414 = vmatpush3.bf16.msra.mxu1 %v3413_v62 }
 0x676   :  { %3415 = vmatprep.subr.bf16.mxu1 %v4232_v2  ;;  %v3419_v15 = vpack.c.bf16 %v3948_v6, %v3947_v10 }
 0x678   :  { %1078 = vmatmul.mubr.f32.vlgmr.msra.gmra.mrb[8].mxu1 %v1001_v3 }
 0x679   :  { %3417 = vmatpush3.bf16.msra.mxu1 %v3416_v4  ;;  %3146 = vmatprep.mubr.msk.f32.mxu1 %vm4247_vm12, %v4248_v14  ;;  %vm2832_vm12 = vcmask 551936  }
 0x67a   :  { %3418 = vmatprep.subr.bf16.mxu1 %v4232_v2 }
 0x67c   :  { %v1008_v22 = vpop.permute.xlu1 %1007 }
 0x67d   :  { %3420 = vmatpush3.bf16.msra.mxu1 %v3419_v15 }
 0x680   :  { %3147 = vmatmul.mubr.msk.f32.vlgmr.msra.gmra.mrb[10].mxu1 %vm525_vm9, %v1003_v16 }
 0x74b   :  { %v2994_v17 = vpop.f32.mrb[8].mxu1 }
 0x74c   :  { %v2995_v18 = vpop.f32.mrb[9].mxu1 }
 0x74d   :  { %v2996_v19 = vadd.f32 %v2995_v18, %v2994_v17 }
 0x74f   :  { %v1080_v24 = vadd.f32 %v2996_v19, %v1008_v22 }
 0x753   :  { %v1149_v27 = vpop.f32.mrb[10].mxu1 }
 0x754   :  { %v1150_v29 = vadd.f32 %v1149_v27, %v1080_v24  ;;  %v3148_v30 = vpop.f32.mrb[11].mxu1 }
 0x756   :  { %vm1153_vm13 = vcmp.ge.f32.partialorder %v1150_v29, 0.0  ;;  %v1154_v31 = vmul.f32 0.25, %v1150_v29 }
 0x758   :  { %v1155_v33 = vsel %vm1153_vm13, %v1150_v29, %v1154_v31 }
 0x759   :  { %v1156_v34 = vmul.f32 %v4443_v38, %v1155_v33  ;;  %v4249_v38 = vmov 5  }
 0x75a   :  { %3950 = vset.pattern.permute.xlu1 %v4249_v38  ;;  %3951 = vset.pattern.permute.xlu0 %v4249_v38 }
 0x75b   :  { %1158 = vrot.lane.b32.xlu0 %v1156_v34, %s4243_s18 }
 0x7cd   :  { %v1159_v35 = vpop.permute.xlu0 %1158 }
 0x7ce   :  { %v1161_v36 = vsel %vm397_vm6, 0.0, %v1159_v35 }
 0x7cf   :  { %v1162_v9 = vsel %vm402_vm7, %v1161_v36, 0.0 }
 0x7d0   :  { %1167 = vrot.lane.b32.xlu0 %v1162_v9, %s4235_s11  ;;  %1164 = vrot.lane.b32.xlu1 %v1162_v9, %s4233_s9 }
 0x7d4   :  { %1173 = vrot.lane.b32.xlu0 %v1162_v9, %s4236_s12  ;;  %1170 = vrot.lane.b32.xlu1 %v1162_v9, %s4234_s10 }
 0x7d8   :  { %1179 = vrot.lane.b32.xlu0 %v1162_v9, %s4238_s15  ;;  %1176 = vrot.lane.b32.xlu1 %v1162_v9, %s4237_s14 }
 0x7dc   :  { %1185 = vrot.lane.b32.xlu0 %v1162_v9, %s4240_s20  ;;  %1182 = vrot.lane.b32.xlu1 %v1162_v9, %s4239_s16 }
 0x7e0   :  { %1193 = vperm.xlu1 %3950, %v4663_v13   ;;  %1197 = vperm.xlu0 %3951, %v4669_v37  }
 0x7e4   :  { %1201 = vperm.xlu1 %3950, %v4226_v39  }
 0x7e8   :  { %1205 = vperm.xlu1 %3950, %v4227_v40  }
 0x842   :  { %v1168_v42 = vpop.permute.xlu0 %1167  ;;  %v1165_v43 = vpop.permute.xlu1 %1164 }
 0x843   :  { %v3421_v45 = vpack.c.bf16 %v1165_v43, %v1161_v36 }
 0x845   :  { %3423 = vmatprep.subr.msk.bf16.mxu0 %vm4679_vm15, %v3421_v45 }
 0x846   :  { %v1174_v46 = vpop.permute.xlu0 %1173  ;;  %3426 = vmatpush3.bf16.msk.msra.mxu0 %vm4679_vm15, %v3421_v45  ;;  %v1171_v47 = vpop.permute.xlu1 %1170  ;;  %v4706_v45 = vld [vmem:[%s5121_s0] ss:$0 sm:$0xff] }
 0x847   :  { %v3427_v48 = vpack.c.bf16 %v1171_v47, %v1168_v42 }
 0x849   :  { %3428 = vmatprep.subr.bf16.mxu0 %v3427_v48 }
 0x84a   :  { %3430 = vmatpush3.bf16.msra.mxu0 %v3427_v48  ;;  %v1177_v49 = vpop.permute.xlu1 %1176  ;;  %v1180_v52 = vpop.permute.xlu0 %1179 }
 0x84b   :  { %v3431_v50 = vpack.c.bf16 %v1177_v49, %v1174_v46 }
 0x84d   :  { %3432 = vmatprep.subr.bf16.mxu0 %v3431_v50 }
 0x84e   :  { %3434 = vmatpush3.bf16.msra.mxu0 %v3431_v50  ;;  %v1183_v54 = vpop.permute.xlu1 %1182  ;;  %v1186_v56 = vpop.permute.xlu0 %1185 }
 0x84f   :  { %v3435_v55 = vpack.c.bf16 %v1183_v54, %v1180_v52 }
 0x851   :  { %3436 = vmatprep.subr.bf16.mxu0 %v3435_v55 }
 0x852   :  { %3438 = vmatpush3.bf16.msra.mxu0 %v3435_v55 }
 0x853   :  { %3165 = vmatprep.subr.mxu0 %v1186_v56 }
 0x856   :  { %3166 = vmatpush3.msra.mxu0 %v1186_v56 }
 0x857   :  { %3168 = vmatmul.mubr.msk.f32.vlgmr.msra.gmra.mrb[18].mxu0 %vm83_vm1, %v1189_v57 }
 0x858   :  { %3170 = vmatprep.mubr.msk.f32.mxu0 %vm83_vm1, %v1190_v58 }
 0x85b   :  { %3171 = vmatmul.mubr.msk.f32.gmra.mrb[20].mxu0 %vm83_vm1, %v1191_v59 }
 0x85f   :  { %v1194_v60 = vpop.permute.xlu1 %1193  ;;  %v1198_v62 = vpop.permute.xlu0 %1197 }
 0x863   :  { %v1202_v61 = vpop.permute.xlu1 %1201 }
 0x867   :  { %v1206_v10 = vpop.permute.xlu1 %1205 }
 0x92a   :  { %v3169_v63 = vpop.f32.mrb[18].mxu0 }
 0x92b   :  { %v1292_v0 = vadd.f32 %v3169_v63, %v1198_v62  ;;  %v1286_v1 = vpop.f32.mrb[19].mxu0 }
 0x92c   :  { %v1287_v3 = vadd.f32 %v1286_v1, %v1194_v60 }
 0x92d   :  { %v2874_v4 = vmul.f32 -1.442695, %v1292_v0 }
 0x92e   :  { %v2873_v6 = vmul.f32 -1.442695, %v1287_v3  ;;  %v3172_v14 = vpop.f32.mrb[20].mxu0 }
 0x92f   :  { %4200 = vpow2.f32 %v2874_v4  ;;  %v1302_v15 = vadd.f32 %v3172_v14, %v1206_v10  ;;  %v1296_v16 = vpop.f32.mrb[21].mxu0  ;;  %v1466_v10 = vld [vmem:[%s5119_s5 + $0x1d0] sm:$0xff]  ;;  %v1661_v14 = vld [vmem:[%s5119_s5 + $0x1f8] sm:$0xff] }
 0x930   :  { %4202 = vpow2.f32 %v2873_v6  ;;  %v1297_v17 = vadd.f32 %v1296_v16, %v1202_v61  ;;  %v4755_v6 = vld [vmem:[%s5122_s3] sm:$0xff]  ;;  %1549 = vmatprep.mubr.f32.mxu1 %v1466_v10  ;;  %3202 = vmatprep.mubr.msk.f32.mxu0 %vm83_vm1, %v1661_v14  ;;  %v4252_v16 = vmov 7  }
 0x931   :  { %v2876_v18 = vmul.f32 -1.442695, %v1302_v15  ;;  %v4251_v15 = vmov 6  }
 0x932   :  { %v2875_v19 = vmul.f32 -1.442695, %v1297_v17  ;;  %4042 = vset.pattern.permute.xlu0 %v4251_v15  ;;  %4043 = vset.pattern.permute.xlu1 %v4251_v15 }
 0x933   :  { %4204 = vpow2.f32 %v2876_v18 }
 0x934   :  { %4206 = vpow2.f32 %v2875_v19 }
 0x939   :  { %v4201_v22 = vpop.eup %4200 }
 0x93a   :  { %v4203_v24 = vpop.eup %4202  ;;  %v1318_v27 = vadd.f32 1.0, %v4201_v22 }
 0x93b   :  { %v1317_v29 = vadd.f32 1.0, %v4203_v24 }
 0x93c   :  { %4208 = vrcp.f32 %v1318_v27 }
 0x93d   :  { %v4205_v30 = vpop.eup %4204  ;;  %4210 = vrcp.f32 %v1317_v29 }
 0x93e   :  { %v4207_v31 = vpop.eup %4206  ;;  %v1320_v33 = vadd.f32 1.0, %v4205_v30 }
 0x93f   :  { %v1319_v34 = vadd.f32 1.0, %v4207_v31 }
 0x940   :  { %4212 = vrcp.f32 %v1320_v33 }
 0x941   :  { %4214 = vrcp.f32 %v1319_v34 }
 0x946   :  { %v4209_v35 = vpop.eup %4208 }
 0x947   :  { %v4211_v36 = vpop.eup %4210  ;;  %v1330_v9 = vmul.f32 %v4209_v35, %v4584_v7 }
 0x948   :  { %v1329_v12 = vmul.f32 %v4211_v36, %v4582_v5 }
 0x949   :  { %v1334_v39 = vadd.f32 %v1330_v9, %v4436_v32 }
 0x94a   :  { %v4213_v40 = vpop.eup %4212  ;;  %v1333_v42 = vadd.f32 %v1329_v12, %v4433_v25 }
 0x94b   :  { %v4215_v43 = vpop.eup %4214  ;;  %v1338_v46 = vmul.f32 %v4706_v45, %v1334_v39  ;;  %v1332_v47 = vmul.f32 %v4213_v40, %v4593_v28 }
 0x94c   :  { %v1337_v48 = vmul.f32 %v4706_v45, %v1333_v42  ;;  %v1331_v7 = vmul.f32 %v4215_v43, %v4590_v23 }
 0x94d   :  { %v1336_v5 = vadd.f32 %v1332_v47, %v4454_v51 }
 0x94e   :  { %v3952_v32 = vpack.i.bf16 %v1338_v46, %v1337_v48  ;;  %v1335_v49 = vadd.f32 %v1331_v7, %v4447_v41 }
 0x94f   :  { %v1340_v25 = vmul.f32 %v4706_v45, %v1336_v5 }
 0x950   :  { %3953 = vrot.lane.b32.xlu0 %v3952_v32, %s4243_s18  ;;  %v1339_v50 = vmul.f32 %v4706_v45, %v1335_v49 }
 0x952   :  { %v3957_v52 = vpack.i.bf16 %v1340_v25, %v1339_v50 }
 0x954   :  { %3958 = vrot.lane.b32.xlu1 %v3957_v52, %s4243_s18 }
 0x9c2   :  { %v3954_v54 = vpop.permute.xlu0 %3953 }
 0x9c3   :  { %v3956_v28 = vunpack.i.h.bf16 %v3954_v54  ;;  %v3955_v55 = vunpack.i.l.bf16 %v3954_v54 }
 0x9c5   :  { %v4719_v56 = vsel %vm397_vm6, 0.0, %v3956_v28  ;;  %v4722_v51 = vsel %vm397_vm6, 0.0, %v3955_v55 }
 0x9c6   :  { %v1362_v41 = vsel %vm402_vm7, %v4719_v56, 0.0  ;;  %v1361_v23 = vsel %vm402_vm7, %v4722_v51, 0.0  ;;  %v3441_v57 = vpack.c.bf16 %v4719_v56, %v4722_v51  ;;  %v3959_v58 = vpop.permute.xlu1 %3958 }
 0x9c7   :  { %v3961_v59 = vunpack.i.h.bf16 %v3959_v58  ;;  %v3960_v60 = vunpack.i.l.bf16 %v3959_v58  ;;  %v3962_v61 = vpack.i.bf16 %v1362_v41, %v1361_v23 }
 0x9c9   :  { %v4731_v62 = vsel %vm397_vm6, 0.0, %v3961_v59  ;;  %v4734_v63 = vsel %vm397_vm6, 0.0, %v3960_v60  ;;  %3963 = vrot.lane.b32.xlu0 %v3962_v61, %s4236_s12  ;;  %3973 = vrot.lane.b32.xlu1 %v3962_v61, %s4233_s9 }
 0x9ca   :  { %v1364_v0 = vsel %vm402_vm7, %v4731_v62, 0.0  ;;  %v1363_v1 = vsel %vm402_vm7, %v4734_v63, 0.0  ;;  %v3446_v3 = vpack.c.bf16 %v4731_v62, %v4734_v63 }
 0x9cb   :  { %v3982_v4 = vpack.i.bf16 %v1364_v0, %v1363_v1 }
 0x9cd   :  { %3968 = vrot.lane.b32.xlu0 %v3962_v61, %s4237_s14  ;;  %3983 = vrot.lane.b32.xlu1 %v3982_v4, %s4236_s12 }
 0x9d1   :  { %3978 = vrot.lane.b32.xlu0 %v3962_v61, %s4238_s15  ;;  %3988 = vrot.lane.b32.xlu1 %v3962_v61, %s4235_s11 }
 0x9d5   :  { %3993 = vrot.lane.b32.xlu0 %v3962_v61, %s4239_s16  ;;  %4003 = vrot.lane.b32.xlu1 %v3982_v4, %s4233_s9 }
 0x9d9   :  { %3998 = vrot.lane.b32.xlu0 %v3982_v4, %s4237_s14  ;;  %4008 = vrot.lane.b32.xlu1 %v3962_v61, %s4234_s10 }
 0x9dd   :  { %1637 = vrot.lane.b32.xlu0 %v4755_v6, %s4233_s9  ;;  %4018 = vrot.lane.b32.xlu1 %v3982_v4, %s4235_s11 }
 0x9e1   :  { %4013 = vrot.lane.b32.xlu0 %v3982_v4, %s4238_s15  ;;  %1640 = vrot.lane.b32.xlu1 %v4755_v6, %s4235_s11 }
 0x9e5   :  { %1643 = vrot.lane.b32.xlu0 %v4755_v6, %s4234_s10  ;;  %4023 = vrot.lane.b32.xlu1 %v3982_v4, %s4239_s16 }
 0x9e9   :  { %4033 = vrot.lane.b32.xlu0 %v3982_v4, %s4234_s10  ;;  %4028 = vrot.lane.b32.xlu1 %v3962_v61, %s4240_s20 }
 0x9ed   :  { %1646 = vrot.lane.b32.xlu0 %v4755_v6, %s4236_s12  ;;  %1649 = vrot.lane.b32.xlu1 %v4755_v6, %s4237_s14 }
 0x9f1   :  { %4038 = vrot.lane.b32.xlu0 %v3982_v4, %s4240_s20  ;;  %1652 = vrot.lane.b32.xlu1 %v4755_v6, %s4238_s15 }
 0x9f5   :  { %1655 = vrot.lane.b32.xlu0 %v4755_v6, %s4239_s16  ;;  %1658 = vrot.lane.b32.xlu1 %v4755_v6, %s4240_s20 }
 0x9f9   :  { %1472 = vperm.xlu0 %4042, %v4663_v13   ;;  %1476 = vperm.xlu1 %4043, %v4669_v37  }
 0x9fd   :  { %4045 = vset.pattern.permute.xlu0 %v4252_v16  ;;  %4044 = vset.pattern.permute.xlu1 %v4252_v16 }
 0x9fe   :  { %1668 = vperm.xlu0 %4045, %v4669_v37   ;;  %1664 = vperm.xlu1 %4044, %v4663_v13  }
 0xa3b   :  { %v3964_v17 = vpop.permute.xlu0 %3963  ;;  %v3974_v18 = vpop.permute.xlu1 %3973 }
 0xa3c   :  { %v3966_v19 = vunpack.i.h.bf16 %v3964_v17  ;;  %v3965_v22 = vunpack.i.l.bf16 %v3964_v17  ;;  %v3976_v36 = vunpack.i.h.bf16 %v3974_v18  ;;  %v3975_v9 = vunpack.i.l.bf16 %v3974_v18 }
 0xa3e   :  { %v3439_v24 = vpack.c.bf16 %v3966_v19, %v3965_v22  ;;  %v3451_v42 = vpack.c.bf16 %v3976_v36, %v3975_v9 }
 0xa3f   :  { %v3969_v27 = vpop.permute.xlu0 %3968  ;;  %v3984_v29 = vpop.permute.xlu1 %3983 }
 0xa40   :  { %v3971_v30 = vunpack.i.h.bf16 %v3969_v27  ;;  %v3970_v31 = vunpack.i.l.bf16 %v3969_v27  ;;  %v3986_v33 = vunpack.i.h.bf16 %v3984_v29  ;;  %v3985_v34 = vunpack.i.l.bf16 %v3984_v29  ;;  %3440 = vmatprep.subr.bf16.mxu1 %v3439_v24 }
 0xa41   :  { %3443 = vmatpush3.bf16.msk.msra.mxu1 %vm4497_vm8, %v3441_v57 }
 0xa42   :  { %v3444_v35 = vpack.c.bf16 %v3986_v33, %v3985_v34  ;;  %v3449_v40 = vpack.c.bf16 %v3971_v30, %v3970_v31 }
 0xa43   :  { %v3979_v12 = vpop.permute.xlu0 %3978  ;;  %v3989_v39 = vpop.permute.xlu1 %3988 }
 0xa44   :  { %3445 = vmatprep.subr.bf16.mxu1 %v3444_v35  ;;  %v3981_v32 = vunpack.i.h.bf16 %v3979_v12  ;;  %v3980_v49 = vunpack.i.l.bf16 %v3979_v12  ;;  %v3991_v54 = vunpack.i.h.bf16 %v3989_v39  ;;  %v3990_v28 = vunpack.i.l.bf16 %v3989_v39 }
 0xa45   :  { %3448 = vmatpush3.bf16.msk.msra.mxu1 %vm4497_vm8, %v3446_v3 }
 0xa46   :  { %3450 = vmatprep.subr.bf16.mxu1 %v3449_v40  ;;  %v3457_v23 = vpack.c.bf16 %v3981_v32, %v3980_v49  ;;  %v3459_v57 = vpack.c.bf16 %v3991_v54, %v3990_v28  ;;  %v1468_v32 = vld [vmem:[%s5119_s5 + $0x1e0] sm:$0xff]  ;;  %v1470_v54 = vld [vmem:[%s5119_s5 + $0x1f0] sm:$0xff] }
 0xa47   :  { %v3994_v43 = vpop.permute.xlu0 %3993  ;;  %v4004_v46 = vpop.permute.xlu1 %4003 }
 0xa48   :  { %v4006_v47 = vunpack.i.h.bf16 %v4004_v46  ;;  %v4005_v48 = vunpack.i.l.bf16 %v4004_v46  ;;  %v3996_v62 = vunpack.i.h.bf16 %v3994_v43  ;;  %v3995_v63 = vunpack.i.l.bf16 %v3994_v43  ;;  %v1465_v43 = vld [vmem:[%s5119_s5 + $0x1c8] sm:$0xff] }
 0xa49   :  { %3452 = vmatpush3.bf16.msra.mxu1 %v3451_v42  ;;  %v1469_v46 = vld [vmem:[%s5119_s5 + $0x1e8] sm:$0xff] }
 0xa4a   :  { %v3455_v55 = vpack.c.bf16 %v4006_v47, %v4005_v48  ;;  %v3465_v24 = vpack.c.bf16 %v3996_v62, %v3995_v63 }
 0xa4b   :  { %v3999_v7 = vpop.permute.xlu0 %3998  ;;  %v4009_v5 = vpop.permute.xlu1 %4008 }
 0xa4c   :  { %v4001_v25 = vunpack.i.h.bf16 %v3999_v7  ;;  %v4000_v50 = vunpack.i.l.bf16 %v3999_v7  ;;  %v4011_v4 = vunpack.i.h.bf16 %v4009_v5  ;;  %v4010_v10 = vunpack.i.l.bf16 %v4009_v5 }
 0xa4e   :  { %v3453_v52 = vpack.c.bf16 %v4001_v25, %v4000_v50  ;;  %v3467_v27 = vpack.c.bf16 %v4011_v4, %v4010_v10  ;;  %v1467_v25 = vld [vmem:[%s5119_s5 + $0x1d8] sm:$0xff] }
 0xa4f   :  { %v1638_v56 = vpop.permute.xlu0 %1637  ;;  %v4019_v51 = vpop.permute.xlu1 %4018 }
 0xa50   :  { %v3481_v41 = vpack.c.bf16 %v1638_v56, %v4755_v6  ;;  %3454 = vmatprep.subr.bf16.mxu1 %v3453_v52  ;;  %v4021_v58 = vunpack.i.h.bf16 %v4019_v51  ;;  %v4020_v59 = vunpack.i.l.bf16 %v4019_v51 }
 0xa51   :  { %3456 = vmatpush3.bf16.msra.mxu1 %v3455_v55  ;;  %v1662_v55 = vld [vmem:[%s5119_s5 + $0x210] sm:$0xff] }
 0xa52   :  { %3458 = vmatprep.subr.bf16.mxu1 %v3457_v23  ;;  %3482 = vmatprep.subr.bf16.mxu0 %v3481_v41  ;;  %v3463_v6 = vpack.c.bf16 %v4021_v58, %v4020_v59 }
 0xa53   :  { %3484 = vmatpush3.bf16.msra.mxu0 %v3481_v41  ;;  %v4014_v60 = vpop.permute.xlu0 %4013  ;;  %v1641_v61 = vpop.permute.xlu1 %1640 }
 0xa54   :  { %v4016_v0 = vunpack.i.h.bf16 %v4014_v60  ;;  %v4015_v1 = vunpack.i.l.bf16 %v4014_v60 }
 0xa55   :  { %3460 = vmatpush3.bf16.msra.mxu1 %v3459_v57 }
 0xa56   :  { %v3461_v3 = vpack.c.bf16 %v4016_v0, %v4015_v1 }
 0xa57   :  { %v1644_v14 = vpop.permute.xlu0 %1643  ;;  %v4024_v17 = vpop.permute.xlu1 %4023 }
 0xa58   :  { %v3485_v18 = vpack.c.bf16 %v1644_v14, %v1641_v61  ;;  %v4026_v19 = vunpack.i.h.bf16 %v4024_v17  ;;  %v4025_v22 = vunpack.i.l.bf16 %v4024_v17  ;;  %3462 = vmatprep.subr.bf16.mxu1 %v3461_v3 }
 0xa59   :  { %3464 = vmatpush3.bf16.msra.mxu1 %v3463_v6 }
 0xa5a   :  { %3466 = vmatprep.subr.bf16.mxu1 %v3465_v24  ;;  %3486 = vmatprep.subr.bf16.mxu0 %v3485_v18  ;;  %v3469_v31 = vpack.c.bf16 %v4026_v19, %v4025_v22 }
 0xa5b   :  { %v4034_v29 = vpop.permute.xlu0 %4033  ;;  %3488 = vmatpush3.bf16.msra.mxu0 %v3485_v18  ;;  %v4029_v30 = vpop.permute.xlu1 %4028 }
 0xa5c   :  { %v4036_v33 = vunpack.i.h.bf16 %v4034_v29  ;;  %v4035_v34 = vunpack.i.l.bf16 %v4034_v29  ;;  %v4031_v35 = vunpack.i.h.bf16 %v4029_v30  ;;  %v4030_v36 = vunpack.i.l.bf16 %v4029_v30 }
 0xa5d   :  { %3468 = vmatpush3.bf16.msra.mxu1 %v3467_v27 }
 0xa5e   :  { %v3471_v9 = vpack.c.bf16 %v4036_v33, %v4035_v34  ;;  %3470 = vmatprep.subr.bf16.mxu1 %v3469_v31  ;;  %v3473_v42 = vpack.c.bf16 %v4031_v35, %v4030_v36 }
 0xa5f   :  { %v1647_v12 = vpop.permute.xlu0 %1646  ;;  %v1650_v39 = vpop.permute.xlu1 %1649 }
 0xa60   :  { %v3489_v40 = vpack.c.bf16 %v1650_v39, %v1647_v12 }
 0xa61   :  { %3472 = vmatpush3.bf16.msra.mxu1 %v3471_v9 }
 0xa62   :  { %3474 = vmatprep.subr.bf16.mxu1 %v3473_v42  ;;  %3490 = vmatprep.subr.bf16.mxu0 %v3489_v40 }
 0xa63   :  { %v4039_v47 = vpop.permute.xlu0 %4038  ;;  %3492 = vmatpush3.bf16.msra.mxu0 %v3489_v40  ;;  %v1653_v5 = vpop.permute.xlu1 %1652 }
 0xa64   :  { %v4041_v48 = vunpack.i.h.bf16 %v4039_v47  ;;  %v4040_v7 = vunpack.i.l.bf16 %v4039_v47  ;;  %1550 = vmatmul.mubr.f32.vlgmr.msra.gmra.mrb[12].mxu1 %v1465_v43  ;;  %v1825_v47 = vld [vmem:[%s5119_s5 + $0x230] sm:$0xff] }
 0xa65   :  { %3476 = vmatpush3.bf16.msra.mxu1 %v3473_v42  ;;  %1554 = vmatprep.mubr.f32.mxu1 %v1469_v46 }
 0xa66   :  { %v3477_v49 = vpack.c.bf16 %v4041_v48, %v4040_v7  ;;  %v4253_v48 = vmov 8  }
 0xa67   :  { %v1656_v50 = vpop.permute.xlu0 %1655  ;;  %v1659_v28 = vpop.permute.xlu1 %1658  ;;  %4091 = vset.pattern.permute.xlu1 %v4253_v48 }
 0xa68   :  { %v3493_v52 = vpack.c.bf16 %v1656_v50, %v1653_v5  ;;  %1555 = vmatmul.mubr.f32.gmra.mrb[14].mxu1 %v1468_v32  ;;  %3478 = vmatprep.subr.bf16.mxu1 %v3477_v49 }
 0xa69   :  { %3480 = vmatpush3.bf16.msra.mxu1 %v3477_v49  ;;  %3181 = vmatprep.mubr.msk.f32.mxu1 %vm525_vm9, %v1467_v25 }
 0xa6a   :  { %3494 = vmatprep.subr.bf16.mxu0 %v3493_v52  ;;  %3497 = vmatprep.subr.bf16.mxu1 %v4232_v2 }
 0xa6b   :  { %3496 = vmatpush3.bf16.msra.mxu0 %v3493_v52 }
 0xa6c   :  { %3182 = vmatmul.mubr.msk.f32.vlgmr.msra.gmra.mrb[16].mxu1 %vm525_vm9, %v1470_v54  ;;  %3200 = vmatprep.subr.mxu0 %v1659_v28  ;;  %vm2759_vm9 = vcmask 752640  }
 0xa6d   :  { %2887 = vmatprep.mubr.msk.f32.mxu1 %vm257_vm0, %v1825_v47 }
 0xa6f   :  { %3201 = vmatpush3.msra.mxu0 %v1659_v28 }
 0xa70   :  { %3203 = vmatmul.mubr.msk.f32.vlgmr.msra.gmra.mrb[22].mxu0 %vm83_vm1, %v1662_v55 }
 0xa78   :  { %v1477_v23 = vpop.permute.xlu1 %1476  ;;  %v1473_v57 = vpop.permute.xlu0 %1472 }
 0xa7d   :  { %v1669_v0 = vpop.permute.xlu0 %1668  ;;  %v1665_v3 = vpop.permute.xlu1 %1664 }
 0xb37   :  { %v3047_v56 = vpop.f32.mrb[12].mxu1 }
 0xb38   :  { %v3048_v51 = vpop.f32.mrb[13].mxu1 }
 0xb39   :  { %v3049_v41 = vadd.f32 %v3048_v51, %v3047_v56 }
 0xb3b   :  { %v3050_v58 = vpop.f32.mrb[14].mxu1  ;;  %v1552_v61 = vadd.f32 %v3049_v41, %v1473_v57 }
 0xb3c   :  { %v3051_v59 = vpop.f32.mrb[15].mxu1 }
 0xb3d   :  { %v3052_v60 = vadd.f32 %v3051_v59, %v3050_v58 }
 0xb3f   :  { %v1557_v62 = vadd.f32 %v3052_v60, %v1477_v23  ;;  %v3183_v63 = vpop.f32.mrb[16].mxu1 }
 0xb40   :  { %v1626_v1 = vpop.f32.mrb[17].mxu1 }
 0xb41   :  { %v1632_v4 = vadd.f32 %v3183_v63, %v1557_v62  ;;  %v1627_v10 = vadd.f32 %v1626_v1, %v1552_v61 }
 0xb43   :  { %v3636_v6 = vadd.f32 %v1669_v0, %v1632_v4  ;;  %v3639_v14 = vadd.f32 %v1665_v3, %v1627_v10  ;;  %v3204_v17 = vpop.f32.mrb[22].mxu0 }
 0xb44   :  { %v1743_v18 = vpop.f32.mrb[23].mxu0 }
 0xb45   :  { %v4824_v19 = vadd.f32 %v3636_v6, %v3204_v17  ;;  %v4826_v22 = vadd.f32 %v3639_v14, %v1743_v18 }
 0xb47   :  { %vm1755_vm2 = vcmp.ge.f32.partialorder %v4824_v19, 0.0  ;;  %v1757_v24 = vmul.f32 0.25, %v4824_v19  ;;  %vm1754_vm3 = vcmp.ge.f32.partialorder %v4826_v22, 0.0  ;;  %v1756_v27 = vmul.f32 0.25, %v4826_v22 }
 0xb49   :  { %v1759_v29 = vsel %vm1755_vm2, %v4824_v19, %v1757_v24  ;;  %v1758_v30 = vsel %vm1754_vm3, %v4826_v22, %v1756_v27 }
 0xb4a   :  { %v1760_v31 = vmul.f32 %v4706_v45, %v1758_v30  ;;  %v1761_v33 = vmul.f32 %v4706_v45, %v1759_v29  ;;  %v1824_v29 = vld [vmem:[%s5119_s5 + $0x228] sm:$0xff] }
 0xb4c   :  { %v4046_v34 = vpack.i.bf16 %v1761_v33, %v1760_v31 }
 0xb4e   :  { %4047 = vrot.lane.b32.xlu1 %v4046_v34, %s4243_s18 }
 0xbc0   :  { %v4048_v35 = vpop.permute.xlu1 %4047 }
 0xbc1   :  { %v4050_v36 = vunpack.i.h.bf16 %v4048_v35  ;;  %v4049_v9 = vunpack.i.l.bf16 %v4048_v35 }
 0xbc3   :  { %v1771_v12 = vsel %vm397_vm6, 0.0, %v4050_v36  ;;  %v1770_v39 = vsel %vm397_vm6, 0.0, %v4049_v9 }
 0xbc4   :  { %v1773_v40 = vsel %vm402_vm7, %v1771_v12, 0.0  ;;  %v1772_v42 = vsel %vm402_vm7, %v1770_v39, 0.0  ;;  %v3498_v43 = vpack.c.bf16 %v1771_v12, %v1770_v39 }
 0xbc5   :  { %v4056_v46 = vpack.i.bf16 %v1773_v40, %v1772_v42  ;;  %v1938_v42 = vld [vmem:[%s5119_s5 + $0x240] sm:$0xff] }
 0xbc6   :  { %3500 = vmatpush1.bf16.msk.msra.mxu1 %vm4497_vm8, %v3498_v43  ;;  %3223 = vmatprep.mubr.msk.f32.mxu0 %vm83_vm1, %v1938_v42  ;;  %v4254_v43 = vmov 9  }
 0xbc7   :  { %4057 = vrot.lane.b32.xlu0 %v4056_v46, %s4235_s11  ;;  %4052 = vrot.lane.b32.xlu1 %v4056_v46, %s4233_s9 }
 0xbc8   :  { %3501 = vmatprep.subr.bf16.mxu1 %v4232_v2  ;;  %4093 = vset.pattern.permute.xlu0 %v4254_v43 }
 0xbcb   :  { %4067 = vrot.lane.b32.xlu0 %v4056_v46, %s4236_s12  ;;  %4062 = vrot.lane.b32.xlu1 %v4056_v46, %s4234_s10 }
 0xbcf   :  { %4077 = vrot.lane.b32.xlu0 %v4056_v46, %s4238_s15  ;;  %4072 = vrot.lane.b32.xlu1 %v4056_v46, %s4237_s14 }
 0xbd3   :  { %4087 = vrot.lane.b32.xlu0 %v4056_v46, %s4240_s20  ;;  %4082 = vrot.lane.b32.xlu1 %v4056_v46, %s4239_s16 }
 0xbd7   :  { %1827 = vperm.xlu1 %4091, %v4663_v13  }
 0xbdb   :  { %4092 = vset.pattern.permute.xlu1 %v4254_v43 }
 0xc39   :  { %v4058_v7 = vpop.permute.xlu0 %4057  ;;  %v4053_v5 = vpop.permute.xlu1 %4052 }
 0xc3a   :  { %v4055_v32 = vunpack.i.h.bf16 %v4053_v5  ;;  %v4054_v49 = vunpack.i.l.bf16 %v4053_v5  ;;  %v4060_v25 = vunpack.i.h.bf16 %v4058_v7  ;;  %v4059_v50 = vunpack.i.l.bf16 %v4058_v7 }
 0xc3c   :  { %v3502_v52 = vpack.c.bf16 %v4055_v32, %v4054_v49  ;;  %v3505_v28 = vpack.c.bf16 %v4060_v25, %v4059_v50 }
 0xc3d   :  { %v4063_v54 = vpop.permute.xlu1 %4062  ;;  %v4068_v51 = vpop.permute.xlu0 %4067 }
 0xc3e   :  { %3503 = vmatpush1.bf16.msra.mxu1 %v3502_v52  ;;  %v4065_v55 = vunpack.i.h.bf16 %v4063_v54  ;;  %v4064_v56 = vunpack.i.l.bf16 %v4063_v54  ;;  %v4070_v41 = vunpack.i.h.bf16 %v4068_v51  ;;  %v4069_v23 = vunpack.i.l.bf16 %v4068_v51 }
 0xc3f   :  { %3504 = vmatprep.subr.bf16.mxu1 %v4232_v2 }
 0xc40   :  { %v3508_v57 = vpack.c.bf16 %v4065_v55, %v4064_v56  ;;  %v3511_v59 = vpack.c.bf16 %v4070_v41, %v4069_v23  ;;  %v1939_v55 = vld [vmem:[%s5119_s5 + $0x258] sm:$0xff] }
 0xc41   :  { %v4073_v58 = vpop.permute.xlu1 %4072  ;;  %v4078_v62 = vpop.permute.xlu0 %4077 }
 0xc42   :  { %3506 = vmatpush1.bf16.msra.mxu1 %v3505_v28  ;;  %v4075_v60 = vunpack.i.h.bf16 %v4073_v58  ;;  %v4074_v61 = vunpack.i.l.bf16 %v4073_v58  ;;  %v4080_v63 = vunpack.i.h.bf16 %v4078_v62  ;;  %v4079_v0 = vunpack.i.l.bf16 %v4078_v62 }
 0xc43   :  { %3507 = vmatprep.subr.bf16.mxu1 %v4232_v2 }
 0xc44   :  { %v3514_v1 = vpack.c.bf16 %v4075_v60, %v4074_v61  ;;  %v3517_v4 = vpack.c.bf16 %v4080_v63, %v4079_v0 }
 0xc45   :  { %v4083_v3 = vpop.permute.xlu1 %4082  ;;  %v4088_v14 = vpop.permute.xlu0 %4087 }
 0xc46   :  { %3509 = vmatpush1.bf16.msra.mxu1 %v3508_v57  ;;  %v4085_v10 = vunpack.i.h.bf16 %v4083_v3  ;;  %v4084_v6 = vunpack.i.l.bf16 %v4083_v3  ;;  %v4090_v17 = vunpack.i.h.bf16 %v4088_v14  ;;  %v4089_v18 = vunpack.i.l.bf16 %v4088_v14 }
 0xc47   :  { %3510 = vmatprep.subr.bf16.mxu1 %v4232_v2 }
 0xc48   :  { %v3520_v24 = vpack.c.bf16 %v4085_v10, %v4084_v6  ;;  %v3523_v27 = vpack.c.bf16 %v4090_v17, %v4089_v18  ;;  %v2094_v17 = vld [vmem:[%s5119_s5 + $0x278] sm:$0xff]  ;;  %v4255_v18 = vmov 10  }
 0xc4a   :  { %3512 = vmatpush1.bf16.msra.mxu1 %v3511_v59 }
 0xc4b   :  { %3513 = vmatprep.subr.bf16.mxu1 %v4232_v2 }
 0xc4e   :  { %3515 = vmatpush1.bf16.msra.mxu1 %v3514_v1 }
 0xc4f   :  { %3516 = vmatprep.subr.bf16.mxu1 %v4232_v2 }
 0xc52   :  { %3518 = vmatpush1.bf16.msra.mxu1 %v3517_v4 }
 0xc53   :  { %3519 = vmatprep.subr.bf16.mxu1 %v4232_v2 }
 0xc56   :  { %3521 = vmatpush1.bf16.msra.mxu1 %v3520_v24  ;;  %v1828_v30 = vpop.permute.xlu1 %1827 }
 0xc57   :  { %3522 = vmatprep.subr.bf16.mxu1 %v4232_v2 }
 0xc5a   :  { %3524 = vmatpush1.bf16.msra.mxu1 %v3523_v27 }
 0xc5d   :  { %1898 = vmatmul.mubr.f32.vlgmr.msra.gmra.mrb[18].mxu1 %v1824_v29 }
 0xd30   :  { %v1899_v31 = vpop.f32.mrb[18].mxu1 }
 0xd31   :  { %v1900_v33 = vadd.f32 %v1899_v31, %v1828_v30  ;;  %v1901_v34 = vpop.f32.mrb[19].mxu1 }
 0xd33   :  { %vm1903_vm4 = vcmp.ge.f32.partialorder %v1900_v33, 0.0  ;;  %v1904_v35 = vmul.f32 0.25, %v1900_v33 }
 0xd35   :  { %v1905_v36 = vsel %vm1903_vm4, %v1900_v33, %v1904_v35 }
 0xd36   :  { %v1906_v9 = vmul.f32 %v4706_v45, %v1905_v36 }
 0xd38   :  { %1908 = vrot.lane.b32.xlu0 %v1906_v9, %s4243_s18 }
 0xdaa   :  { %v1909_v12 = vpop.permute.xlu0 %1908 }
 0xdab   :  { %v1911_v39 = vsel %vm397_vm6, 0.0, %v1909_v12 }
 0xdac   :  { %v1912_v40 = vsel %vm402_vm7, %v1911_v39, 0.0 }
 0xdad   :  { %1917 = vrot.lane.b32.xlu0 %v1912_v40, %s4235_s11  ;;  %1914 = vrot.lane.b32.xlu1 %v1912_v40, %s4233_s9 }
 0xdb1   :  { %1923 = vrot.lane.b32.xlu0 %v1912_v40, %s4236_s12  ;;  %1920 = vrot.lane.b32.xlu1 %v1912_v40, %s4234_s10 }
 0xdb5   :  { %1929 = vrot.lane.b32.xlu0 %v1912_v40, %s4238_s15  ;;  %1926 = vrot.lane.b32.xlu1 %v1912_v40, %s4237_s14 }
 0xdb9   :  { %1935 = vrot.lane.b32.xlu0 %v1912_v40, %s4240_s20  ;;  %1932 = vrot.lane.b32.xlu1 %v1912_v40, %s4239_s16 }
 0xdbd   :  { %1945 = vperm.xlu0 %4093, %v4669_v37   ;;  %1941 = vperm.xlu1 %4092, %v4663_v13  }
 0xdc1   :  { %4139 = vset.pattern.permute.xlu1 %v4255_v18  ;;  %v4959_v18 = vld [vmem:[%s5120_s6] sm:$0xff] }
 0xe1f   :  { %v1918_v46 = vpop.permute.xlu0 %1917  ;;  %v1915_v47 = vpop.permute.xlu1 %1914 }
 0xe20   :  { %v3525_v7 = vpack.c.bf16 %v1915_v47, %v1911_v39 }
 0xe22   :  { %3527 = vmatprep.subr.msk.bf16.mxu0 %vm4679_vm15, %v3525_v7 }
 0xe23   :  { %v1924_v5 = vpop.permute.xlu0 %1923  ;;  %3530 = vmatpush3.bf16.msk.msra.mxu0 %vm4679_vm15, %v3525_v7  ;;  %v1921_v32 = vpop.permute.xlu1 %1920 }
 0xe24   :  { %v3531_v49 = vpack.c.bf16 %v1921_v32, %v1918_v46 }
 0xe26   :  { %3532 = vmatprep.subr.bf16.mxu0 %v3531_v49 }
 0xe27   :  { %3534 = vmatpush3.bf16.msra.mxu0 %v3531_v49  ;;  %v1927_v25 = vpop.permute.xlu1 %1926  ;;  %v1930_v52 = vpop.permute.xlu0 %1929 }
 0xe28   :  { %v3535_v50 = vpack.c.bf16 %v1927_v25, %v1924_v5 }
 0xe2a   :  { %3536 = vmatprep.subr.bf16.mxu0 %v3535_v50 }
 0xe2b   :  { %3538 = vmatpush3.bf16.msra.mxu0 %v3535_v50  ;;  %v1933_v37 = vpop.permute.xlu1 %1932  ;;  %v1936_v28 = vpop.permute.xlu0 %1935 }
 0xe2c   :  { %v3539_v54 = vpack.c.bf16 %v1933_v37, %v1930_v52 }
 0xe2e   :  { %3540 = vmatprep.subr.bf16.mxu0 %v3539_v54 }
 0xe2f   :  { %3542 = vmatpush3.bf16.msra.mxu0 %v3539_v54 }
 0xe30   :  { %3221 = vmatprep.subr.mxu0 %v1936_v28 }
 0xe33   :  { %3222 = vmatpush3.msra.mxu0 %v1936_v28 }
 0xe34   :  { %3224 = vmatmul.mubr.msk.f32.vlgmr.msra.gmra.mrb[24].mxu0 %vm83_vm1, %v1939_v55  ;;  %3543 = vmatprep.subr.bf16.mxu0 %v4232_v2 }
 0xe35   :  { %2893 = vmatprep.mubr.msk.f32.mxu0 %vm257_vm0, %v2094_v17  ;;  %v4953_v17 = vld [vmem:[%s5120_s6 + $0x8] sm:$0xff] }
 0xe3c   :  { %v1946_v56 = vpop.permute.xlu0 %1945  ;;  %v1942_v51 = vpop.permute.xlu1 %1941 }
 0xf07   :  { %v3225_v41 = vpop.f32.mrb[24].mxu0 }
 0xf08   :  { %v4895_v23 = vadd.f32 %v3225_v41, %v1946_v56  ;;  %v2020_v57 = vpop.f32.mrb[25].mxu0 }
 0xf09   :  { %v4897_v58 = vadd.f32 %v2020_v57, %v1942_v51  ;;  %v2093_v57 = vld [vmem:[%s5119_s5 + $0x270] sm:$0xff] }
 0xf0a   :  { %v2030_v59 = vmul.f32 %v4706_v45, %v4895_v23 }
 0xf0b   :  { %v2029_v60 = vmul.f32 %v4706_v45, %v4897_v58 }
 0xf0d   :  { %v4094_v61 = vpack.i.bf16 %v2030_v59, %v2029_v60 }
 0xf0f   :  { %4095 = vrot.lane.b32.xlu1 %v4094_v61, %s4243_s18 }
 0xf81   :  { %v4096_v62 = vpop.permute.xlu1 %4095 }
 0xf82   :  { %v4098_v63 = vunpack.i.h.bf16 %v4096_v62  ;;  %v4097_v0 = vunpack.i.l.bf16 %v4096_v62 }
 0xf84   :  { %v2040_v1 = vsel %vm397_vm6, 0.0, %v4098_v63  ;;  %v2039_v3 = vsel %vm397_vm6, 0.0, %v4097_v0 }
 0xf85   :  { %v2042_v4 = vsel %vm402_vm7, %v2040_v1, 0.0  ;;  %v2041_v10 = vsel %vm402_vm7, %v2039_v3, 0.0  ;;  %v3544_v6 = vpack.c.bf16 %v2040_v1, %v2039_v3 }
 0xf86   :  { %v4104_v14 = vpack.i.bf16 %v2042_v4, %v2041_v10 }
 0xf87   :  { %3546 = vmatpush1.bf16.msk.msra.mxu0 %vm4497_vm8, %v3544_v6  ;;  %v2207_v6 = vld [vmem:[%s5119_s5 + $0x288] sm:$0xff] }
 0xf88   :  { %4105 = vrot.lane.b32.xlu0 %v4104_v14, %s4235_s11  ;;  %4100 = vrot.lane.b32.xlu1 %v4104_v14, %s4233_s9 }
 0xf89   :  { %3547 = vmatprep.subr.bf16.mxu0 %v4232_v2  ;;  %3244 = vmatprep.mubr.msk.f32.mxu1 %vm83_vm1, %v2207_v6 }
 0xf8c   :  { %4115 = vrot.lane.b32.xlu0 %v4104_v14, %s4236_s12  ;;  %4110 = vrot.lane.b32.xlu1 %v4104_v14, %s4234_s10 }
 0xf90   :  { %4125 = vrot.lane.b32.xlu0 %v4104_v14, %s4238_s15  ;;  %4120 = vrot.lane.b32.xlu1 %v4104_v14, %s4237_s14 }
 0xf94   :  { %4135 = vrot.lane.b32.xlu0 %v4104_v14, %s4240_s20  ;;  %4130 = vrot.lane.b32.xlu1 %v4104_v14, %s4239_s16  ;;  %v4256_v14 = vmov 11  }
 0xf95   :  { %4141 = vset.pattern.permute.xlu0 %v4256_v14 }
 0xf98   :  { %2096 = vperm.xlu1 %4139, %v4663_v13  }
 0xf9c   :  { %4140 = vset.pattern.permute.xlu1 %v4256_v14 }
 0xffa   :  { %v4106_v24 = vpop.permute.xlu0 %4105  ;;  %v4101_v27 = vpop.permute.xlu1 %4100 }
 0xffb   :  { %v4103_v29 = vunpack.i.h.bf16 %v4101_v27  ;;  %v4102_v30 = vunpack.i.l.bf16 %v4101_v27  ;;  %v4108_v31 = vunpack.i.h.bf16 %v4106_v24  ;;  %v4107_v33 = vunpack.i.l.bf16 %v4106_v24 }
 0xffd   :  { %v3548_v34 = vpack.c.bf16 %v4103_v29, %v4102_v30  ;;  %v3551_v36 = vpack.c.bf16 %v4108_v31, %v4107_v33 }
 0xffe   :  { %v4111_v35 = vpop.permute.xlu1 %4110  ;;  %v4116_v39 = vpop.permute.xlu0 %4115 }
 0xfff   :  { %3549 = vmatpush1.bf16.msra.mxu0 %v3548_v34  ;;  %v4113_v9 = vunpack.i.h.bf16 %v4111_v35  ;;  %v4112_v12 = vunpack.i.l.bf16 %v4111_v35  ;;  %v4118_v40 = vunpack.i.h.bf16 %v4116_v39  ;;  %v4117_v13 = vunpack.i.l.bf16 %v4116_v39  ;;  %v2208_v39 = vld [vmem:[%s5119_s5 + $0x2a0] sm:$0xff] }
0x1000   :  { %3550 = vmatprep.subr.bf16.mxu0 %v4232_v2 }
0x1001   :  { %v3554_v42 = vpack.c.bf16 %v4113_v9, %v4112_v12  ;;  %v3557_v46 = vpack.c.bf16 %v4118_v40, %v4117_v13 }
0x1002   :  { %v4121_v43 = vpop.permute.xlu1 %4120  ;;  %v4126_v5 = vpop.permute.xlu0 %4125 }
0x1003   :  { %3552 = vmatpush1.bf16.msra.mxu0 %v3551_v36  ;;  %v4123_v47 = vunpack.i.h.bf16 %v4121_v43  ;;  %v4122_v7 = vunpack.i.l.bf16 %v4121_v43  ;;  %v4128_v32 = vunpack.i.h.bf16 %v4126_v5  ;;  %v4127_v49 = vunpack.i.l.bf16 %v4126_v5 }
0x1004   :  { %3553 = vmatprep.subr.bf16.mxu0 %v4232_v2 }
0x1005   :  { %v3560_v25 = vpack.c.bf16 %v4123_v47, %v4122_v7  ;;  %v3563_v52 = vpack.c.bf16 %v4128_v32, %v4127_v49 }
0x1006   :  { %v4131_v50 = vpop.permute.xlu1 %4130  ;;  %v4136_v28 = vpop.permute.xlu0 %4135 }
0x1007   :  { %3555 = vmatpush1.bf16.msra.mxu0 %v3554_v42  ;;  %v4133_v37 = vunpack.i.h.bf16 %v4131_v50  ;;  %v4132_v54 = vunpack.i.l.bf16 %v4131_v50  ;;  %v4138_v55 = vunpack.i.h.bf16 %v4136_v28  ;;  %v4137_v56 = vunpack.i.l.bf16 %v4136_v28 }
0x1008   :  { %3556 = vmatprep.subr.bf16.mxu0 %v4232_v2 }
0x1009   :  { %v3566_v51 = vpack.c.bf16 %v4133_v37, %v4132_v54  ;;  %v3569_v41 = vpack.c.bf16 %v4138_v55, %v4137_v56 }
0x100b   :  { %3558 = vmatpush1.bf16.msra.mxu0 %v3557_v46 }
0x100c   :  { %3559 = vmatprep.subr.bf16.mxu0 %v4232_v2 }
0x100f   :  { %3561 = vmatpush1.bf16.msra.mxu0 %v3560_v25 }
0x1010   :  { %3562 = vmatprep.subr.bf16.mxu0 %v4232_v2 }
0x1013   :  { %3564 = vmatpush1.bf16.msra.mxu0 %v3563_v52 }
0x1014   :  { %3565 = vmatprep.subr.bf16.mxu0 %v4232_v2 }
0x1017   :  { %3567 = vmatpush1.bf16.msra.mxu0 %v3566_v51  ;;  %v2097_v59 = vpop.permute.xlu1 %2096 }
0x1018   :  { %3568 = vmatprep.subr.bf16.mxu0 %v4232_v2 }
0x101b   :  { %3570 = vmatpush1.bf16.msra.mxu0 %v3569_v41  ;;  %v4980_v41 = vld [vmem:[%s5121_s0] ss:$0 sm:$0xff] }
0x101e   :  { %2167 = vmatmul.mubr.f32.vlgmr.msra.gmra.mrb[26].mxu0 %v2093_v57 }
0x10f1   :  { %v2168_v60 = vpop.f32.mrb[26].mxu0 }
0x10f2   :  { %v2169_v61 = vadd.f32 %v2168_v60, %v2097_v59  ;;  %v2170_v62 = vpop.f32.mrb[27].mxu0 }
0x10f4   :  { %vm2172_vm5 = vcmp.ge.f32.partialorder %v2169_v61, 0.0  ;;  %v2173_v63 = vmul.f32 0.25, %v2169_v61 }
0x10f6   :  { %v2174_v0 = vsel %vm2172_vm5, %v2169_v61, %v2173_v63 }
0x10f7   :  { %v2175_v1 = vmul.f32 %v4706_v45, %v2174_v0  ;;  %v4257_v0 = vmov 12  }
0x10f9   :  { %2177 = vrot.lane.b32.xlu0 %v2175_v1, %s4243_s18 }
0x116b   :  { %v2178_v3 = vpop.permute.xlu0 %2177 }
0x116c   :  { %v2180_v4 = vsel %vm397_vm6, 0.0, %v2178_v3 }
0x116d   :  { %v2181_v10 = vsel %vm402_vm7, %v2180_v4, 0.0 }
0x116e   :  { %2186 = vrot.lane.b32.xlu0 %v2181_v10, %s4235_s11  ;;  %2183 = vrot.lane.b32.xlu1 %v2181_v10, %s4233_s9 }
0x1172   :  { %2192 = vrot.lane.b32.xlu0 %v2181_v10, %s4236_s12  ;;  %2189 = vrot.lane.b32.xlu1 %v2181_v10, %s4234_s10 }
0x1176   :  { %2198 = vrot.lane.b32.xlu0 %v2181_v10, %s4238_s15  ;;  %2195 = vrot.lane.b32.xlu1 %v2181_v10, %s4237_s14 }
0x117a   :  { %2204 = vrot.lane.b32.xlu0 %v2181_v10, %s4240_s20  ;;  %2201 = vrot.lane.b32.xlu1 %v2181_v10, %s4239_s16 }
0x117e   :  { %2214 = vperm.xlu0 %4141, %v4953_v17   ;;  %2210 = vperm.xlu1 %4140, %v4959_v18  }
0x1182   :  { %4189 = vset.pattern.permute.xlu0 %v4244_v20  ;;  %4187 = vset.pattern.permute.xlu1 %v4257_v0  ;;  %v2590_v0 = vld [vmem:[%s5123_s4] sm:$0x7]  ;;  %s4259_s4 = smov 110  }
0x11e0   :  { %v2187_v24 = vpop.permute.xlu0 %2186  ;;  %v2184_v27 = vpop.permute.xlu1 %2183 }
0x11e1   :  { %v3571_v29 = vpack.c.bf16 %v2184_v27, %v2180_v4 }
0x11e3   :  { %3573 = vmatprep.subr.msk.bf16.mxu1 %vm4679_vm15, %v3571_v29 }
0x11e4   :  { %v2193_v30 = vpop.permute.xlu0 %2192  ;;  %3576 = vmatpush3.bf16.msk.msra.mxu1 %vm4679_vm15, %v3571_v29  ;;  %v2190_v31 = vpop.permute.xlu1 %2189 }
0x11e5   :  { %v3577_v33 = vpack.c.bf16 %v2190_v31, %v2187_v24 }
0x11e7   :  { %3578 = vmatprep.subr.bf16.mxu1 %v3577_v33 }
0x11e8   :  { %3580 = vmatpush3.bf16.msra.mxu1 %v3577_v33  ;;  %v2196_v34 = vpop.permute.xlu1 %2195  ;;  %v2199_v36 = vpop.permute.xlu0 %2198 }
0x11e9   :  { %v3581_v35 = vpack.c.bf16 %v2196_v34, %v2193_v30 }
0x11eb   :  { %3582 = vmatprep.subr.bf16.mxu1 %v3581_v35 }
0x11ec   :  { %3584 = vmatpush3.bf16.msra.mxu1 %v3581_v35  ;;  %v2202_v20 = vpop.permute.xlu1 %2201  ;;  %v2205_v12 = vpop.permute.xlu0 %2204 }
0x11ed   :  { %v3585_v9 = vpack.c.bf16 %v2202_v20, %v2199_v36 }
0x11ef   :  { %3586 = vmatprep.subr.bf16.mxu1 %v3585_v9 }
0x11f0   :  { %3588 = vmatpush3.bf16.msra.mxu1 %v3585_v9 }
0x11f1   :  { %3242 = vmatprep.subr.mxu1 %v2205_v12 }
0x11f4   :  { %3243 = vmatpush3.msra.mxu1 %v2205_v12 }
0x11f5   :  { %3245 = vmatmul.mubr.msk.f32.vlgmr.msra.gmra.mrb[20].mxu1 %vm83_vm1, %v2208_v39  ;;  %3589 = vmatprep.subr.bf16.mxu1 %v4232_v2 }
0x11f6   :  { %2901 = vmatprep.mubr.msk.f32.mxu1 %vm257_vm0, %v2379_v26  ;;  %vm2634_vm0 = vcmask 1039360  }
0x11fd   :  { %v2215_v40 = vpop.permute.xlu0 %2214  ;;  %v2211_v13 = vpop.permute.xlu1 %2210 }
0x12c8   :  { %v3246_v42 = vpop.f32.mrb[20].mxu1 }
0x12c9   :  { %v2295_v43 = vadd.f32 %v3246_v42, %v2215_v40  ;;  %v2289_v46 = vpop.f32.mrb[21].mxu1 }
0x12ca   :  { %v2290_v47 = vadd.f32 %v2289_v46, %v2211_v13 }
0x12cb   :  { %v2898_v7 = vmul.f32 -1.442695, %v2295_v43 }
0x12cc   :  { %v2897_v5 = vmul.f32 -1.442695, %v2290_v47 }
0x12cd   :  { %4216 = vpow2.f32 %v2898_v7 }
0x12ce   :  { %4218 = vpow2.f32 %v2897_v5 }
0x12d7   :  { %v4217_v32 = vpop.eup %4216 }
0x12d8   :  { %v4219_v49 = vpop.eup %4218  ;;  %v2305_v25 = vadd.f32 1.0, %v4217_v32 }
0x12d9   :  { %v2304_v50 = vadd.f32 1.0, %v4219_v49 }
0x12da   :  { %4220 = vrcp.f32 %v2305_v25 }
0x12db   :  { %4222 = vrcp.f32 %v2304_v50 }
0x12e4   :  { %v4221_v52 = vpop.eup %4220 }
0x12e5   :  { %v4223_v37 = vpop.eup %4222  ;;  %v2311_v54 = vmul.f32 %v4221_v52, %v4895_v23  ;;  %v2378_v52 = vld [vmem:[%s5119_s5 + $0x2b8] sm:$0xff] }
0x12e6   :  { %v2310_v28 = vmul.f32 %v4223_v37, %v4897_v58 }
0x12e7   :  { %v2313_v55 = vadd.f32 %v4824_v19, %v2311_v54 }
0x12e8   :  { %v2312_v56 = vadd.f32 %v4826_v22, %v2310_v28 }
0x12e9   :  { %v2315_v51 = vmul.f32 %v4706_v45, %v2313_v55 }
0x12ea   :  { %v2314_v57 = vmul.f32 %v4980_v41, %v2312_v56 }
0x12ec   :  { %v4142_v59 = vpack.i.bf16 %v2315_v51, %v2314_v57 }
0x12ee   :  { %4143 = vrot.lane.b32.xlu1 %v4142_v59, %s4243_s18  ;;  %v2489_v59 = vld [vmem:[%s5119_s5 + $0x2d0] sm:$0xff] }
0x12ef   :  { %3265 = vmatprep.mubr.msk.f32.mxu0 %vm83_vm1, %v2489_v59 }
0x1360   :  { %v4144_v60 = vpop.permute.xlu1 %4143 }
0x1361   :  { %v4146_v23 = vunpack.i.h.bf16 %v4144_v60  ;;  %v4145_v61 = vunpack.i.l.bf16 %v4144_v60 }
0x1363   :  { %v2325_v58 = vsel %vm397_vm6, 0.0, %v4146_v23  ;;  %v2324_v19 = vsel %vm397_vm6, 0.0, %v4145_v61 }
0x1364   :  { %v2327_v22 = vsel %vm402_vm7, %v2325_v58, 0.0  ;;  %v2326_v45 = vsel %vm402_vm7, %v2324_v19, 0.0  ;;  %v3590_v62 = vpack.c.bf16 %v2325_v58, %v2324_v19 }
0x1365   :  { %v4152_v63 = vpack.i.bf16 %v2327_v22, %v2326_v45  ;;  %v2597_v22 = vlaneseq }
0x1366   :  { %3592 = vmatpush1.bf16.msk.msra.mxu1 %vm4497_vm8, %v3590_v62  ;;  %vm2734_vm8 = vcmask 883712  }
0x1367   :  { %4153 = vrot.lane.b32.xlu0 %v4152_v63, %s4235_s11  ;;  %4148 = vrot.lane.b32.xlu1 %v4152_v63, %s4233_s9  ;;  %v2598_v62 = vshrl.u32 %v2597_v22, 7 }
0x1368   :  { %3593 = vmatprep.subr.bf16.mxu1 %v4232_v2 }
0x1369   :  { %v2603_v26 = vsub.s32 1, %v2598_v62 }
0x136b   :  { %4163 = vrot.lane.b32.xlu0 %v4152_v63, %s4236_s12  ;;  %4158 = vrot.lane.b32.xlu1 %v4152_v63, %s4234_s10 }
0x136f   :  { %4173 = vrot.lane.b32.xlu0 %v4152_v63, %s4238_s15  ;;  %4168 = vrot.lane.b32.xlu1 %v4152_v63, %s4237_s14 }
0x1373   :  { %4183 = vrot.lane.b32.xlu0 %v4152_v63, %s4240_s20  ;;  %4178 = vrot.lane.b32.xlu1 %v4152_v63, %s4239_s16  ;;  %v2599_v63 = vsub.s32 0, %v2598_v62 }
0x1377   :  { %2381 = vperm.xlu1 %4187, %v4959_v18  }
0x137b   :  { %4188 = vset.pattern.permute.xlu1 %v4242_v11 }
0x13d9   :  { %v4154_v1 = vpop.permute.xlu0 %4153  ;;  %v4149_v3 = vpop.permute.xlu1 %4148 }
0x13da   :  { %v4151_v4 = vunpack.i.h.bf16 %v4149_v3  ;;  %v4150_v10 = vunpack.i.l.bf16 %v4149_v3  ;;  %v4156_v6 = vunpack.i.h.bf16 %v4154_v1  ;;  %v4155_v14 = vunpack.i.l.bf16 %v4154_v1 }
0x13db   :  { %v2607_v1 = vsub.s32 2, %v2598_v62  ;;  %v5052_v3 = vrot.slane %v2590_v0, %v2599_v63 }
0x13dc   :  { %v3594_v24 = vpack.c.bf16 %v4151_v4, %v4150_v10  ;;  %v3597_v29 = vpack.c.bf16 %v4156_v6, %v4155_v14  ;;  %v5054_v4 = vrot.slane %v2590_v0, %v2603_v26 }
0x13dd   :  { %v4159_v27 = vpop.permute.xlu1 %4158  ;;  %v4164_v33 = vpop.permute.xlu0 %4163  ;;  %v5056_v10 = vrot.slane %v2590_v0, %v2607_v1 }
0x13de   :  { %3595 = vmatpush1.bf16.msra.mxu1 %v3594_v24  ;;  %v4161_v30 = vunpack.i.h.bf16 %v4159_v27  ;;  %v4160_v31 = vunpack.i.l.bf16 %v4159_v27  ;;  %v4166_v34 = vunpack.i.h.bf16 %v4164_v33  ;;  %v4165_v11 = vunpack.i.l.bf16 %v4164_v33 }
0x13df   :  { %3596 = vmatprep.subr.bf16.mxu1 %v4232_v2 }
0x13e0   :  { %v3600_v35 = vpack.c.bf16 %v4161_v30, %v4160_v31  ;;  %v3603_v20 = vpack.c.bf16 %v4166_v34, %v4165_v11 }
0x13e1   :  { %v4169_v36 = vpop.permute.xlu1 %4168  ;;  %v4174_v39 = vpop.permute.xlu0 %4173 }
0x13e2   :  { %3598 = vmatpush1.bf16.msra.mxu1 %v3597_v29  ;;  %v4171_v9 = vunpack.i.h.bf16 %v4169_v36  ;;  %v4170_v12 = vunpack.i.l.bf16 %v4169_v36  ;;  %v4176_v40 = vunpack.i.h.bf16 %v4174_v39  ;;  %v4175_v13 = vunpack.i.l.bf16 %v4174_v39 }
0x13e3   :  { %3599 = vmatprep.subr.bf16.mxu1 %v4232_v2 }
0x13e4   :  { %v3606_v42 = vpack.c.bf16 %v4171_v9, %v4170_v12  ;;  %v3609_v46 = vpack.c.bf16 %v4176_v40, %v4175_v13 }
0x13e5   :  { %v4179_v43 = vpop.permute.xlu1 %4178  ;;  %v4184_v5 = vpop.permute.xlu0 %4183 }
0x13e6   :  { %3601 = vmatpush1.bf16.msra.mxu1 %v3600_v35  ;;  %v4181_v47 = vunpack.i.h.bf16 %v4179_v43  ;;  %v4180_v7 = vunpack.i.l.bf16 %v4179_v43  ;;  %v4186_v32 = vunpack.i.h.bf16 %v4184_v5  ;;  %v4185_v49 = vunpack.i.l.bf16 %v4184_v5 }
0x13e7   :  { %3602 = vmatprep.subr.bf16.mxu1 %v4232_v2  ;;  %v4262_v5 = vmov 14  }
0x13e8   :  { %v3612_v25 = vpack.c.bf16 %v4181_v47, %v4180_v7  ;;  %v3615_v50 = vpack.c.bf16 %v4186_v32, %v4185_v49  ;;  %v2818_v32 = vld [vmem:[%s5120_s6] sm:$0xf] }
0x13ea   :  { %3604 = vmatpush1.bf16.msra.mxu1 %v3603_v20 }
0x13eb   :  { %3605 = vmatprep.subr.bf16.mxu1 %v4232_v2 }
0x13ee   :  { %3607 = vmatpush1.bf16.msra.mxu1 %v3606_v42 }
0x13ef   :  { %3608 = vmatprep.subr.bf16.mxu1 %v4232_v2 }
0x13f2   :  { %3610 = vmatpush1.bf16.msra.mxu1 %v3609_v46 }
0x13f3   :  { %3611 = vmatprep.subr.bf16.mxu1 %v4232_v2 }
0x13f6   :  { %3613 = vmatpush1.bf16.msra.mxu1 %v3612_v25  ;;  %v2382_v37 = vpop.permute.xlu1 %2381 }
0x13f7   :  { %3614 = vmatprep.subr.bf16.mxu1 %v4232_v2 }
0x13fa   :  { %3616 = vmatpush1.bf16.msra.mxu1 %v3615_v50 }
0x13fd   :  { %2452 = vmatmul.mubr.f32.vlgmr.msra.gmra.mrb[22].mxu1 %v2378_v52 }
0x14d0   :  { %v2453_v54 = vpop.f32.mrb[22].mxu1 }
0x14d1   :  { %v2454_v28 = vadd.f32 %v2453_v54, %v2382_v37  ;;  %v2455_v55 = vpop.f32.mrb[23].mxu1 }
0x14d3   :  { %v2457_v56 = vmul.f32 %v4980_v41, %v2454_v28  ;;  %v2589_v41 = vld [vmem:[%s5119_s5 + $0x300] sm:$0xf]  ;;  %s4260_s5 = smov 109  }
0x14d5   :  { %2459 = vrot.lane.b32.xlu0 %v2457_v56, %s4243_s18 }
0x1547   :  { %v2460_v51 = vpop.permute.xlu0 %2459 }
0x1548   :  { %v2462_v57 = vsel %vm397_vm6, 0.0, %v2460_v51  ;;  %vm2684_vm6 = vcmask 900096  }
0x1549   :  { %v2463_v2 = vsel %vm402_vm7, %v2462_v57, 0.0  ;;  %vm2709_vm7 = vcmask 891904  }
0x154a   :  { %2468 = vrot.lane.b32.xlu0 %v2463_v2, %s4235_s11  ;;  %2465 = vrot.lane.b32.xlu1 %v2463_v2, %s4233_s9 }
0x154e   :  { %2474 = vrot.lane.b32.xlu0 %v2463_v2, %s4236_s12  ;;  %2471 = vrot.lane.b32.xlu1 %v2463_v2, %s4234_s10 }
0x1552   :  { %2480 = vrot.lane.b32.xlu0 %v2463_v2, %s4238_s15  ;;  %2477 = vrot.lane.b32.xlu1 %v2463_v2, %s4237_s14 }
0x1556   :  { %2486 = vrot.lane.b32.xlu0 %v2463_v2, %s4240_s20  ;;  %2483 = vrot.lane.b32.xlu1 %v2463_v2, %s4239_s16 }
0x155a   :  { %2619 = vperm.xlu1 %4188, %v2589_v41   ;;  %2644 = vperm.xlu0 %4189, %v2589_v41  }
0x155e   :  { %4190 = vset.pattern.permute.xlu1 %v4245_v21  ;;  %4192 = vset.pattern.permute.xlu0 %v4249_v38  ;;  %v4258_v21 = vmov 13  }
0x155f   :  { %2669 = vperm.xlu1 %4190, %v2589_v41   ;;  %2719 = vperm.xlu0 %4192, %v2589_v41  }
0x1563   :  { %4191 = vset.pattern.permute.xlu1 %v4246_v53  ;;  %4195 = vset.pattern.permute.xlu0 %v4253_v48 }
0x1564   :  { %2694 = vperm.xlu1 %4191, %v2589_v41   ;;  %2794 = vperm.xlu0 %4195, %v2589_v41  }
0x1568   :  { %4193 = vset.pattern.permute.xlu1 %v4251_v15  ;;  %4197 = vset.pattern.permute.xlu0 %v4258_v21 }
0x1569   :  { %2744 = vperm.xlu1 %4193, %v2589_v41  }
0x156d   :  { %4194 = vset.pattern.permute.xlu1 %v4252_v16 }
0x156e   :  { %2769 = vperm.xlu1 %4194, %v2589_v41  }
0x1572   :  { %4196 = vset.pattern.permute.xlu1 %v4241_v8 }
0x1573   :  { %2593 = vperm.xlu1 %4196, %v2589_v41  }
0x1577   :  { %4198 = vset.pattern.permute.xlu1 %v4258_v21 }
0x15bc   :  { %v2469_v38 = vpop.permute.xlu0 %2468  ;;  %v2466_v60 = vpop.permute.xlu1 %2465 }
0x15bd   :  { %v3617_v23 = vpack.c.bf16 %v2466_v60, %v2462_v57 }
0x15bf   :  { %3619 = vmatprep.subr.msk.bf16.mxu0 %vm4679_vm15, %v3617_v23 }
0x15c0   :  { %v2475_v53 = vpop.permute.xlu0 %2474  ;;  %3622 = vmatpush3.bf16.msk.msra.mxu0 %vm4679_vm15, %v3617_v23  ;;  %v2472_v15 = vpop.permute.xlu1 %2471 }
0x15c1   :  { %v3623_v48 = vpack.c.bf16 %v2472_v15, %v2469_v38 }
0x15c3   :  { %3624 = vmatprep.subr.bf16.mxu0 %v3623_v48 }
0x15c4   :  { %3626 = vmatpush3.bf16.msra.mxu0 %v3623_v48  ;;  %v2478_v16 = vpop.permute.xlu1 %2477  ;;  %v2481_v61 = vpop.permute.xlu0 %2480 }
0x15c5   :  { %v3627_v8 = vpack.c.bf16 %v2478_v16, %v2475_v53 }
0x15c7   :  { %3628 = vmatprep.subr.bf16.mxu0 %v3627_v8 }
0x15c8   :  { %3630 = vmatpush3.bf16.msra.mxu0 %v3627_v8  ;;  %v2484_v58 = vpop.permute.xlu1 %2483  ;;  %v2487_v45 = vpop.permute.xlu0 %2486 }
0x15c9   :  { %v3631_v19 = vpack.c.bf16 %v2484_v58, %v2481_v61 }
0x15cb   :  { %3632 = vmatprep.subr.bf16.mxu0 %v3631_v19 }
0x15cc   :  { %3634 = vmatpush3.bf16.msra.mxu0 %v3631_v19 }
0x15cd   :  { %3263 = vmatprep.subr.mxu0 %v2487_v45 }
0x15d0   :  { %3264 = vmatpush3.msra.mxu0 %v2487_v45 }
0x15d1   :  { %3266 = vmatmul.mubr.msk.f32.vlgmr.msra.gmra.mrb[28].mxu0 %vm83_vm1, %v2490_v44  ;;  %vm2659_vm1 = vcmask 1031168  }
0x15d9   :  { %v2620_v6 = vpop.permute.xlu1 %2619  ;;  %v2645_v14 = vpop.permute.xlu0 %2644 }
0x15da   :  { %v2622_v24 = vmul.f32 %v2620_v6, %v5052_v3  ;;  %v2623_v27 = vmul.f32 %v2620_v6, %v5054_v4  ;;  %v2624_v29 = vmul.f32 %v2620_v6, %v5056_v10  ;;  %v2647_v30 = vmul.f32 %v2645_v14, %v5052_v3 }
0x15db   :  { %v2648_v33 = vmul.f32 %v2645_v14, %v5054_v4  ;;  %v2649_v34 = vmul.f32 %v2645_v14, %v5056_v10 }
0x15dc   :  { %2628 = vrot.lane.b32.xlu1 %v2622_v24, %s4233_s9  ;;  %2630 = vrot.lane.b32.xlu0 %v2623_v27, %s4233_s9 }
0x15de   :  { %v2670_v31 = vpop.permute.xlu1 %2669  ;;  %v2720_v40 = vpop.permute.xlu0 %2719 }
0x15df   :  { %v2672_v11 = vmul.f32 %v2670_v31, %v5052_v3  ;;  %v2673_v35 = vmul.f32 %v2670_v31, %v5054_v4  ;;  %v2674_v20 = vmul.f32 %v2670_v31, %v5056_v10  ;;  %v2722_v13 = vmul.f32 %v2720_v40, %v5052_v3 }
0x15e0   :  { %2632 = vrot.lane.b32.xlu1 %v2624_v29, %s4233_s9  ;;  %2653 = vrot.lane.b32.xlu0 %v2647_v30, %s4235_s11  ;;  %v2723_v42 = vmul.f32 %v2720_v40, %v5054_v4  ;;  %v2724_v43 = vmul.f32 %v2720_v40, %v5056_v10  ;;  %s4261_s9 = smov 92  }
0x15e3   :  { %v2695_v36 = vpop.permute.xlu1 %2694  ;;  %v2795_v50 = vpop.permute.xlu0 %2794 }
0x15e4   :  { %2655 = vrot.lane.b32.xlu1 %v2648_v33, %s4235_s11  ;;  %2657 = vrot.lane.b32.xlu0 %v2649_v34, %s4235_s11  ;;  %v2697_v9 = vmul.f32 %v2695_v36, %v5052_v3  ;;  %v2698_v12 = vmul.f32 %v2695_v36, %v5054_v4  ;;  %v2699_v39 = vmul.f32 %v2695_v36, %v5056_v10 }
0x15e5   :  { %v2797_v54 = vmul.f32 %v2795_v50, %v5052_v3  ;;  %v2799_v28 = vmul.f32 %v2795_v50, %v5056_v10 }
0x15e8   :  { %2678 = vrot.lane.b32.xlu1 %v2672_v11, %s4259_s4  ;;  %2680 = vrot.lane.b32.xlu0 %v2673_v35, %s4259_s4  ;;  %v2745_v46 = vpop.permute.xlu1 %2744 }
0x15e9   :  { %v2748_v47 = vmul.f32 %v2745_v46, %v5054_v4  ;;  %v2747_v7 = vmul.f32 %v2745_v46, %v5052_v3  ;;  %v2749_v25 = vmul.f32 %v2745_v46, %v5056_v10 }
0x15ec   :  { %2682 = vrot.lane.b32.xlu1 %v2674_v20, %s4259_s4  ;;  %2703 = vrot.lane.b32.xlu0 %v2697_v9, %s4260_s5 }
0x15ed   :  { %v2770_v49 = vpop.permute.xlu1 %2769 }
0x15ee   :  { %v2772_v52 = vmul.f32 %v2770_v49, %v5052_v3  ;;  %v2773_v37 = vmul.f32 %v2770_v49, %v5054_v4 }
0x15f0   :  { %2705 = vrot.lane.b32.xlu1 %v2698_v12, %s4260_s5  ;;  %2707 = vrot.lane.b32.xlu0 %v2699_v39, %s4260_s5 }
0x15f2   :  { %v2594_v55 = vpop.permute.xlu1 %2593 }
0x15f3   :  { %v2612_v58 = vmul.f32 %v5052_v3, %v2594_v55  ;;  %v2614_v19 = vmul.f32 %v5056_v10, %v2594_v55  ;;  %v2613_v44 = vmul.f32 %v5054_v4, %v2594_v55 }
0x15f4   :  { %2728 = vrot.lane.b32.xlu1 %v2722_v13, %s4238_s15  ;;  %2730 = vrot.lane.b32.xlu0 %v2723_v42, %s4238_s15 }
0x15f8   :  { %2732 = vrot.lane.b32.xlu1 %v2724_v43, %s4238_s15  ;;  %2492 = vperm.xlu0 %4197, %v4959_v18   ;;  %v2774_v18 = vmul.f32 %v2770_v49, %v5056_v10  ;;  %s4263_s15 = smov 91  }
0x15fc   :  { %2496 = vperm.xlu1 %4198, %v4953_v17   ;;  %2755 = vrot.lane.b32.xlu0 %v2748_v47, %s4261_s9  ;;  %v2798_v17 = vmul.f32 %v2795_v50, %v5054_v4 }
0x15fd   :  { %4199 = vset.pattern.permute.xlu0 %v4262_v5 }
0x1600   :  { %2821 = vperm.xlu0 %4199, %v2818_v32   ;;  %2753 = vrot.lane.b32.xlu1 %v2747_v7, %s4261_s9 }
0x1604   :  { %2757 = vrot.lane.b32.xlu1 %v2749_v25, %s4261_s9  ;;  %2782 = vrot.lane.b32.xlu0 %v2774_v18, %s4263_s15 }
0x1608   :  { %2778 = vrot.lane.b32.xlu1 %v2772_v52, %s4263_s15  ;;  %2805 = vrot.lane.b32.xlu0 %v2798_v17, %s4264_s25 }
0x160c   :  { %2780 = vrot.lane.b32.xlu1 %v2773_v37, %s4263_s15 }
0x1610   :  { %2803 = vrot.lane.b32.xlu1 %v2797_v54, %s4264_s25 }
0x1614   :  { %2807 = vrot.lane.b32.xlu1 %v2799_v28, %s4264_s25 }
0x164e   :  { %v2629_v56 = vpop.permute.xlu1 %2628  ;;  %v2631_v51 = vpop.permute.xlu0 %2630 }
0x164f   :  { %v2635_v22 = vsel %vm2634_vm0, %v2629_v56, %v2631_v51 }
0x1650   :  { %v2640_v62 = vadd.f32 %v2635_v22, %v2612_v58 }
0x1652   :  { %v2633_v57 = vpop.permute.xlu1 %2632  ;;  %v2654_v2 = vpop.permute.xlu0 %2653 }
0x1653   :  { %v2636_v26 = vsel %vm2634_vm0, %v2631_v51, %v2633_v57  ;;  %v2642_v0 = vadd.f32 %v2633_v57, %v2614_v19 }
0x1654   :  { %v2641_v14 = vadd.f32 %v2636_v26, %v2613_v44 }
0x1656   :  { %v2656_v59 = vpop.permute.xlu1 %2655  ;;  %v2658_v41 = vpop.permute.xlu0 %2657 }
0x1657   :  { %v2660_v1 = vsel %vm2659_vm1, %v2654_v2, %v2656_v59  ;;  %v2661_v27 = vsel %vm2659_vm1, %v2656_v59, %v2658_v41  ;;  %v2667_v29 = vadd.f32 %v2658_v41, %v2642_v0 }
0x1658   :  { %v2665_v24 = vadd.f32 %v2660_v1, %v2640_v62  ;;  %v2666_v31 = vadd.f32 %v2661_v27, %v2641_v14 }
0x165a   :  { %v2679_v21 = vpop.permute.xlu1 %2678  ;;  %v2681_v38 = vpop.permute.xlu0 %2680 }
0x165b   :  { %v2685_v3 = vsel %vm2684_vm6, %v2679_v21, %v2681_v38 }
0x165c   :  { %v2690_v33 = vadd.f32 %v2685_v3, %v2665_v24 }
0x165e   :  { %v2683_v60 = vpop.permute.xlu1 %2682  ;;  %v2704_v23 = vpop.permute.xlu0 %2703 }
0x165f   :  { %v2686_v34 = vsel %vm2684_vm6, %v2681_v38, %v2683_v60  ;;  %v2692_v11 = vadd.f32 %v2683_v60, %v2667_v29 }
0x1660   :  { %v2691_v36 = vadd.f32 %v2686_v34, %v2666_v31 }
0x1662   :  { %v2706_v53 = vpop.permute.xlu1 %2705  ;;  %v2708_v15 = vpop.permute.xlu0 %2707 }
0x1663   :  { %v2710_v4 = vsel %vm2709_vm7, %v2704_v23, %v2706_v53  ;;  %v2711_v12 = vsel %vm2709_vm7, %v2706_v53, %v2708_v15  ;;  %v2717_v39 = vadd.f32 %v2708_v15, %v2692_v11 }
0x1664   :  { %v2715_v20 = vadd.f32 %v2710_v4, %v2690_v33  ;;  %v2716_v47 = vadd.f32 %v2711_v12, %v2691_v36 }
0x1666   :  { %v2729_v48 = vpop.permute.xlu1 %2728  ;;  %v2731_v16 = vpop.permute.xlu0 %2730 }
0x1667   :  { %v2735_v40 = vsel %vm2734_vm8, %v2729_v48, %v2731_v16 }
0x1668   :  { %v2740_v7 = vadd.f32 %v2735_v40, %v2715_v20 }
0x166a   :  { %v2733_v8 = vpop.permute.xlu1 %2732 }
0x166b   :  { %v2736_v42 = vsel %vm2734_vm8, %v2731_v16, %v2733_v8  ;;  %v2742_v43 = vadd.f32 %v2733_v8, %v2717_v39 }
0x166c   :  { %v2741_v18 = vadd.f32 %v2736_v42, %v2716_v47 }
0x1677   :  { %v5096_v61 = vpop.permute.xlu0 %2492 }
0x167b   :  { %v5100_v45 = vpop.permute.xlu1 %2496  ;;  %v2756_v63 = vpop.permute.xlu0 %2755 }
0x167f   :  { %v2754_v6 = vpop.permute.xlu1 %2753  ;;  %v2822_v10 = vpop.permute.xlu0 %2821 }
0x1680   :  { %v2760_v46 = vsel %vm2759_vm9, %v2754_v6, %v2756_v63 }
0x1681   :  { %v2765_v50 = vadd.f32 %v2760_v46, %v2740_v7 }
0x1683   :  { %v2758_v30 = vpop.permute.xlu1 %2757  ;;  %v2783_v9 = vpop.permute.xlu0 %2782 }
0x1684   :  { %v2761_v32 = vsel %vm2759_vm9, %v2756_v63, %v2758_v30  ;;  %v2767_v49 = vadd.f32 %v2758_v30, %v2742_v43 }
0x1685   :  { %v2766_v54 = vadd.f32 %v2761_v32, %v2741_v18 }
0x1686   :  { %v2792_v55 = vadd.f32 %v2783_v9, %v2767_v49 }
0x1687   :  { %v2779_v35 = vpop.permute.xlu1 %2778  ;;  %v2806_v5 = vpop.permute.xlu0 %2805 }
0x168b   :  { %v2781_v13 = vpop.permute.xlu1 %2780 }
0x168c   :  { %v2785_v25 = vsel %vm2784_vm10, %v2779_v35, %v2781_v13  ;;  %v2786_v17 = vsel %vm2784_vm10, %v2781_v13, %v2783_v9 }
0x168d   :  { %v2790_v28 = vadd.f32 %v2785_v25, %v2765_v50  ;;  %v2791_v56 = vadd.f32 %v2786_v17, %v2766_v54 }
0x168f   :  { %v2804_v52 = vpop.permute.xlu1 %2803 }
0x1690   :  { %v2810_v37 = vsel %vm2809_vm11, %v2804_v52, %v2806_v5 }
0x1691   :  { %v2815_v51 = vadd.f32 %v2810_v37, %v2790_v28 }
0x1693   :  { %v2808_v57 = vpop.permute.xlu1 %2807  ;;  %v2824_v38 = vadd.f32 %v2822_v10, %v2815_v51 }
0x1694   :  { %v2811_v2 = vsel %vm2809_vm11, %v2806_v5, %v2808_v57  ;;  %v2817_v59 = vadd.f32 %v2808_v57, %v2792_v55 }
0x1695   :  { %v2816_v41 = vadd.f32 %v2811_v2, %v2791_v56 }
0x1696   :  { %v2826_v21 = vadd.f32 %v2822_v10, %v2817_v59 }
0x1697   :  { %v2825_v60 = vadd.f32 %v2822_v10, %v2816_v41 }
0x1698   :  { %2833 = vst.msk [vmem:[%s5124_s7 + $0x8] sm:$0xf] %vm2832_vm12, %v2826_v21 }
0x1699   :  { %v2829_v23 = vcombine.low %v2824_v38, %v2825_v60 }
0x169b   :  { %2831 = vst [vmem:[%s5124_s7] sm:$0xff] %v2829_v23 }
0x16a4   :  { %v3267_v53 = vpop.f32.mrb[28].mxu0 }
0x16a5   :  { %v2577_v15 = vadd.f32 %v3267_v53, %v5100_v45  ;;  %v2571_v48 = vpop.f32.mrb[29].mxu0 }
0x16a6   :  { %v2572_v16 = vadd.f32 %v2571_v48, %v5096_v61 }
0x16a7   :  { %vm2581_vm13 = vcmp.ge.f32.partialorder %v2577_v15, 0.0  ;;  %v2583_v8 = vmul.f32 0.25, %v2577_v15 }
0x16a8   :  { %vm2580_vm15 = vcmp.ge.f32.partialorder %v2572_v16, 0.0  ;;  %v2582_v58 = vmul.f32 0.25, %v2572_v16 }
0x16a9   :  { %v2585_v19 = vsel %vm2581_vm13, %v2577_v15, %v2583_v8 }
0x16aa   :  { %2588 = vst.msk [vmem:[%s5125_s8 + $0x8] sm:$0xff] %vm2586_vm14, %v2585_v19  ;;  %v2584_v22 = vsel %vm2580_vm15, %v2572_v16, %v2582_v58 }
0x16ab   :  { %2587 = vst.msk [vmem:[%s5125_s8] sm:$0xff] %vm2586_vm14, %v2584_v22 }

</bundles_post_ra>
